<compile_context>
chip_gen: v6e
topology: v6e:2x2x1
jax: 0.10.0
libtpu: 0.0.40
codegen_flags: <defaults>
</compile_context>

<pallas_src>
import functools

import jax
import jax.numpy as jnp
from jax.experimental import pallas as pl
from jax.experimental.pallas import tpu as pltpu


def mixunit_kernel(x_ref, w_exp_ref, bn1_b_ref, wdw_ref, bn2_b_ref,
                   w_se1_ref, b_se1_ref, w_se2_ref, b_se2_ref,
                   w_c2_ref, bn3_b_ref, o_ref, ypad_ref,
                   *, H, W, K, pad, cmid):
    wc_mid = W * cmid

    x = x_ref[0]                                    # (H, W*Cin) f32, lane-dense

    # ---- expansion: mixed 1x1 conv as W-block-diagonal packed matmul (BN1 scale
    #      folded into the weight); bf16 MXU operands, f32 accumulate; bias + ReLU
    #      in f32 on the VPU. ----
    y = jnp.dot(x.astype(jnp.bfloat16), w_exp_ref[...],
                preferred_element_type=jnp.float32)            # (H, W*Cmid)
    y = jnp.maximum(y + bn1_b_ref[...], 0.0)

    # ---- conv1: mixed depthwise conv (3x3 & 5x5 fused into KxK taps). ----
    # dy taps: sublane row offsets into the row-padded scratch (border rows zero).
    # dx taps: lane rotations by multiples of Cmid (XLU); W-boundary masks and the
    # BN2 scale are already folded into wdw_ref rows, so no in-kernel masking.
    ypad_ref[0:pad, :] = jnp.zeros((pad, wc_mid), jnp.float32)
    ypad_ref[pad + H:pad + H + pad, :] = jnp.zeros((pad, wc_mid), jnp.float32)
    ypad_ref[pad:pad + H, :] = y

    acc0 = jnp.zeros((H, wc_mid), jnp.float32)
    acc1 = jnp.zeros((H, wc_mid), jnp.float32)
    for dy in range(K):
        row = ypad_ref[dy:dy + H, :]                           # (H, W*Cmid)
        for dx in range(K):
            shift = ((pad - dx) * cmid) % wc_mid
            tap = row if shift == 0 else pltpu.roll(row, shift=shift, axis=1)
            idx = dy * K + dx
            w_tap = wdw_ref[idx:idx + 1, :]                    # (1, W*Cmid)
            if idx % 2 == 0:
                acc0 = acc0 + tap * w_tap
            else:
                acc1 = acc1 + tap * w_tap
    z = jnp.maximum(acc0 + acc1 + bn2_b_ref[...], 0.0)         # (H, W*Cmid)

    # ---- squeeze-excite ----
    # Global average pool fused into FC1: w_se1_ref = tile(w_se1, (W, 1)) / (H*W).
    # These FCs are tiny and MXU-hostile; accepted as-is.
    t = jnp.dot(z, w_se1_ref[...], preferred_element_type=jnp.float32)   # (H, Cse)
    h1 = jnp.maximum(jnp.sum(t, axis=0, keepdims=True) + b_se1_ref[...], 0.0)
    g = jax.nn.sigmoid(
        jnp.dot(h1, w_se2_ref[...], preferred_element_type=jnp.float32)
        + b_se2_ref[...])                                      # (1, W*Cmid), W-tiled
    zs = z * g

    # ---- conv2: mixed 1x1 projection (packed matmul, BN3 scale folded) + bias +
    #      residual add; lane-dense (H, W*Cout) store. ----
    o = jnp.dot(zs.astype(jnp.bfloat16), w_c2_ref[...],
                preferred_element_type=jnp.float32)            # (H, W*Cout)
    o_ref[0] = o + bn3_b_ref[...] + x


def mixunit_forward(x, p, *, K=5, pad=2):
    N, H, W, Cin = x.shape
    wc_in = W * Cin
    wc_mid = p["w_exp_packed"].shape[1]
    cmid = wc_mid // W
    wc_out = p["w_c2_packed"].shape[1]
    cout = wc_out // W

    # Row-major (N,H,W,C) -> (N,H,W*C) is a free relayout-less reshape; it gives
    # the kernel a lane-dense last dim (multiple of 128).
    x_packed = x.reshape(N, H, wc_in)

    kernel = functools.partial(mixunit_kernel, H=H, W=W, K=K, pad=pad, cmid=cmid)

    def rep(shape):
        nd = len(shape)
        return pl.BlockSpec(shape, lambda b, _nd=nd: (0,) * _nd)

    in_specs = [
        pl.BlockSpec((1, H, wc_in), lambda b: (b, 0, 0)),      # x (packed)
        rep(p["w_exp_packed"].shape),                          # (W*Cin, W*Cmid) bf16
        rep(p["bn1_b_packed"].shape),                          # (1, W*Cmid)
        rep(p["wdw_packed"].shape),                            # (K*K, W*Cmid)
        rep(p["bn2_b_packed"].shape),                          # (1, W*Cmid)
        rep(p["w_se1_pool"].shape),                            # (W*Cmid, Cse)
        rep(p["b_se1"].shape),                                 # (1, Cse)
        rep(p["w_se2_tiled"].shape),                           # (Cse, W*Cmid)
        rep(p["b_se2_tiled"].shape),                           # (1, W*Cmid)
        rep(p["w_c2_packed"].shape),                           # (W*Cmid, W*Cout) bf16
        rep(p["bn3_b_packed"].shape),                          # (1, W*Cout)
    ]
    out_specs = pl.BlockSpec((1, H, wc_out), lambda b: (b, 0, 0))

    out_packed = pl.pallas_call(
        kernel,
        out_shape=jax.ShapeDtypeStruct((N, H, wc_out), jnp.float32),
        grid_spec=pltpu.PrefetchScalarGridSpec(
            num_scalar_prefetch=0,
            grid=(N,),
            in_specs=in_specs,
            out_specs=out_specs,
            scratch_shapes=[pltpu.VMEM((H + 2 * pad, wc_mid), jnp.float32)],
        ),
        compiler_params=pltpu.CompilerParams(
            dimension_semantics=("parallel",),
            vmem_limit_bytes=32 * 1024 * 1024,
        ),
    )(x_packed, p["w_exp_packed"], p["bn1_b_packed"],
      p["wdw_packed"], p["bn2_b_packed"],
      p["w_se1_pool"], p["b_se1"], p["w_se2_tiled"], p["b_se2_tiled"],
      p["w_c2_packed"], p["bn3_b_packed"])
    return out_packed.reshape(N, H, W, cout)


# ------------------------ raw (module-style) parameters ------------------------

def split_channels(channels, kernel_count):
    s = [channels // kernel_count] * kernel_count
    s[0] += channels - sum(s)
    return s


def block_diag_weight(key, cin, cout, kernel_count, scale=0.1):
    # Equivalent to MixConv with 1x1 kernels: split in/out channels, one conv per
    # split, concat outputs == single block-diagonal (cin, cout) matmul.
    in_sp = split_channels(cin, kernel_count)
    out_sp = split_channels(cout, kernel_count)
    w = jnp.zeros((cin, cout), jnp.float32)
    keys = jax.random.split(key, kernel_count)
    io = oo = 0
    for k, (ci, co) in enumerate(zip(in_sp, out_sp)):
        blk = scale * jax.random.normal(keys[k], (ci, co), jnp.float32)
        w = w.at[io:io + ci, oo:oo + co].set(blk)
        io += ci
        oo += co
    return w


def mixed_dw_weight(key, cmid, kernel_sizes, K, scale=0.1):
    # Mixed depthwise kernels [3,5,...] zero-padded to a common KxK kernel
    # (same output as the per-group 'same' paddings used by MixConvBlock).
    splits = split_channels(cmid, len(kernel_sizes))
    w = jnp.zeros((K, K, cmid), jnp.float32)
    keys = jax.random.split(key, len(kernel_sizes))
    c0 = 0
    for i, (ks, cs) in enumerate(zip(kernel_sizes, splits)):
        blk = scale * jax.random.normal(keys[i], (ks, ks, cs), jnp.float32)
        off = (K - ks) // 2
        w = w.at[off:off + ks, off:off + ks, c0:c0 + cs].set(blk)
        c0 += cs
    return w


def bn_params(key, c, eps=1e-5):
    k1, k2, k3, k4 = jax.random.split(key, 4)
    gamma = 1.0 + 0.1 * jax.random.normal(k1, (c,), jnp.float32)
    beta = 0.1 * jax.random.normal(k2, (c,), jnp.float32)
    mean = 0.1 * jax.random.normal(k3, (c,), jnp.float32)
    var = 1.0 + 0.1 * jnp.abs(jax.random.normal(k4, (c,), jnp.float32))
    scale = gamma / jnp.sqrt(var + eps)
    bias = beta - mean * scale
    return scale.reshape(1, c), bias.reshape(1, c)


def make_raw_params(key, cin, cout, cmid, cse, K):
    ks = jax.random.split(key, 8)
    bn1_s, bn1_b = bn_params(ks[1], cmid)
    bn2_s, bn2_b = bn_params(ks[3], cmid)
    bn3_s, bn3_b = bn_params(ks[6], cout)
    return dict(
        w_exp=block_diag_weight(ks[0], cin, cmid, kernel_count=2),
        bn1_s=bn1_s, bn1_b=bn1_b,
        w_dw=mixed_dw_weight(ks[2], cmid, kernel_sizes=[3, 5], K=K),
        bn2_s=bn2_s, bn2_b=bn2_b,
        w_se1=0.1 * jax.random.normal(ks[4], (cmid, cse), jnp.float32),
        b_se1=0.1 * jax.random.normal(ks[4], (1, cse), jnp.float32),
        w_se2=0.1 * jax.random.normal(ks[5], (cse, cmid), jnp.float32),
        b_se2=0.1 * jax.random.normal(ks[5], (1, cmid), jnp.float32),
        w_c2=block_diag_weight(ks[7], cmid, cout, kernel_count=2),
        bn3_s=bn3_s, bn3_b=bn3_b,
    )


# ----------------- kernel-side packed / folded parameters (wrapper) ------------

def prepare_params(raw, H, W, K, pad):
    cmid = raw["w_exp"].shape[1]
    eye_w = jnp.eye(W, dtype=jnp.float32)

    # Fold BN scales into the preceding conv weights (inference-mode BN).
    w_exp_f = raw["w_exp"] * raw["bn1_s"]                    # (Cin, Cmid)
    w_c2_f = raw["w_c2"] * raw["bn3_s"]                      # (Cmid, Cout)
    wdw_f = raw["w_dw"] * raw["bn2_s"][0][None, None, :]     # (K, K, Cmid)

    # W-block-diagonal packing of the 1x1 convs for the lane-dense (H, W*C) layout.
    w_exp_packed = jnp.kron(eye_w, w_exp_f).astype(jnp.bfloat16)   # (W*Cin, W*Cmid)
    w_c2_packed = jnp.kron(eye_w, w_c2_f).astype(jnp.bfloat16)     # (W*Cmid, W*Cout)

    # Packed per-tap depthwise weights with the W-boundary mask folded in:
    # wdw_packed[dy*K+dx, w*Cmid + c] = wdw[dy,dx,c]*bn2_s[c] * [0 <= w+dx-pad < W]
    w_idx = jnp.arange(W)
    rows = []
    for dy in range(K):
        for dx in range(K):
            valid = ((w_idx + dx - pad >= 0) &
                     (w_idx + dx - pad < W)).astype(jnp.float32)
            rows.append(jnp.reshape(valid[:, None] * wdw_f[dy, dx][None, :],
                                    (W * cmid,)))
    wdw_packed = jnp.stack(rows, axis=0)                     # (K*K, W*Cmid)

    def tile_w(v):                                           # (r, C) -> (r, W*C)
        return jnp.tile(v, (1, W))

    return dict(
        w_exp_packed=w_exp_packed,
        bn1_b_packed=tile_w(raw["bn1_b"]),
        wdw_packed=wdw_packed,
        bn2_b_packed=tile_w(raw["bn2_b"]),
        w_se1_pool=jnp.tile(raw["w_se1"], (W, 1)) / float(H * W),   # (W*Cmid, Cse)
        b_se1=raw["b_se1"],
        w_se2_tiled=tile_w(raw["w_se2"]),                    # (Cse, W*Cmid)
        b_se2_tiled=tile_w(raw["b_se2"]),
        w_c2_packed=w_c2_packed,
        bn3_b_packed=tile_w(raw["bn3_b"]),
    )


# --------------------------- pure-JAX reference (check) ------------------------

def mixunit_reference(x, p, K=5, pad=2):
    N, H, W, _ = x.shape
    Cmid = p["w_exp"].shape[1]
    y = jnp.einsum("nhwc,cd->nhwd", x, p["w_exp"])
    y = jnp.maximum(y * p["bn1_s"][0] + p["bn1_b"][0], 0.0)
    ypad = jnp.pad(y, ((0, 0), (pad, pad), (pad, pad), (0, 0)))
    acc = jnp.zeros((N, H, W, Cmid), jnp.float32)
    for dy in range(K):
        for dx in range(K):
            acc = acc + ypad[:, dy:dy + H, dx:dx + W, :] * p["w_dw"][dy, dx]
    z = jnp.maximum(acc * p["bn2_s"][0] + p["bn2_b"][0], 0.0)
    s = jnp.mean(z, axis=(1, 2))
    h = jnp.maximum(s @ p["w_se1"] + p["b_se1"][0], 0.0)
    g = jax.nn.sigmoid(h @ p["w_se2"] + p["b_se2"][0])
    z = z * g[:, None, None, :]
    o = jnp.einsum("nhwc,cd->nhwd", z, p["w_c2"])
    o = o * p["bn3_s"][0] + p["bn3_b"][0]
    return o + x


if __name__ == "__main__":
    N, H, W = 2, 16, 16
    Cin = Cout = 16
    exp_factor, se_factor = 2, 2
    Cmid = exp_factor * Cin                      # 32
    Cse = Cmid // (exp_factor * se_factor)       # 8
    K, pad = 5, 2                                # max mixed depthwise kernel

    key = jax.random.PRNGKey(0)
    kx, kp = jax.random.split(key)
    x = jax.random.normal(kx, (N, H, W, Cin), jnp.float32)
    raw = make_raw_params(kp, Cin, Cout, Cmid, Cse, K)
    params = prepare_params(raw, H, W, K, pad)

    out = mixunit_forward(x, params, K=K, pad=pad)
    out = jax.block_until_ready(out)

    ref = mixunit_reference(x, raw, K=K, pad=pad)
    assert out.shape == (N, H, W, Cout)
    # Kernel uses bf16 MXU operands (f32 accumulate) for the two 1x1 convs; the
    # reference is pure f32, so allow bf16-rounding-level differences.
    err = float(jnp.max(jnp.abs(out - ref)))
    assert err < 2e-2, err

    print("KERNEL_OK")
</pallas_src>

<mosaic_0001>
module attributes {stable_mosaic.version = 11 : i64} {
  func.func @mixunit_kernel(%arg0: i32, %arg1: memref<1x16x256xf32, #tpu.memory_space<vmem>>, %arg2: memref<256x512xbf16, #tpu.memory_space<vmem>>, %arg3: memref<1x512xf32, #tpu.memory_space<vmem>>, %arg4: memref<25x512xf32, #tpu.memory_space<vmem>>, %arg5: memref<1x512xf32, #tpu.memory_space<vmem>>, %arg6: memref<512x8xf32, #tpu.memory_space<vmem>>, %arg7: memref<1x8xf32, #tpu.memory_space<vmem>>, %arg8: memref<8x512xf32, #tpu.memory_space<vmem>>, %arg9: memref<1x512xf32, #tpu.memory_space<vmem>>, %arg10: memref<512x256xbf16, #tpu.memory_space<vmem>>, %arg11: memref<1x256xf32, #tpu.memory_space<vmem>>, %arg12: memref<1x16x256xf32, #tpu.memory_space<vmem>>, %arg13: memref<20x512xf32, #tpu.memory_space<vmem>>) attributes {dimension_semantics = [#tpu.dimension_semantics<parallel>], iteration_bounds = array<i64: 2>, scalar_prefetch = 0 : i64, scratch_operands = 1 : i64, tpu.core_type = #tpu.core_type<tc>, window_params = [{transform_indices = @transform_0, window_bounds = array<i64: 1, 16, 256>}, {pipeline_mode = #tpu.pipeline_mode<synchronous>, transform_indices = @transform_1, window_bounds = array<i64: 256, 512>}, {pipeline_mode = #tpu.pipeline_mode<synchronous>, transform_indices = @transform_2, window_bounds = array<i64: 1, 512>}, {pipeline_mode = #tpu.pipeline_mode<synchronous>, transform_indices = @transform_3, window_bounds = array<i64: 25, 512>}, {pipeline_mode = #tpu.pipeline_mode<synchronous>, transform_indices = @transform_4, window_bounds = array<i64: 1, 512>}, {pipeline_mode = #tpu.pipeline_mode<synchronous>, transform_indices = @transform_5, window_bounds = array<i64: 512, 8>}, {pipeline_mode = #tpu.pipeline_mode<synchronous>, transform_indices = @transform_6, window_bounds = array<i64: 1, 8>}, {pipeline_mode = #tpu.pipeline_mode<synchronous>, transform_indices = @transform_7, window_bounds = array<i64: 8, 512>}, {pipeline_mode = #tpu.pipeline_mode<synchronous>, transform_indices = @transform_8, window_bounds = array<i64: 1, 512>}, {pipeline_mode = #tpu.pipeline_mode<synchronous>, transform_indices = @transform_9, window_bounds = array<i64: 512, 256>}, {pipeline_mode = #tpu.pipeline_mode<synchronous>, transform_indices = @transform_10, window_bounds = array<i64: 1, 256>}, {transform_indices = @transform_11, window_bounds = array<i64: 1, 16, 256>}]} {
    %c0 = arith.constant 0 : index
    %c0_0 = arith.constant 0 : index
    %c0_1 = arith.constant 0 : index
    %0 = vector.load %arg1[%c0, %c0_0, %c0_1] : memref<1x16x256xf32, #tpu.memory_space<vmem>>, vector<1x16x256xf32>
    %1 = vector.shape_cast %0 : vector<1x16x256xf32> to vector<16x256xf32>
    %2 = arith.truncf %1 : vector<16x256xf32> to vector<16x256xbf16>
    %c0_2 = arith.constant 0 : index
    %c0_3 = arith.constant 0 : index
    %3 = vector.load %arg2[%c0_2, %c0_3] : memref<256x512xbf16, #tpu.memory_space<vmem>>, vector<256x512xbf16>
    %cst = arith.constant dense<0.000000e+00> : vector<16x512xf32>
    %4 = tpu.matmul %2, %3, %cst {dimension_numbers = #tpu.dot_dimension_numbers<[1], [0], [0], [1], [0, 0, 1, 1], [], []>} : vector<16x256xbf16>, vector<256x512xbf16>, vector<16x512xf32> -> vector<16x512xf32>
    %c0_4 = arith.constant 0 : index
    %c0_5 = arith.constant 0 : index
    %5 = vector.load %arg3[%c0_4, %c0_5] : memref<1x512xf32, #tpu.memory_space<vmem>>, vector<1x512xf32>
    %6 = vector.broadcast %5 : vector<1x512xf32> to vector<16x512xf32>
    %7 = arith.addf %4, %6 : vector<16x512xf32>
    %cst_6 = arith.constant 0.000000e+00 : f32
    %8 = vector.broadcast %cst_6 : f32 to vector<16x512xf32>
    %9 = arith.maximumf %7, %8 : vector<16x512xf32>
    %cst_7 = arith.constant 0.000000e+00 : f32
    %10 = vector.broadcast %cst_7 : f32 to vector<2x512xf32>
    %c0_8 = arith.constant 0 : index
    %c0_9 = arith.constant 0 : index
    %11 = vector.load %arg13[%c0_8, %c0_9] : memref<20x512xf32, #tpu.memory_space<vmem>>, vector<2x512xf32>
    tpu.vector_store %arg13[%c0_8, %c0_9], %10 {strides = array<i32>} : memref<20x512xf32, #tpu.memory_space<vmem>>, vector<2x512xf32>,
    %cst_10 = arith.constant 0.000000e+00 : f32
    %12 = vector.broadcast %cst_10 : f32 to vector<2x512xf32>
    %c18 = arith.constant 18 : index
    %c0_11 = arith.constant 0 : index
    %13 = vector.load %arg13[%c18, %c0_11] : memref<20x512xf32, #tpu.memory_space<vmem>>, vector<2x512xf32>
    tpu.vector_store %arg13[%c18, %c0_11], %12 {strides = array<i32>} : memref<20x512xf32, #tpu.memory_space<vmem>>, vector<2x512xf32>,
    %c2 = arith.constant 2 : index
    %c0_12 = arith.constant 0 : index
    %14 = vector.load %arg13[%c2, %c0_12] : memref<20x512xf32, #tpu.memory_space<vmem>>, vector<16x512xf32>
    tpu.vector_store %arg13[%c2, %c0_12], %9 {strides = array<i32>} : memref<20x512xf32, #tpu.memory_space<vmem>>, vector<16x512xf32>,
    %cst_13 = arith.constant 0.000000e+00 : f32
    %15 = vector.broadcast %cst_13 : f32 to vector<16x512xf32>
    %cst_14 = arith.constant 0.000000e+00 : f32
    %16 = vector.broadcast %cst_14 : f32 to vector<16x512xf32>
    %c0_15 = arith.constant 0 : index
    %c0_16 = arith.constant 0 : index
    %17 = vector.load %arg13[%c0_15, %c0_16] : memref<20x512xf32, #tpu.memory_space<vmem>>, vector<16x512xf32>
    %c64_i32 = arith.constant 64 : i32
    %18 = tpu.dynamic_rotate %17 by %c64_i32 dim 1 : vector<16x512xf32>, i32 -> vector<16x512xf32>
    %c0_17 = arith.constant 0 : index
    %c0_18 = arith.constant 0 : index
    %19 = vector.load %arg4[%c0_17, %c0_18] : memref<25x512xf32, #tpu.memory_space<vmem>>, vector<1x512xf32>
    %20 = vector.broadcast %19 : vector<1x512xf32> to vector<16x512xf32>
    %21 = arith.mulf %18, %20 : vector<16x512xf32>
    %22 = arith.addf %15, %21 : vector<16x512xf32>
    %c32_i32 = arith.constant 32 : i32
    %23 = tpu.dynamic_rotate %17 by %c32_i32 dim 1 : vector<16x512xf32>, i32 -> vector<16x512xf32>
    %c1 = arith.constant 1 : index
    %c0_19 = arith.constant 0 : index
    %24 = vector.load %arg4[%c1, %c0_19] : memref<25x512xf32, #tpu.memory_space<vmem>>, vector<1x512xf32>
    %25 = vector.broadcast %24 : vector<1x512xf32> to vector<16x512xf32>
    %26 = arith.mulf %23, %25 : vector<16x512xf32>
    %27 = arith.addf %16, %26 : vector<16x512xf32>
    %c2_20 = arith.constant 2 : index
    %c0_21 = arith.constant 0 : index
    %28 = vector.load %arg4[%c2_20, %c0_21] : memref<25x512xf32, #tpu.memory_space<vmem>>, vector<1x512xf32>
    %29 = vector.broadcast %28 : vector<1x512xf32> to vector<16x512xf32>
    %30 = arith.mulf %17, %29 : vector<16x512xf32>
    %31 = arith.addf %22, %30 : vector<16x512xf32>
    %c480_i32 = arith.constant 480 : i32
    %32 = tpu.dynamic_rotate %17 by %c480_i32 dim 1 : vector<16x512xf32>, i32 -> vector<16x512xf32>
    %c3 = arith.constant 3 : index
    %c0_22 = arith.constant 0 : index
    %33 = vector.load %arg4[%c3, %c0_22] : memref<25x512xf32, #tpu.memory_space<vmem>>, vector<1x512xf32>
    %34 = vector.broadcast %33 : vector<1x512xf32> to vector<16x512xf32>
    %35 = arith.mulf %32, %34 : vector<16x512xf32>
    %36 = arith.addf %27, %35 : vector<16x512xf32>
    %c448_i32 = arith.constant 448 : i32
    %37 = tpu.dynamic_rotate %17 by %c448_i32 dim 1 : vector<16x512xf32>, i32 -> vector<16x512xf32>
    %c4 = arith.constant 4 : index
    %c0_23 = arith.constant 0 : index
    %38 = vector.load %arg4[%c4, %c0_23] : memref<25x512xf32, #tpu.memory_space<vmem>>, vector<1x512xf32>
    %39 = vector.broadcast %38 : vector<1x512xf32> to vector<16x512xf32>
    %40 = arith.mulf %37, %39 : vector<16x512xf32>
    %41 = arith.addf %31, %40 : vector<16x512xf32>
    %c1_24 = arith.constant 1 : index
    %c0_25 = arith.constant 0 : index
    %42 = vector.load %arg13[%c1_24, %c0_25] : memref<20x512xf32, #tpu.memory_space<vmem>>, vector<16x512xf32>
    %c64_i32_26 = arith.constant 64 : i32
    %43 = tpu.dynamic_rotate %42 by %c64_i32_26 dim 1 : vector<16x512xf32>, i32 -> vector<16x512xf32>
    %c5 = arith.constant 5 : index
    %c0_27 = arith.constant 0 : index
    %44 = vector.load %arg4[%c5, %c0_27] : memref<25x512xf32, #tpu.memory_space<vmem>>, vector<1x512xf32>
    %45 = vector.broadcast %44 : vector<1x512xf32> to vector<16x512xf32>
    %46 = arith.mulf %43, %45 : vector<16x512xf32>
    %47 = arith.addf %36, %46 : vector<16x512xf32>
    %c32_i32_28 = arith.constant 32 : i32
    %48 = tpu.dynamic_rotate %42 by %c32_i32_28 dim 1 : vector<16x512xf32>, i32 -> vector<16x512xf32>
    %c6 = arith.constant 6 : index
    %c0_29 = arith.constant 0 : index
    %49 = vector.load %arg4[%c6, %c0_29] : memref<25x512xf32, #tpu.memory_space<vmem>>, vector<1x512xf32>
    %50 = vector.broadcast %49 : vector<1x512xf32> to vector<16x512xf32>
    %51 = arith.mulf %48, %50 : vector<16x512xf32>
    %52 = arith.addf %41, %51 : vector<16x512xf32>
    %c7 = arith.constant 7 : index
    %c0_30 = arith.constant 0 : index
    %53 = vector.load %arg4[%c7, %c0_30] : memref<25x512xf32, #tpu.memory_space<vmem>>, vector<1x512xf32>
    %54 = vector.broadcast %53 : vector<1x512xf32> to vector<16x512xf32>
    %55 = arith.mulf %42, %54 : vector<16x512xf32>
    %56 = arith.addf %47, %55 : vector<16x512xf32>
    %c480_i32_31 = arith.constant 480 : i32
    %57 = tpu.dynamic_rotate %42 by %c480_i32_31 dim 1 : vector<16x512xf32>, i32 -> vector<16x512xf32>
    %c8 = arith.constant 8 : index
    %c0_32 = arith.constant 0 : index
    %58 = vector.load %arg4[%c8, %c0_32] : memref<25x512xf32, #tpu.memory_space<vmem>>, vector<1x512xf32>
    %59 = vector.broadcast %58 : vector<1x512xf32> to vector<16x512xf32>
    %60 = arith.mulf %57, %59 : vector<16x512xf32>
    %61 = arith.addf %52, %60 : vector<16x512xf32>
    %c448_i32_33 = arith.constant 448 : i32
    %62 = tpu.dynamic_rotate %42 by %c448_i32_33 dim 1 : vector<16x512xf32>, i32 -> vector<16x512xf32>
    %c9 = arith.constant 9 : index
    %c0_34 = arith.constant 0 : index
    %63 = vector.load %arg4[%c9, %c0_34] : memref<25x512xf32, #tpu.memory_space<vmem>>, vector<1x512xf32>
    %64 = vector.broadcast %63 : vector<1x512xf32> to vector<16x512xf32>
    %65 = arith.mulf %62, %64 : vector<16x512xf32>
    %66 = arith.addf %56, %65 : vector<16x512xf32>
    %c2_35 = arith.constant 2 : index
    %c0_36 = arith.constant 0 : index
    %67 = vector.load %arg13[%c2_35, %c0_36] : memref<20x512xf32, #tpu.memory_space<vmem>>, vector<16x512xf32>
    %c64_i32_37 = arith.constant 64 : i32
    %68 = tpu.dynamic_rotate %67 by %c64_i32_37 dim 1 : vector<16x512xf32>, i32 -> vector<16x512xf32>
    %c10 = arith.constant 10 : index
    %c0_38 = arith.constant 0 : index
    %69 = vector.load %arg4[%c10, %c0_38] : memref<25x512xf32, #tpu.memory_space<vmem>>, vector<1x512xf32>
    %70 = vector.broadcast %69 : vector<1x512xf32> to vector<16x512xf32>
    %71 = arith.mulf %68, %70 : vector<16x512xf32>
    %72 = arith.addf %61, %71 : vector<16x512xf32>
    %c32_i32_39 = arith.constant 32 : i32
    %73 = tpu.dynamic_rotate %67 by %c32_i32_39 dim 1 : vector<16x512xf32>, i32 -> vector<16x512xf32>
    %c11 = arith.constant 11 : index
    %c0_40 = arith.constant 0 : index
    %74 = vector.load %arg4[%c11, %c0_40] : memref<25x512xf32, #tpu.memory_space<vmem>>, vector<1x512xf32>
    %75 = vector.broadcast %74 : vector<1x512xf32> to vector<16x512xf32>
    %76 = arith.mulf %73, %75 : vector<16x512xf32>
    %77 = arith.addf %66, %76 : vector<16x512xf32>
    %c12 = arith.constant 12 : index
    %c0_41 = arith.constant 0 : index
    %78 = vector.load %arg4[%c12, %c0_41] : memref<25x512xf32, #tpu.memory_space<vmem>>, vector<1x512xf32>
    %79 = vector.broadcast %78 : vector<1x512xf32> to vector<16x512xf32>
    %80 = arith.mulf %67, %79 : vector<16x512xf32>
    %81 = arith.addf %72, %80 : vector<16x512xf32>
    %c480_i32_42 = arith.constant 480 : i32
    %82 = tpu.dynamic_rotate %67 by %c480_i32_42 dim 1 : vector<16x512xf32>, i32 -> vector<16x512xf32>
    %c13 = arith.constant 13 : index
    %c0_43 = arith.constant 0 : index
    %83 = vector.load %arg4[%c13, %c0_43] : memref<25x512xf32, #tpu.memory_space<vmem>>, vector<1x512xf32>
    %84 = vector.broadcast %83 : vector<1x512xf32> to vector<16x512xf32>
    %85 = arith.mulf %82, %84 : vector<16x512xf32>
    %86 = arith.addf %77, %85 : vector<16x512xf32>
    %c448_i32_44 = arith.constant 448 : i32
    %87 = tpu.dynamic_rotate %67 by %c448_i32_44 dim 1 : vector<16x512xf32>, i32 -> vector<16x512xf32>
    %c14 = arith.constant 14 : index
    %c0_45 = arith.constant 0 : index
    %88 = vector.load %arg4[%c14, %c0_45] : memref<25x512xf32, #tpu.memory_space<vmem>>, vector<1x512xf32>
    %89 = vector.broadcast %88 : vector<1x512xf32> to vector<16x512xf32>
    %90 = arith.mulf %87, %89 : vector<16x512xf32>
    %91 = arith.addf %81, %90 : vector<16x512xf32>
    %c3_46 = arith.constant 3 : index
    %c0_47 = arith.constant 0 : index
    %92 = vector.load %arg13[%c3_46, %c0_47] : memref<20x512xf32, #tpu.memory_space<vmem>>, vector<16x512xf32>
    %c64_i32_48 = arith.constant 64 : i32
    %93 = tpu.dynamic_rotate %92 by %c64_i32_48 dim 1 : vector<16x512xf32>, i32 -> vector<16x512xf32>
    %c15 = arith.constant 15 : index
    %c0_49 = arith.constant 0 : index
    %94 = vector.load %arg4[%c15, %c0_49] : memref<25x512xf32, #tpu.memory_space<vmem>>, vector<1x512xf32>
    %95 = vector.broadcast %94 : vector<1x512xf32> to vector<16x512xf32>
    %96 = arith.mulf %93, %95 : vector<16x512xf32>
    %97 = arith.addf %86, %96 : vector<16x512xf32>
    %c32_i32_50 = arith.constant 32 : i32
    %98 = tpu.dynamic_rotate %92 by %c32_i32_50 dim 1 : vector<16x512xf32>, i32 -> vector<16x512xf32>
    %c16 = arith.constant 16 : index
    %c0_51 = arith.constant 0 : index
    %99 = vector.load %arg4[%c16, %c0_51] : memref<25x512xf32, #tpu.memory_space<vmem>>, vector<1x512xf32>
    %100 = vector.broadcast %99 : vector<1x512xf32> to vector<16x512xf32>
    %101 = arith.mulf %98, %100 : vector<16x512xf32>
    %102 = arith.addf %91, %101 : vector<16x512xf32>
    %c17 = arith.constant 17 : index
    %c0_52 = arith.constant 0 : index
    %103 = vector.load %arg4[%c17, %c0_52] : memref<25x512xf32, #tpu.memory_space<vmem>>, vector<1x512xf32>
    %104 = vector.broadcast %103 : vector<1x512xf32> to vector<16x512xf32>
    %105 = arith.mulf %92, %104 : vector<16x512xf32>
    %106 = arith.addf %97, %105 : vector<16x512xf32>
    %c480_i32_53 = arith.constant 480 : i32
    %107 = tpu.dynamic_rotate %92 by %c480_i32_53 dim 1 : vector<16x512xf32>, i32 -> vector<16x512xf32>
    %c18_54 = arith.constant 18 : index
    %c0_55 = arith.constant 0 : index
    %108 = vector.load %arg4[%c18_54, %c0_55] : memref<25x512xf32, #tpu.memory_space<vmem>>, vector<1x512xf32>
    %109 = vector.broadcast %108 : vector<1x512xf32> to vector<16x512xf32>
    %110 = arith.mulf %107, %109 : vector<16x512xf32>
    %111 = arith.addf %102, %110 : vector<16x512xf32>
    %c448_i32_56 = arith.constant 448 : i32
    %112 = tpu.dynamic_rotate %92 by %c448_i32_56 dim 1 : vector<16x512xf32>, i32 -> vector<16x512xf32>
    %c19 = arith.constant 19 : index
    %c0_57 = arith.constant 0 : index
    %113 = vector.load %arg4[%c19, %c0_57] : memref<25x512xf32, #tpu.memory_space<vmem>>, vector<1x512xf32>
    %114 = vector.broadcast %113 : vector<1x512xf32> to vector<16x512xf32>
    %115 = arith.mulf %112, %114 : vector<16x512xf32>
    %116 = arith.addf %106, %115 : vector<16x512xf32>
    %c4_58 = arith.constant 4 : index
    %c0_59 = arith.constant 0 : index
    %117 = vector.load %arg13[%c4_58, %c0_59] : memref<20x512xf32, #tpu.memory_space<vmem>>, vector<16x512xf32>
    %c64_i32_60 = arith.constant 64 : i32
    %118 = tpu.dynamic_rotate %117 by %c64_i32_60 dim 1 : vector<16x512xf32>, i32 -> vector<16x512xf32>
    %c20 = arith.constant 20 : index
    %c0_61 = arith.constant 0 : index
    %119 = vector.load %arg4[%c20, %c0_61] : memref<25x512xf32, #tpu.memory_space<vmem>>, vector<1x512xf32>
    %120 = vector.broadcast %119 : vector<1x512xf32> to vector<16x512xf32>
    %121 = arith.mulf %118, %120 : vector<16x512xf32>
    %122 = arith.addf %111, %121 : vector<16x512xf32>
    %c32_i32_62 = arith.constant 32 : i32
    %123 = tpu.dynamic_rotate %117 by %c32_i32_62 dim 1 : vector<16x512xf32>, i32 -> vector<16x512xf32>
    %c21 = arith.constant 21 : index
    %c0_63 = arith.constant 0 : index
    %124 = vector.load %arg4[%c21, %c0_63] : memref<25x512xf32, #tpu.memory_space<vmem>>, vector<1x512xf32>
    %125 = vector.broadcast %124 : vector<1x512xf32> to vector<16x512xf32>
    %126 = arith.mulf %123, %125 : vector<16x512xf32>
    %127 = arith.addf %116, %126 : vector<16x512xf32>
    %c22 = arith.constant 22 : index
    %c0_64 = arith.constant 0 : index
    %128 = vector.load %arg4[%c22, %c0_64] : memref<25x512xf32, #tpu.memory_space<vmem>>, vector<1x512xf32>
    %129 = vector.broadcast %128 : vector<1x512xf32> to vector<16x512xf32>
    %130 = arith.mulf %117, %129 : vector<16x512xf32>
    %131 = arith.addf %122, %130 : vector<16x512xf32>
    %c480_i32_65 = arith.constant 480 : i32
    %132 = tpu.dynamic_rotate %117 by %c480_i32_65 dim 1 : vector<16x512xf32>, i32 -> vector<16x512xf32>
    %c23 = arith.constant 23 : index
    %c0_66 = arith.constant 0 : index
    %133 = vector.load %arg4[%c23, %c0_66] : memref<25x512xf32, #tpu.memory_space<vmem>>, vector<1x512xf32>
    %134 = vector.broadcast %133 : vector<1x512xf32> to vector<16x512xf32>
    %135 = arith.mulf %132, %134 : vector<16x512xf32>
    %136 = arith.addf %127, %135 : vector<16x512xf32>
    %c448_i32_67 = arith.constant 448 : i32
    %137 = tpu.dynamic_rotate %117 by %c448_i32_67 dim 1 : vector<16x512xf32>, i32 -> vector<16x512xf32>
    %c24 = arith.constant 24 : index
    %c0_68 = arith.constant 0 : index
    %138 = vector.load %arg4[%c24, %c0_68] : memref<25x512xf32, #tpu.memory_space<vmem>>, vector<1x512xf32>
    %139 = vector.broadcast %138 : vector<1x512xf32> to vector<16x512xf32>
    %140 = arith.mulf %137, %139 : vector<16x512xf32>
    %141 = arith.addf %131, %140 : vector<16x512xf32>
    %142 = arith.addf %141, %136 : vector<16x512xf32>
    %c0_69 = arith.constant 0 : index
    %c0_70 = arith.constant 0 : index
    %143 = vector.load %arg5[%c0_69, %c0_70] : memref<1x512xf32, #tpu.memory_space<vmem>>, vector<1x512xf32>
    %144 = vector.broadcast %143 : vector<1x512xf32> to vector<16x512xf32>
    %145 = arith.addf %142, %144 : vector<16x512xf32>
    %cst_71 = arith.constant 0.000000e+00 : f32
    %146 = vector.broadcast %cst_71 : f32 to vector<16x512xf32>
    %147 = arith.maximumf %145, %146 : vector<16x512xf32>
    %c0_72 = arith.constant 0 : index
    %c0_73 = arith.constant 0 : index
    %148 = vector.load %arg6[%c0_72, %c0_73] : memref<512x8xf32, #tpu.memory_space<vmem>>, vector<512x8xf32>
    %cst_74 = arith.constant dense<0.000000e+00> : vector<16x8xf32>
    %149 = tpu.matmul %147, %148, %cst_74 {dimension_numbers = #tpu.dot_dimension_numbers<[1], [0], [0], [1], [0, 0, 1, 1], [], []>} : vector<16x512xf32>, vector<512x8xf32>, vector<16x8xf32> -> vector<16x8xf32>
    %cst_75 = arith.constant dense<0.000000e+00> : vector<8xf32>
    %150 = vector.multi_reduction <add>, %149, %cst_75 [0] : vector<16x8xf32> to vector<8xf32>
    %151 = vector.shape_cast %150 : vector<8xf32> to vector<1x8xf32>
    %c0_76 = arith.constant 0 : index
    %c0_77 = arith.constant 0 : index
    %152 = vector.load %arg7[%c0_76, %c0_77] : memref<1x8xf32, #tpu.memory_space<vmem>>, vector<1x8xf32>
    %153 = arith.addf %151, %152 : vector<1x8xf32>
    %cst_78 = arith.constant 0.000000e+00 : f32
    %154 = vector.broadcast %cst_78 : f32 to vector<1x8xf32>
    %155 = arith.maximumf %153, %154 : vector<1x8xf32>
    %c0_79 = arith.constant 0 : index
    %c0_80 = arith.constant 0 : index
    %156 = vector.load %arg8[%c0_79, %c0_80] : memref<8x512xf32, #tpu.memory_space<vmem>>, vector<8x512xf32>
    %cst_81 = arith.constant dense<0.000000e+00> : vector<1x512xf32>
    %157 = tpu.matmul %155, %156, %cst_81 {dimension_numbers = #tpu.dot_dimension_numbers<[1], [0], [0], [1], [0, 0, 1, 1], [], []>} : vector<1x8xf32>, vector<8x512xf32>, vector<1x512xf32> -> vector<1x512xf32>
    %c0_82 = arith.constant 0 : index
    %c0_83 = arith.constant 0 : index
    %158 = vector.load %arg9[%c0_82, %c0_83] : memref<1x512xf32, #tpu.memory_space<vmem>>, vector<1x512xf32>
    %159 = arith.addf %157, %158 : vector<1x512xf32>
    %160 = arith.negf %159 : vector<1x512xf32>
    %161 = math.exp %160 : vector<1x512xf32>
    %cst_84 = arith.constant 1.000000e+00 : f32
    %162 = vector.broadcast %cst_84 : f32 to vector<1x512xf32>
    %163 = arith.addf %162, %161 : vector<1x512xf32>
    %164 = arith.divf %162, %163 : vector<1x512xf32>
    %165 = vector.broadcast %164 : vector<1x512xf32> to vector<16x512xf32>
    %166 = arith.mulf %147, %165 : vector<16x512xf32>
    %167 = arith.truncf %166 : vector<16x512xf32> to vector<16x512xbf16>
    %c0_85 = arith.constant 0 : index
    %c0_86 = arith.constant 0 : index
    %168 = vector.load %arg10[%c0_85, %c0_86] : memref<512x256xbf16, #tpu.memory_space<vmem>>, vector<512x256xbf16>
    %cst_87 = arith.constant dense<0.000000e+00> : vector<16x256xf32>
    %169 = tpu.matmul %167, %168, %cst_87 {dimension_numbers = #tpu.dot_dimension_numbers<[1], [0], [0], [1], [0, 0, 1, 1], [], []>} : vector<16x512xbf16>, vector<512x256xbf16>, vector<16x256xf32> -> vector<16x256xf32>
    %c0_88 = arith.constant 0 : index
    %c0_89 = arith.constant 0 : index
    %170 = vector.load %arg11[%c0_88, %c0_89] : memref<1x256xf32, #tpu.memory_space<vmem>>, vector<1x256xf32>
    %171 = vector.broadcast %170 : vector<1x256xf32> to vector<16x256xf32>
    %172 = arith.addf %169, %171 : vector<16x256xf32>
    %173 = arith.addf %172, %1 : vector<16x256xf32>
    %c0_90 = arith.constant 0 : index
    %c0_91 = arith.constant 0 : index
    %c0_92 = arith.constant 0 : index
    %174 = vector.load %arg12[%c0_90, %c0_91, %c0_92] : memref<1x16x256xf32, #tpu.memory_space<vmem>>, vector<1x16x256xf32>
    %175 = vector.shape_cast %174 : vector<1x16x256xf32> to vector<16x256xf32>
    %176 = vector.shape_cast %173 : vector<16x256xf32> to vector<1x16x256xf32>
    tpu.vector_store %arg12[%c0_90, %c0_91, %c0_92], %176 {strides = array<i32>} : memref<1x16x256xf32, #tpu.memory_space<vmem>>, vector<1x16x256xf32>,
    return
  }
  func.func @transform_0(%arg0: i32) -> (i32, i32, i32) {
    %c0_i32 = arith.constant 0 : i32
    %c0_i32_0 = arith.constant 0 : i32
    %c0_i32_1 = arith.constant 0 : i32
    return %arg0, %c0_i32, %c0_i32_0 : i32, i32, i32
  }
  func.func @transform_1(%arg0: i32) -> (i32, i32) {
    %c0_i32 = arith.constant 0 : i32
    %c0_i32_0 = arith.constant 0 : i32
    %c0_i32_1 = arith.constant 0 : i32
    return %c0_i32, %c0_i32_0 : i32, i32
  }
  func.func @transform_2(%arg0: i32) -> (i32, i32) {
    %c0_i32 = arith.constant 0 : i32
    %c0_i32_0 = arith.constant 0 : i32
    %c0_i32_1 = arith.constant 0 : i32
    return %c0_i32, %c0_i32_0 : i32, i32
  }
  func.func @transform_3(%arg0: i32) -> (i32, i32) {
    %c0_i32 = arith.constant 0 : i32
    %c0_i32_0 = arith.constant 0 : i32
    %c0_i32_1 = arith.constant 0 : i32
    return %c0_i32, %c0_i32_0 : i32, i32
  }
  func.func @transform_4(%arg0: i32) -> (i32, i32) {
    %c0_i32 = arith.constant 0 : i32
    %c0_i32_0 = arith.constant 0 : i32
    %c0_i32_1 = arith.constant 0 : i32
    return %c0_i32, %c0_i32_0 : i32, i32
  }
  func.func @transform_5(%arg0: i32) -> (i32, i32) {
    %c0_i32 = arith.constant 0 : i32
    %c0_i32_0 = arith.constant 0 : i32
    %c0_i32_1 = arith.constant 0 : i32
    return %c0_i32, %c0_i32_0 : i32, i32
  }
  func.func @transform_6(%arg0: i32) -> (i32, i32) {
    %c0_i32 = arith.constant 0 : i32
    %c0_i32_0 = arith.constant 0 : i32
    %c0_i32_1 = arith.constant 0 : i32
    return %c0_i32, %c0_i32_0 : i32, i32
  }
  func.func @transform_7(%arg0: i32) -> (i32, i32) {
    %c0_i32 = arith.constant 0 : i32
    %c0_i32_0 = arith.constant 0 : i32
    %c0_i32_1 = arith.constant 0 : i32
    return %c0_i32, %c0_i32_0 : i32, i32
  }
  func.func @transform_8(%arg0: i32) -> (i32, i32) {
    %c0_i32 = arith.constant 0 : i32
    %c0_i32_0 = arith.constant 0 : i32
    %c0_i32_1 = arith.constant 0 : i32
    return %c0_i32, %c0_i32_0 : i32, i32
  }
  func.func @transform_9(%arg0: i32) -> (i32, i32) {
    %c0_i32 = arith.constant 0 : i32
    %c0_i32_0 = arith.constant 0 : i32
    %c0_i32_1 = arith.constant 0 : i32
    return %c0_i32, %c0_i32_0 : i32, i32
  }
  func.func @transform_10(%arg0: i32) -> (i32, i32) {
    %c0_i32 = arith.constant 0 : i32
    %c0_i32_0 = arith.constant 0 : i32
    %c0_i32_1 = arith.constant 0 : i32
    return %c0_i32, %c0_i32_0 : i32, i32
  }
  func.func @transform_11(%arg0: i32) -> (i32, i32, i32) {
    %c0_i32 = arith.constant 0 : i32
    %c0_i32_0 = arith.constant 0 : i32
    %c0_i32_1 = arith.constant 0 : i32
    return %arg0, %c0_i32, %c0_i32_0 : i32, i32, i32
  }
}

</mosaic_0001>

<bundles_post_ra>
// kernel: tpu_custom_call.1
= control target key start
LH: loop header
LB: loop body
LE: loop exit
PB: predicated region body
PF: predicated region fallthrough
CT: control target
= control target key end

     0   :  { %s7201_s0 = inlined_call_operand.hbm [shape: f32[2,16,256], index: 0, kind: input, shape index: {}]   ;;  %s7202_s1 = inlined_call_operand.vmem [shape: bf16[256,512], index: 1, kind: input, shape index: {}]   ;;  %s7203_s2 = inlined_call_operand.hbm [shape: f32[1,512], index: 2, kind: input, shape index: {}]   ;;  %s7204_s3 = inlined_call_operand.hbm [shape: f32[25,512], index: 3, kind: input, shape index: {}]   ;;  %s7205_s4 = inlined_call_operand.vmem [shape: f32[1,512], index: 4, kind: input, shape index: {}]   ;;  %s7206_s5 = inlined_call_operand.vmem [shape: f32[512,8], index: 5, kind: input, shape index: {}]   ;;  %s7207_s6 = inlined_call_operand.vmem [shape: f32[1,8], index: 6, kind: input, shape index: {}]   ;;  %s7208_s7 = inlined_call_operand.vmem [shape: f32[8,512], index: 7, kind: input, shape index: {}]   ;;  %s7209_s8 = inlined_call_operand.vmem [shape: f32[1,512], index: 8, kind: input, shape index: {}]   ;;  %s7210_s9 = inlined_call_operand.hbm [shape: bf16[512,256], index: 9, kind: input, shape index: {}]   ;;  %s7211_s10 = inlined_call_operand.vmem [shape: f32[1,256], index: 10, kind: input, shape index: {}]   ;;  %s7212_s11 = inlined_call_operand.hbm [shape: f32[2,16,256], index: 11, kind: output, shape index: {}]  }
   0x1   :  { %7294 = sst [smem:[#allocation93_spill]] %s7203_s2 }
   0x2   :  { %7295 = sst [smem:[#allocation94_spill]] %s7204_s3 }
   0x3   :  { %7296 = sst [smem:[#allocation95_spill]] %s7210_s9 }
   0x4   :  { %16 = vsyncpa [#allocation4], 0 }
   0x5   :  { %18 = vsyncpa [#allocation4 + $0x1], 0 }
   0x6   :  { %19 = vsyncpa [#allocation7], 0 }
   0x7   :  { %20 = vsyncpa [#allocation10], 0 }
   0x8   :  { %21 = vsyncpa [#allocation5], 0 }
   0x9   :  { %23 = vsyncpa [#allocation5 + $0x1], 0  ;;  %s4609_s17 = smov 0   ;;  %s4611_s18 = smov 0  }
   0xa   :  { %s4613_s19 = smov 0   ;;  %s4615_s20 = smov 0  }
   0xb LB: > { %7297 = sst [smem:[#allocation16_spill]] %s4526_s19  ;;  %s4630_s21 = sadd.s32 4294967295, %s4530_s20   ;;  %s4530_s20 = sphi %s4615_s20, %s7549_s20   ;;  %s4526_s19 = sphi %s4613_s19, %s7546_s19   ;;  %s4522_s18 = sphi %s4611_s18, %s7548_s18   ;;  %s4518_s17 = sphi %s4609_s17, %s7547_s17  }
   0xc   : > { %s3819_s22 = sadd.s32 4294967294, %s4530_s20   ;;  %p49_p0 = scmp.ne.s32.totalorder %s4522_s18, %s4518_s17 }
   0xd   : > { %p7213_p1 = scmp.eq.s32.totalorder %s4630_s21, 0  ;;  %p289_p3 = scmp.eq.s32.totalorder %s3819_s22, 1 }
   0xe   : > { %p3820_p5 = scmp.ge.s32.totalorder %s4530_s20, 1  ;;  %p296_p7 = scmp.lt.s32.totalorder %s4530_s20, 3 }
   0xf   : > { %p4639_p4 = por %p7213_p1, %p49_p0  ;;  %p4644_p6 = por %p289_p3, %p49_p0 }
  0x10   : > { %p4649_p8 = pnand %p3820_p5, %p296_p7  ;;  %s4532_s26 = smov [#allocation6]  }
  0x11   : > { %s7298_s23 = scalar_select %p4639_p4, 1, 0 }
  0x12   : > { %s7299_s24 = scalar_select %p4644_p6, 1, 0 }
  0x13   : > { %s7300_s25 = scalar_select %p4649_p8, 1, 0 }
  0x14   : > { %s312_s27 = sshll.u32 %s4532_s26, 4  ;;  %p4067_p10 = pneg %p4649_p8  ;;  %s313_s27 = int_to_ptr.vmem [resolvable:$true] %s312_s27 }
  0x15   : > { %s4533_s28 = smov [#allocation8]   ;;  %s4534_s12 = smov [#allocation9]  }
  0x16   : > { %s322_s29 = sshll.u32 %s4533_s28, 4  ;;  %p4658_p11 = pnand %p4067_p10, %p7213_p1  ;;  %s323_s29 = int_to_ptr.vmem [resolvable:$true] %s322_s29 }
  0x17   : > { %s350_s13 = sshll.u32 %s4534_s12, 4  ;;  %s4363_s14 = scalar_lea.vmem %s313_s27, 64  ;;  %s351_s13 = int_to_ptr.vmem [resolvable:$true] %s350_s13 }
  0x18   : > { %p4354_p12 = pneg %p4658_p11  ;;  %p4364_p13 = scmp.ne.s32.totalorder %s313_s27, %s4363_s14 }
  0x19   : > { %p4371_p5 = scmp.lt.s32.totalorder %s313_s27, %s313_s27  ;;  %p4372_p7 = scmp.lt.s32.totalorder %s4363_s14, %s4363_s14 }
  0x1a   : > { %p4366_p0 = pnand %p4364_p13, %p4354_p12 }
  0x1b   : > { %p4373_p9 = por %p4372_p7, %p4371_p5 }
  0x1c   : > { %p4367_p3 = pneg %p4366_p0 }
  0x1e   : > { %p4374_p10 = pnand %p4373_p9, %p4367_p3 }
  0x20   : > { %4377 = shalt.err (!%p4374_p10)
}
  0x21   : > { %s7302_s2 = sld [smem:[#allocation93_spill]]  ;;  %s4389_s22 = scalar_lea.vmem %s323_s29, 2048 }
  0x22   : > { %p4390_p1 = scmp.ne.s32.totalorder %s323_s29, %s4389_s22  ;;  %p4397_p13 = scmp.lt.s32.totalorder %s323_s29, %s323_s29 }
  0x23   : > { %p4398_p0 = scmp.lt.s32.totalorder %s4389_s22, %s4389_s22 }
  0x24   : > { %p4392_p2 = pnand %p4390_p1, %p4354_p12 }
  0x25   : > { %p4399_p4 = por %p4398_p0, %p4397_p13 }
  0x26   : > { %p4393_p6 = pneg %p4392_p2 }
  0x27   : > { %4070 = dma.hbm_to_vmem [thread:$0]  (!%p4658_p11), %s7302_s2, 64, %s313_s27, [#allocation7]  }
  0x28   : > { %p4400_p8 = pnand %p4399_p4, %p4393_p6 }
  0x2a   : > { %4403 = shalt.err (!%p4400_p8)
}
  0x2b   : > { %s4535_s26 = smov 512   ;;  %s4536_s28 = smov 32  }
  0x2c   : > { %s7303_s3 = sld [smem:[#allocation94_spill]]  ;;  %s4415_s27 = scalar_lea.vmem %s351_s13, 8192 }
  0x2d   : > { %p4416_p9 = scmp.ne.s32.totalorder %s351_s13, %s4415_s27  ;;  %p4423_p3 = scmp.lt.s32.totalorder %s351_s13, %s351_s13 }
  0x2e   : > { %p4424_p5 = scmp.lt.s32.totalorder %s4415_s27, %s4415_s27 }
  0x2f   : > { %p4418_p1 = pnand %p4416_p9, %p4354_p12 }
  0x30   : > { %p4425_p4 = por %p4424_p5, %p4423_p3 }
  0x31   : > { %p4419_p2 = pneg %p4418_p1 }
  0x32   : > { %4073 = dma.hbm_to_vmem [thread:$0]  (!%p4658_p11), %s7303_s3, 2048, %s323_s29, [#allocation7], %s4535_s26, %s4535_s26, %s4536_s28  }
  0x33   : > { %p4426_p6 = pnand %p4425_p4, %p4419_p2 }
  0x35   : > { %4429 = shalt.err (!%p4426_p6)
}
  0x36   : > { %s4537_s15 = smov 128   ;;  %s4538_s29 = smov 8  }
  0x37   : > { %s7304_s9 = sld [smem:[#allocation95_spill]]  ;;  %s4689_s26 = sadd.s32 1, %s4530_s20  }
  0x38   : > { %s33_s28 = ssub.s32 %s4530_s20, %s4689_s26  ;;  %s36_s12 = sadd.s32 1, %s4526_s19 }
  0x39   : > { %p34_p8 = scmp.eq.s32.totalorder %s33_s28, 0  ;;  %p43_p12 = scmp.ne.s32.totalorder %s4526_s19, %s4522_s18 }
  0x3a   : > { %p44_p7 = scmp.eq.s32.totalorder %s4530_s20, 0  ;;  %p4088_p10 = scmp.lt.s32.totalorder %s4530_s20, 2 }
  0x3b   : > { %s4699_s14 = scalar_select %p34_p8, %s4526_s19, %s36_s12  }
  0x3c   : > { %p45_p13 = por %p44_p7, %p43_p12  ;;  %p7306_p0 = scmp.eq.s32.totalorder %s4630_s21, 1 }
  0x3d   : > { %4076 = dma.hbm_to_vmem [thread:$0]  (!%p4658_p11), %s7304_s9, 8192, %s351_s13, [#allocation10], %s4537_s15, %s4537_s15, %s4538_s29  }
  0x3e   : > { %7305 = sst [smem:[#allocation17_spill]] %s4699_s14  ;;  %p4703_p9 = por %p7306_p0, %p43_p12 }
  0x3f   : > { %s367_s30 = sand.u32 1, %s4526_s19   ;;  %s3973_s16 = sshll.u32 %s4530_s20, 9 }
  0x40   : > { %s7307_s27 = scalar_select %p4703_p9, 1, 0 }
  0x41   : > { %s3825_s13 = sshll.u32 %s367_s30, 5  ;;  %s4712_s22 = scalar_lea.hbm %s7201_s0, %s3973_s16 }
  0x42   : > { %s371_s28 = scalar_lea.vmem [#allocation3], %s3825_s13  ;;  %p4714_p11 = pnand %p4088_p10, %p45_p13 }
  0x43   : > { %s378_s12 = sshll.u32 %s371_s28, 4  ;;  %s4720_s3 = scalar_lea.sflag [#allocation4], %s367_s30  ;;  %s4718_s12 = int_to_ptr.vmem [resolvable:$true] %s378_s12 }
  0x44   : > { %s4430_s9 = scalar_lea.hbm %s4712_s22, 512  ;;  %p4432_p2 = pneg %p4714_p11 }
  0x45   : > { %p4431_p1 = scmp.ne.s32.totalorder %s4712_s22, %s4430_s9  ;;  %s4435_s13 = scalar_lea.hbm %s7201_s0, 1024 }
  0x46   : > { %p4436_p4 = scmp.lt.s32.totalorder %s4712_s22, %s7201_s0  ;;  %p4437_p6 = scmp.lt.s32.totalorder %s4435_s13, %s4430_s9 }
  0x47   : > { %p4433_p3 = pnand %p4432_p2, %p4431_p1 }
  0x48   : > { %p4438_p8 = por %p4437_p6, %p4436_p4 }
  0x49   : > { %p4434_p5 = pneg %p4433_p3 }
  0x4b   : > { %p4439_p12 = pnand %p4438_p8, %p4434_p5 }
  0x4d   : > { %4442 = shalt.err (!%p4439_p12)
}
  0x4e   : > { %s4443_s30 = scalar_lea.vmem %s4718_s12, 512  ;;  %s4539_s14 = smov [#allocation3]  }
  0x4f   : > { %p4444_p7 = scmp.ne.s32.totalorder %s4718_s12, %s4443_s30  ;;  %s4448_s19 = sshll.u32 %s4539_s14, 4  ;;  %s4449_s19 = int_to_ptr.vmem [resolvable:$false] %s4448_s19 }
  0x50   : > { %s4450_s16 = scalar_lea.vmem %s4449_s19, 1024  ;;  %p4451_p0 = scmp.lt.s32.totalorder %s4718_s12, %s4449_s19 }
  0x51   : > { %p4446_p10 = pnand %p4444_p7, %p4432_p2  ;;  %p4452_p1 = scmp.lt.s32.totalorder %s4450_s16, %s4443_s30 }
  0x53   : > { %p4447_p13 = pneg %p4446_p10  ;;  %p4453_p3 = por %p4452_p1, %p4451_p0 }
  0x55   : > { %p4454_p9 = pnand %p4453_p3, %p4447_p13 }
  0x57   : > { %4457 = shalt.err (!%p4454_p9)
}
  0x58   : > { %s4540_s9 = smov 256   ;;  %s4541_s15 = smov 16  }
  0x59   : > { %4080 = dma.hbm_to_vmem [thread:$0]  (!%p4714_p11), %s4712_s22, 512, %s4718_s12, %s4720_s3, %s4540_s9, %s4540_s9, %s4541_s15  }
  0x5a   : > { %p7309_p2 = scmp.ne.s32.totalorder %s7300_s25, 0 }
  0x5c   : > { %390 = sbr.rel (%p7309_p2) target bundleno = 1419 (0x58b), region = 64 }
  0x61   : > { %s4744_s14 = sand.u32 1, %s4522_s18   ;;  %p7310_p9 = scmp.ne.s32.totalorder %s7298_s23, 0 }
  0x62   : > { %s3829_s19 = sshll.u32 %s4744_s14, 5  ;;  %s393_s13 = scalar_lea.sflag [#allocation4], %s4744_s14 }
  0x63   : > { %s4750_s29 = scalar_lea.vmem [#allocation3], %s3829_s19 }
  0x64   : > { %4501 = dma.done.wait (%p7310_p9), %s393_s13, 512  }
  0x65   : > { %4503 = vsyncadd (%p7310_p9), %s393_s13, 4294966784  ;;  %p7311_p11 = scmp.eq.s32.totalorder %s4630_s21, 0 }
  0x67   : > { %4505 = dma.done.wait (%p7311_p11), [#allocation7], 2112   ;;  %p7312_p5 = pmov %p7311_p11 }
  0x69   : > { %4507 = vsyncadd (%p7312_p5), [#allocation7], 4294965184  ;;  %p7313_p4 = pmov %p7312_p5 }
  0x6b   : > { %4509 = dma.done.wait (%p7313_p4), [#allocation10], 8192   ;;  %p7314_p6 = pmov %p7313_p4 }
  0x6c   : > { %v4140_v0 = vld [vmem:[%s7202_s1 + $0xe4] ss:$16 sps:$4 sm:$0xff]   ;;  %v4142_v1 = vld [vmem:[%s7202_s1 + $0xec] ss:$16 sps:$4 sm:$0xff]   ;;  %v4144_v2 = vld [vmem:[%s7202_s1 + $0xe0] ss:$16 sps:$4 sm:$0xff]  }
  0x6d   : > { %4511 = vsyncadd (%p7314_p6), [#allocation10], 4294959104  ;;  %859 = vmatprep.subr.bf16.mxu0 %v4140_v0  ;;  %v4145_v3 = vld [vmem:[%s7202_s1 + $0xe8] ss:$16 sps:$4 sm:$0xff]   ;;  %902 = vmatprep.subr.bf16.mxu1 %v4142_v1  ;;  %v4146_v4 = vld [vmem:[%s7202_s1 + $0xc4] ss:$16 sps:$4 sm:$0xff]  }
  0x6e   : > { %860 = vmatpush1.bf16.msra.mxu0 %v4144_v2  ;;  %903 = vmatpush1.bf16.msra.mxu1 %v4145_v3  ;;  %v4148_v5 = vld [vmem:[%s7202_s1 + $0xcc] ss:$16 sps:$4 sm:$0xff]   ;;  %v4150_v6 = vld [vmem:[%s7202_s1 + $0xc0] ss:$16 sps:$4 sm:$0xff]   ;;  %v4151_v7 = vld [vmem:[%s7202_s1 + $0xc8] ss:$16 sps:$4 sm:$0xff]  }
  0x6f   : > { %861 = vmatprep.subr.bf16.mxu0 %v4146_v4  ;;  %904 = vmatprep.subr.bf16.mxu1 %v4148_v5  ;;  %v4152_v8 = vld [vmem:[%s7202_s1 + $0xa4] ss:$16 sps:$4 sm:$0xff]   ;;  %v4154_v9 = vld [vmem:[%s7202_s1 + $0xac] ss:$16 sps:$4 sm:$0xff]   ;;  %v4156_v10 = vld [vmem:[%s7202_s1 + $0xa0] ss:$16 sps:$4 sm:$0xff]  }
  0x70   : > { %v4157_v11 = vld [vmem:[%s7202_s1 + $0xa8] ss:$16 sps:$4 sm:$0xff]   ;;  %v4158_v12 = vld [vmem:[%s7202_s1 + $0x84] ss:$16 sps:$4 sm:$0xff]   ;;  %v4160_v13 = vld [vmem:[%s7202_s1 + $0x8c] ss:$16 sps:$4 sm:$0xff]  }
  0x71   : > { %v4162_v14 = vld [vmem:[%s7202_s1 + $0x80] ss:$16 sps:$4 sm:$0xff]   ;;  %v4163_v15 = vld [vmem:[%s7202_s1 + $0x88] ss:$16 sps:$4 sm:$0xff]   ;;  %v4164_v16 = vld [vmem:[%s7202_s1 + $0x64] ss:$16 sps:$4 sm:$0xff]  }
  0x72   : > { %862 = vmatpush1.bf16.msra.mxu0 %v4150_v6  ;;  %905 = vmatpush1.bf16.msra.mxu1 %v4151_v7  ;;  %v4166_v17 = vld [vmem:[%s7202_s1 + $0x6c] ss:$16 sps:$4 sm:$0xff]   ;;  %v4168_v18 = vld [vmem:[%s7202_s1 + $0x60] ss:$16 sps:$4 sm:$0xff]   ;;  %v4169_v19 = vld [vmem:[%s7202_s1 + $0x68] ss:$16 sps:$4 sm:$0xff]   ;;  %v7220_v7 = vlaneseq }
  0x73   : > { %863 = vmatprep.subr.bf16.mxu0 %v4152_v8  ;;  %906 = vmatprep.subr.bf16.mxu1 %v4154_v9  ;;  %v4170_v20 = vld [vmem:[%s7202_s1 + $0x44] ss:$16 sps:$4 sm:$0xff]   ;;  %v4172_v21 = vld [vmem:[%s7202_s1 + $0x4c] ss:$16 sps:$4 sm:$0xff]   ;;  %v4174_v22 = vld [vmem:[%s7202_s1 + $0x40] ss:$16 sps:$4 sm:$0xff]  }
  0x74   : > { %v4175_v23 = vld [vmem:[%s7202_s1 + $0x48] ss:$16 sps:$4 sm:$0xff]   ;;  %v4176_v24 = vld [vmem:[%s7202_s1 + $0x24] ss:$16 sps:$4 sm:$0xff]   ;;  %v4178_v25 = vld [vmem:[%s7202_s1 + $0x2c] ss:$16 sps:$4 sm:$0xff]  }
  0x75   : > { %v4180_v26 = vld [vmem:[%s7202_s1 + $0x20] ss:$16 sps:$4 sm:$0xff]   ;;  %v4181_v27 = vld [vmem:[%s7202_s1 + $0x28] ss:$16 sps:$4 sm:$0xff]   ;;  %v4182_v28 = vld [vmem:[%s7202_s1 + $0x4] ss:$16 sps:$4 sm:$0xff]  }
  0x76   : > { %864 = vmatpush1.bf16.msra.mxu0 %v4156_v10  ;;  %907 = vmatpush1.bf16.msra.mxu1 %v4157_v11  ;;  %v4184_v29 = vld [vmem:[%s7202_s1 + $0xc] ss:$16 sps:$4 sm:$0xff]   ;;  %v4186_v30 = vld [vmem:[%s7202_s1] ss:$16 sps:$4 sm:$0xff]   ;;  %v4187_v31 = vld [vmem:[%s7202_s1 + $0x8] ss:$16 sps:$4 sm:$0xff]  }
  0x77   : > { %865 = vmatprep.subr.bf16.mxu0 %v4158_v12  ;;  %908 = vmatprep.subr.bf16.mxu1 %v4160_v13  ;;  %v4188_v32 = vld [vmem:[%s7202_s1 + $0x1e4] ss:$16 sps:$4 sm:$0xff]   ;;  %v4190_v33 = vld [vmem:[%s7202_s1 + $0x1ec] ss:$16 sps:$4 sm:$0xff]   ;;  %v4192_v34 = vld [vmem:[%s7202_s1 + $0x1e0] ss:$16 sps:$4 sm:$0xff]  }
  0x78   : > { %v4193_v35 = vld [vmem:[%s7202_s1 + $0x1e8] ss:$16 sps:$4 sm:$0xff]   ;;  %v4194_v36 = vld [vmem:[%s7202_s1 + $0x1c4] ss:$16 sps:$4 sm:$0xff]   ;;  %v4196_v37 = vld [vmem:[%s7202_s1 + $0x1cc] ss:$16 sps:$4 sm:$0xff]  }
  0x79   : > { %v4198_v38 = vld [vmem:[%s7202_s1 + $0x1c0] ss:$16 sps:$4 sm:$0xff]   ;;  %v4199_v39 = vld [vmem:[%s7202_s1 + $0x1c8] ss:$16 sps:$4 sm:$0xff]   ;;  %v4200_v40 = vld [vmem:[%s7202_s1 + $0x1a4] ss:$16 sps:$4 sm:$0xff]  }
  0x7a   : > { %866 = vmatpush1.bf16.msra.mxu0 %v4162_v14  ;;  %909 = vmatpush1.bf16.msra.mxu1 %v4163_v15  ;;  %v4202_v41 = vld [vmem:[%s7202_s1 + $0x1ac] ss:$16 sps:$4 sm:$0xff]   ;;  %v4204_v42 = vld [vmem:[%s7202_s1 + $0x1a0] ss:$16 sps:$4 sm:$0xff]   ;;  %v4205_v43 = vld [vmem:[%s7202_s1 + $0x1a8] ss:$16 sps:$4 sm:$0xff]  }
  0x7b   : > { %867 = vmatprep.subr.bf16.mxu0 %v4164_v16  ;;  %910 = vmatprep.subr.bf16.mxu1 %v4166_v17  ;;  %v4206_v44 = vld [vmem:[%s7202_s1 + $0x184] ss:$16 sps:$4 sm:$0xff]   ;;  %v4208_v45 = vld [vmem:[%s7202_s1 + $0x18c] ss:$16 sps:$4 sm:$0xff]   ;;  %v4210_v46 = vld [vmem:[%s7202_s1 + $0x180] ss:$16 sps:$4 sm:$0xff]  }
  0x7c   : > { %v448_v47 = vld [vmem:[%s4750_s29 + $0x8] sm:$0xff]  ;;  %v4212_v49 = vld [vmem:[%s7202_s1 + $0x164] ss:$16 sps:$4 sm:$0xff]   ;;  %v450_v50 = vld [vmem:[%s4750_s29 + $0x18] sm:$0xff]  ;;  %v7218_v6 = vmov 0.0   ;;  %v520_v8 = vshrl.u32 %v7220_v7, 7 }
  0x7d   : > { %v4211_v48 = vld [vmem:[%s7202_s1 + $0x188] ss:$16 sps:$4 sm:$0xff]   ;;  %v4214_v51 = vld [vmem:[%s7202_s1 + $0x16c] ss:$16 sps:$4 sm:$0xff]   ;;  %v452_v52 = vpack.c.bf16 %v450_v50, %v448_v47  ;;  %v4216_v53 = vld [vmem:[%s7202_s1 + $0x160] ss:$16 sps:$4 sm:$0xff]  }
  0x7e   : > { %868 = vmatpush1.bf16.msra.mxu0 %v4168_v18  ;;  %911 = vmatpush1.bf16.msra.mxu1 %v4169_v19  ;;  %v4217_v54 = vld [vmem:[%s7202_s1 + $0x168] ss:$16 sps:$4 sm:$0xff]   ;;  %v4218_v55 = vld [vmem:[%s7202_s1 + $0x144] ss:$16 sps:$4 sm:$0xff]   ;;  %v4220_v56 = vld [vmem:[%s7202_s1 + $0x14c] ss:$16 sps:$4 sm:$0xff]  }
  0x7f   : > { %869 = vmatprep.subr.bf16.mxu0 %v4170_v20  ;;  %912 = vmatprep.subr.bf16.mxu1 %v4172_v21  ;;  %v4222_v57 = vld [vmem:[%s7202_s1 + $0x140] ss:$16 sps:$4 sm:$0xff]   ;;  %v4223_v58 = vld [vmem:[%s7202_s1 + $0x148] ss:$16 sps:$4 sm:$0xff]   ;;  %v4224_v59 = vld [vmem:[%s7202_s1 + $0x124] ss:$16 sps:$4 sm:$0xff]  }
  0x80   : > { %891 = vmatprep.mubr.bf16.mxu0 %v452_v52  ;;  %934 = vmatprep.mubr.bf16.mxu1 %v452_v52  ;;  %v4226_v60 = vld [vmem:[%s7202_s1 + $0x12c] ss:$16 sps:$4 sm:$0xff]   ;;  %v4228_v61 = vld [vmem:[%s7202_s1 + $0x120] ss:$16 sps:$4 sm:$0xff]   ;;  %v4229_v62 = vld [vmem:[%s7202_s1 + $0x128] ss:$16 sps:$4 sm:$0xff]  }
  0x81   : > { %v4230_v63 = vld [vmem:[%s7202_s1 + $0x104] ss:$16 sps:$4 sm:$0xff]   ;;  %v4232_v0 = vld [vmem:[%s7202_s1 + $0x10c] ss:$16 sps:$4 sm:$0xff]   ;;  %v4234_v1 = vld [vmem:[%s7202_s1 + $0x100] ss:$16 sps:$4 sm:$0xff]  }
  0x82   : > { %870 = vmatpush1.bf16.msra.mxu0 %v4174_v22  ;;  %913 = vmatpush1.bf16.msra.mxu1 %v4175_v23  ;;  %v4235_v2 = vld [vmem:[%s7202_s1 + $0x108] ss:$16 sps:$4 sm:$0xff]   ;;  %v447_v3 = vld [vmem:[%s4750_s29] sm:$0xff]  ;;  %v449_v4 = vld [vmem:[%s4750_s29 + $0x10] sm:$0xff]  ;;  %955 = vst [vmem:[#allocation2 + $0x38] sm:$0x3] %v7218_v6 }
  0x83   : > { %871 = vmatprep.subr.bf16.mxu0 %v4176_v24  ;;  %914 = vmatprep.subr.bf16.mxu1 %v4178_v25  ;;  %v451_v5 = vpack.c.bf16 %v449_v4, %v447_v3  ;;  %953 = vst [vmem:[#allocation2 + $0x50] sm:$0x3] %v7218_v6  ;;  %954 = vst [vmem:[#allocation2] sm:$0x3] %v7218_v6  ;;  %v4969_v9 = vsub.s32 0, %v520_v8  ;;  %v4971_v10 = vsub.s32 2, %v520_v8 }
  0x84   : > { %956 = vst [vmem:[#allocation2 + $0x18] sm:$0x3] %v7218_v6  ;;  %957 = vst [vmem:[#allocation2 + $0x30] sm:$0xc] %v7218_v6  ;;  %v517_v11 = vld [vmem:[#allocation6] sm:$0xf] }
  0x85   : > { %958 = vst [vmem:[#allocation2 + $0x40] sm:$0xc] %v7218_v6  ;;  %959 = vst [vmem:[#allocation2 + $0x8] sm:$0xc] %v7218_v6  ;;  %v4973_v12 = vsub.s32 1, %v520_v8  ;;  %v4975_v13 = vsub.s32 3, %v520_v8  ;;  %v522_v14 = vrot.slane %v517_v11, %v4969_v9  ;;  %v530_v15 = vrot.slane %v517_v11, %v4971_v10 }
  0x86   : > { %872 = vmatpush1.bf16.msra.mxu0 %v4180_v26  ;;  %915 = vmatpush1.bf16.msra.mxu1 %v4181_v27  ;;  %960 = vst [vmem:[#allocation2 + $0x58] sm:$0xc] %v7218_v6  ;;  %7315 = vst [vmem:[#allocation18_spill] sm:$0xff] %v4969_v9  ;;  %vm969_vm0 = vcmask 1041408   ;;  %s4543_s16 = smov 64   ;;  %s4544_s9 = smov 32  }
  0x87   : > { %873 = vmatprep.subr.bf16.mxu0 %v4182_v28  ;;  %916 = vmatprep.subr.bf16.mxu1 %v4184_v29  ;;  %7316 = vst [vmem:[#allocation19_spill] sm:$0xff] %v4971_v10  ;;  %7317 = vst [vmem:[#allocation20_spill] sm:$0xff] %v4973_v12  ;;  %v526_v16 = vrot.slane %v517_v11, %v4973_v12  ;;  %v534_v17 = vrot.slane %v517_v11, %v4975_v13  ;;  %s4545_s15 = smov 96   ;;  %v2177_v4 = vld [vmem:[#allocation8 + $0x41] ss:$8 sm:$0xf] }
  0x88   : > { %7318 = vst [vmem:[#allocation21_spill] sm:$0xff] %v4975_v13  ;;  %vm1309_vm1 = vcmask 1046528   ;;  %vm1665_vm2 = vcmask 1045504   ;;  %vm2021_vm3 = vcmask 1044480   ;;  %vm2377_vm4 = vcmask 1043456   ;;  %s446_s23 = scalar_lea.vmem [#allocation11], %s3829_s19 }
  0x89   : > { %vm2977_vm8 = vcmask 64512   ;;  %s3717_s12 = sshll.u32 %s446_s23, 4  ;;  %s3974_s28 = sshll.u32 %s4630_s21, 9  ;;  %s7151_s12 = int_to_ptr.vmem [resolvable:$true] %s3717_s12 }
  0x8a   : > { %874 = vmatpush1.bf16.msra.mxu0 %v4186_v30  ;;  %917 = vmatpush1.bf16.msra.mxu1 %v4187_v31  ;;  %s7157_s13 = scalar_lea.hbm %s7212_s11, %s3974_s28  ;;  %s3704_s21 = scalar_lea.sflag [#allocation5], %s4744_s14 }
  0x8b   : > { %875 = vmatprep.subr.bf16.mxu0 %v4188_v32  ;;  %918 = vmatprep.subr.bf16.mxu1 %v4190_v33  ;;  %p7542_p12 = scmp.ne.s32.totalorder %s7307_s27, 0  ;;  %s4546_s2 = smov [#allocation11]  }
  0x8c   : > { %s4462_s3 = sshll.u32 %s4546_s2, 4  ;;  %s4463_s3 = int_to_ptr.vmem [resolvable:$false] %s4462_s3 }
  0x8d   : > { %p4465_p13 = scmp.lt.s32.totalorder %s7151_s12, %s4463_s3 }
  0x8e   : > { %876 = vmatpush2.bf16.msra.mxu0 %v4192_v34  ;;  %919 = vmatpush2.bf16.msra.mxu1 %v4193_v35 }
  0x8f   : > { %877 = vmatprep.subr.bf16.mxu0 %v4194_v36  ;;  %920 = vmatprep.subr.bf16.mxu1 %v4196_v37 }
  0x92   : > { %878 = vmatpush2.bf16.msra.mxu0 %v4198_v38  ;;  %921 = vmatpush2.bf16.msra.mxu1 %v4199_v39 }
  0x93   : > { %879 = vmatprep.subr.bf16.mxu0 %v4200_v40  ;;  %922 = vmatprep.subr.bf16.mxu1 %v4202_v41 }
  0x96   : > { %880 = vmatpush2.bf16.msra.mxu0 %v4204_v42  ;;  %923 = vmatpush2.bf16.msra.mxu1 %v4205_v43 }
  0x97   : > { %881 = vmatprep.subr.bf16.mxu0 %v4206_v44  ;;  %924 = vmatprep.subr.bf16.mxu1 %v4208_v45 }
  0x9a   : > { %882 = vmatpush2.bf16.msra.mxu0 %v4210_v46  ;;  %925 = vmatpush2.bf16.msra.mxu1 %v4211_v48 }
  0x9b   : > { %883 = vmatprep.subr.bf16.mxu0 %v4212_v49  ;;  %926 = vmatprep.subr.bf16.mxu1 %v4214_v51 }
  0x9e   : > { %884 = vmatpush2.bf16.msra.mxu0 %v4216_v53  ;;  %927 = vmatpush2.bf16.msra.mxu1 %v4217_v54 }
  0x9f   : > { %885 = vmatprep.subr.bf16.mxu0 %v4218_v55  ;;  %928 = vmatprep.subr.bf16.mxu1 %v4220_v56 }
  0xa2   : > { %886 = vmatpush2.bf16.msra.mxu0 %v4222_v57  ;;  %929 = vmatpush2.bf16.msra.mxu1 %v4223_v58  ;;  %v1465_v58 = vld [vmem:[#allocation8 + $0x7] ss:$8 sm:$0xf] }
  0xa3   : > { %887 = vmatprep.subr.bf16.mxu0 %v4224_v59  ;;  %930 = vmatprep.subr.bf16.mxu1 %v4226_v60  ;;  %v5035_v3 = vrot.slane %v1465_v58, %v4975_v13 }
  0xa6   : > { %888 = vmatpush2.bf16.msra.mxu0 %v4228_v61  ;;  %931 = vmatpush2.bf16.msra.mxu1 %v4229_v62  ;;  %v5024_v62 = vrot.slane %v1465_v58, %v4973_v12 }
  0xa7   : > { %889 = vmatprep.subr.bf16.mxu0 %v4230_v63  ;;  %932 = vmatprep.subr.bf16.mxu1 %v4232_v0  ;;  %v1470_v63 = vrot.slane %v1465_v58, %v4969_v9 }
  0xaa   : > { %890 = vmatpush2.bf16.msra.mxu0 %v4234_v1  ;;  %933 = vmatpush2.bf16.msra.mxu1 %v4235_v2  ;;  %v1478_v1 = vrot.slane %v1465_v58, %v4971_v10  ;;  %v1821_v2 = vld [vmem:[#allocation8 + $0x24] ss:$8 sm:$0xf] }
  0xad   : > { %892 = vmatmul.mubr.bf16.vlgmr.msra.gmra.mxu0 %v451_v5  ;;  %935 = vmatmul.mubr.bf16.vlgmr.msra.gmra.mxu1 %v451_v5 }
 0x16d   : > { %v893_v18 = vpop.f32.mrf.mxu0  ;;  %v936_v19 = vpop.f32.mrf.mxu1 }
 0x16e   : > { %v894_v20 = vadd.f32 %v893_v18, %v522_v14  ;;  %v937_v21 = vadd.f32 %v936_v19, %v530_v15  ;;  %v5053_v18 = vrot.slane %v1821_v2, %v4971_v10  ;;  %v5056_v19 = vrot.slane %v2177_v4, %v4973_v12 }
 0x16f   : > { %v895_v22 = vpop.f32.mrf.mxu0  ;;  %v938_v23 = vpop.f32.mrf.mxu1 }
 0x170   : > { %v945_v24 = vmax.f32 %v894_v20, 0.0  ;;  %v947_v25 = vmax.f32 %v937_v21, 0.0  ;;  %v896_v26 = vadd.f32 %v895_v22, %v526_v16  ;;  %v939_v27 = vadd.f32 %v938_v23, %v534_v17  ;;  %v2533_v22 = vld [vmem:[#allocation8 + $0x46] ss:$8 sm:$0xf] }
 0x171   : > { %v897_v28 = vpop.f32.mrf.mxu0  ;;  %v940_v29 = vpop.f32.mrf.mxu1  ;;  %v5059_v20 = vrot.slane %v2177_v4, %v4969_v9  ;;  %v5062_v21 = vrot.slane %v2177_v4, %v4975_v13 }
 0x172   : > { %v970_v30 = vrot.slane %v945_v24, 6  ;;  %v972_v31 = vrot.slane %v947_v25, 6  ;;  %v946_v32 = vmax.f32 %v896_v26, 0.0  ;;  %v948_v33 = vmax.f32 %v939_v27, 0.0 }
 0x173   : > { %v898_v34 = vadd.f32 %v897_v28, %v522_v14  ;;  %v941_v35 = vadd.f32 %v940_v29, %v530_v15  ;;  %v899_v36 = vpop.f32.mrf.mxu0  ;;  %v942_v37 = vpop.f32.mrf.mxu1  ;;  %v5044_v15 = vrot.slane %v1821_v2, %v4973_v12  ;;  %v5071_v25 = vrot.slane %v2177_v4, %v4971_v10 }
 0x174   : > { %994 = vst [vmem:[#allocation2 + $0x50] sm:$0xfc] %v970_v30  ;;  %996 = vst [vmem:[#allocation2 + $0x38] sm:$0xfc] %v972_v31  ;;  %v971_v38 = vrot.slane %v946_v32, 6  ;;  %v973_v39 = vrot.slane %v948_v33, 6  ;;  %v900_v40 = vadd.f32 %v899_v36, %v526_v16  ;;  %v943_v41 = vadd.f32 %v942_v37, %v534_v17 }
 0x175   : > { %v949_v42 = vmax.f32 %v898_v34, 0.0  ;;  %v951_v43 = vmax.f32 %v941_v35, 0.0  ;;  %v5047_v16 = vrot.slane %v1821_v2, %v4969_v9  ;;  %v5050_v17 = vrot.slane %v1821_v2, %v4975_v13 }
 0x176   : > { %995 = vst [vmem:[#allocation2] sm:$0xfc] %v971_v38  ;;  %997 = vst [vmem:[#allocation2 + $0x18] sm:$0xfc] %v973_v39  ;;  %v950_v44 = vmax.f32 %v900_v40, 0.0  ;;  %v952_v45 = vmax.f32 %v943_v41, 0.0  ;;  %v5074_v26 = vrot.slane %v2533_v22, %v4973_v12  ;;  %v5099_v40 = vrot.slane %v2533_v22, %v4969_v9 }
 0x177   : > { %v974_v46 = vrot.slane %v949_v42, 6  ;;  %v978_v47 = vrot.slane %v951_v43, 6  ;;  %v5102_v41 = vrot.slane %v2533_v22, %v4971_v10  ;;  %v5126_v2 = vrot.slane %v2533_v22, %v4975_v13 }
 0x178   : > { %v976_v48 = vrot.slane %v950_v44, 6  ;;  %v980_v49 = vrot.slane %v952_v45, 6 }
 0x179   : > { %v4981_v50 = vsel %vm969_vm0, %v970_v30, %v974_v46  ;;  %1002 = vst [vmem:[#allocation2 + $0x30] sm:$0x3] %v974_v46  ;;  %v4983_v51 = vsel %vm969_vm0, %v972_v31, %v978_v47  ;;  %1004 = vst [vmem:[#allocation2 + $0x8] sm:$0x3] %v978_v47 }
 0x17a   : > { %7319 = vst [vmem:[#allocation22_spill] sm:$0xff] %v4981_v50  ;;  %v4985_v52 = vsel %vm969_vm0, %v971_v38, %v976_v48  ;;  %1003 = vst [vmem:[#allocation2 + $0x40] sm:$0x3] %v976_v48  ;;  %v4987_v53 = vsel %vm969_vm0, %v973_v39, %v980_v49  ;;  %v7222_v24 = vrot.slane %v4981_v50, 1  ;;  %v5077_v30 = vmul.f32 %v1470_v63, %v4981_v50 }
 0x17b   : > { %7320 = vst [vmem:[#allocation23_spill] sm:$0xff] %v4985_v52  ;;  %7321 = vst [vmem:[#allocation24_spill] sm:$0xff] %v4987_v53  ;;  %v4989_v54 = vld [vmem:[#allocation2 + $0x38] sm:$0xff]  ;;  %v4991_v55 = vld [vmem:[#allocation2 + $0x50] sm:$0xff]  ;;  %v7224_v23 = vrot.slane %v4985_v52, 1  ;;  %v5083_v33 = vmul.f32 %v5024_v62, %v4985_v52  ;;  %v5086_v34 = vmul.f32 %v1478_v1, %v4983_v51  ;;  %v5090_v35 = vmul.f32 %v5035_v3, %v4987_v53 }
 0x17c   : > { %1005 = vst [vmem:[#allocation2 + $0x58] sm:$0x3] %v980_v49  ;;  %7322 = vst [vmem:[#allocation25_spill] sm:$0xff] %v4989_v54  ;;  %1022 = vrot.lane.b32.xlu1 %v4989_v54, %s4543_s16  ;;  %1014 = vrot.lane.b32.xlu0 %v4991_v55, %s4543_s16  ;;  %v5019_v60 = vld [vmem:[#allocation2 + $0x50] sm:$0xfe]  ;;  %v7227_v39 = vrot.slane %v5077_v30, 1 }
 0x17d   : > { %7323 = vst [vmem:[#allocation26_spill] sm:$0xff] %v4991_v55  ;;  %v4997_v56 = vld [vmem:[#allocation2 + $0x18] sm:$0xff]  ;;  %v5003_v57 = vld [vmem:[#allocation2] sm:$0xff]  ;;  %v1487_v8 = vmul.f32 %v1470_v63, %v5019_v60  ;;  %v5079_v32 = vld [vmem:[#allocation2 + $0x50] sm:$0xfc]  ;;  %v1310_v36 = vrot.slane %v5019_v60, 1 }
 0x17e   : > { %7324 = vst [vmem:[#allocation27_spill] sm:$0xff] %v4997_v56  ;;  %7325 = vst [vmem:[#allocation28_spill] sm:$0xff] %v5003_v57  ;;  %v5017_v59 = vld [vmem:[#allocation2] sm:$0xfe]  ;;  %v5021_v61 = vld [vmem:[#allocation2 + $0x38] sm:$0xfe] }
 0x17f   : > { %v5027_v0 = vld [vmem:[#allocation2 + $0x18] sm:$0xfe]  ;;  %v1488_v5 = vmul.f32 %v5024_v62, %v5017_v59  ;;  %v1489_v11 = vmul.f32 %v1478_v1, %v5021_v61  ;;  %v1511_v28 = vrot.slane %v1487_v8, 1  ;;  %v7225_v42 = vrot.slane %v4987_v53, 1  ;;  %v5118_v58 = vld [vmem:[#allocation2] sm:$0xfc] }
 0x180   : > { %1026 = vrot.lane.b32.xlu1 %v4997_v56, %s4543_s16  ;;  %1079 = vrot.lane.b32.xlu0 %v4991_v55, %s4544_s9  ;;  %v1490_v14 = vmul.f32 %v5035_v3, %v5027_v0  ;;  %v5095_v38 = vld [vmem:[#allocation2 + $0x30] sm:$0x1]  ;;  %v5109_v43 = vld [vmem:[#allocation2 + $0x8] sm:$0x1]  ;;  %v7226_v44 = vrot.slane %v5083_v33, 1  ;;  %v7223_v45 = vrot.slane %v5086_v34, 1 }
 0x181   : > { %v1514_v27 = vrot.slane %v1488_v5, 1  ;;  %v1517_v29 = vrot.slane %v1489_v11, 1  ;;  %v5093_v37 = vld [vmem:[#allocation2 + $0x40] sm:$0x1]  ;;  %v7221_v46 = vrot.slane %v5090_v35, 1  ;;  %v1313_v47 = vrot.slane %v5017_v59, 1 }
 0x182   : > { %v1520_v31 = vrot.slane %v1490_v14, 1  ;;  %v1319_v48 = vrot.slane %v5027_v0, 1  ;;  %v5123_v60 = vsel %vm1309_vm1, %v1511_v28, %v7227_v39  ;;  %v1316_v4 = vrot.slane %v5021_v61, 1  ;;  %v5129_v5 = vld [vmem:[#allocation2 + $0x18] sm:$0xfc] }
 0x183   : > { %v5116_v49 = vld [vmem:[#allocation2 + $0x58] sm:$0x1]  ;;  %7326 = vst [vmem:[#allocation29_spill] sm:$0xff] %v5123_v60  ;;  %v5131_v8 = vld [vmem:[#allocation2 + $0x38] sm:$0xfc]  ;;  %v5136_v59 = vsel %vm1309_vm1, %v1514_v27, %v7226_v44  ;;  %v5141_v0 = vsel %vm1309_vm1, %v1517_v29, %v7223_v45  ;;  %v1496_v61 = vmul.f32 %v5024_v62, %v5093_v37  ;;  %v1495_v14 = vmul.f32 %v1470_v63, %v5095_v38 }
 0x184   : > { %1083 = vrot.lane.b32.xlu1 %v5003_v57, %s4544_s9  ;;  %1087 = vrot.lane.b32.xlu0 %v4989_v54, %s4544_s9  ;;  %7327 = vst [vmem:[#allocation30_spill] sm:$0xff] %v5136_v59  ;;  %7328 = vst [vmem:[#allocation31_spill] sm:$0xff] %v5141_v0  ;;  %v5146_v11 = vsel %vm1309_vm1, %v1520_v31, %v7221_v46  ;;  %v1497_v22 = vmul.f32 %v1478_v1, %v5109_v43  ;;  %v5156_v28 = vld [vmem:[#allocation2 + $0x40] sm:$0x3]  ;;  %v5158_v29 = vld [vmem:[#allocation2 + $0x30] sm:$0x3] }
 0x185   : > { %7329 = vst [vmem:[#allocation32_spill] sm:$0xff] %v5146_v11  ;;  %v5154_v27 = vmul.f32 %v5047_v16, %v5079_v32  ;;  %v5160_v6 = vld [vmem:[#allocation2 + $0x58] sm:$0x3]  ;;  %v5169_v62 = vsel %vm1309_vm1, %v1310_v36, %v7222_v24  ;;  %v7228_v63 = vrot.slane %v4983_v51, 1  ;;  %v1498_v1 = vmul.f32 %v5035_v3, %v5116_v49  ;;  %v5178_v7 = vld [vmem:[#allocation2 + $0x8] sm:$0x3] }
 0x186   : > { %v5176_v31 = vmul.f32 %v5044_v15, %v5118_v58  ;;  %v5183_v46 = vsel %vm1309_vm1, %v1313_v47, %v7224_v23  ;;  %v5188_v36 = vsel %vm1309_vm1, %v1319_v48, %v7225_v42  ;;  %v5192_v24 = vmul.f32 %v5050_v17, %v5129_v5  ;;  %v5198_v45 = vld [vmem:[#allocation2] sm:$0xf8]  ;;  %v5217_v44 = vld [vmem:[#allocation2 + $0x50] sm:$0xf8]  ;;  %v5219_v39 = vld [vmem:[#allocation2 + $0x18] sm:$0xf8] }
 0x187   : > { %v5196_v3 = vmul.f32 %v5053_v18, %v5131_v8  ;;  %v5203_v47 = vsel %vm1309_vm1, %v1316_v4, %v7228_v63  ;;  %v5207_v23 = vmul.f32 %v5044_v15, %v5156_v28  ;;  %v5211_v48 = vmul.f32 %v5047_v16, %v5158_v29  ;;  %7330 = vst [vmem:[#allocation33_spill] sm:$0xff] %v5219_v39  ;;  %v5225_v60 = vld [vmem:[#allocation2 + $0x38] sm:$0xf8]  ;;  %v5257_v13 = vld [vmem:[#allocation2 + $0x30] sm:$0x7] }
 0x188   : > { %1091 = vrot.lane.b32.xlu1 %v4997_v56, %s4544_s9  ;;  %1182 = vrot.lane.b32.xlu0 %v4991_v55, %s4545_s15  ;;  %v5215_v42 = vmul.f32 %v5050_v17, %v5160_v6  ;;  %v1525_v11 = vrot.slane %v1496_v61, 1  ;;  %v1523_v0 = vrot.slane %v1495_v14, 1  ;;  %v1527_v4 = vrot.slane %v1497_v22, 1  ;;  %7331 = vst [vmem:[#allocation34_spill] sm:$0xff] %v5225_v60  ;;  %7333 = vst [vmem:[#allocation36_spill] sm:$0xff] %v5257_v13 }
 0x189   : > { %v5223_v63 = vmul.f32 %v5053_v18, %v5178_v7  ;;  %v1529_v59 = vrot.slane %v1498_v1, 1  ;;  %v1867_v61 = vrot.slane %v5154_v27, 2  ;;  %v5235_v14 = vmul.f32 %v5056_v19, %v5198_v45  ;;  %v5259_v9 = vld [vmem:[#allocation2 + $0x58] sm:$0x7] }
 0x18a   : > { %v1876_v22 = vrot.slane %v5192_v24, 2  ;;  %v5241_v55 = vmul.f32 %v5059_v20, %v5217_v44  ;;  %v5245_v1 = vmul.f32 %v5062_v21, %v5219_v39  ;;  %v1879_v27 = vrot.slane %v5211_v48, 2  ;;  %v5254_v24 = vld [vmem:[#allocation2 + $0x40] sm:$0x7]  ;;  %7334 = vst [vmem:[#allocation37_spill] sm:$0xff] %v5259_v9 }
 0x18b   : > { %v5252_v12 = vmul.f32 %v5071_v25, %v5225_v60  ;;  %7332 = vst [vmem:[#allocation35_spill] sm:$0xff] %v5254_v24  ;;  %v7335_v10 = vrot.slane %v5077_v30, 1  ;;  %v7337_v48 = vrot.slane %v5083_v33, 1  ;;  %v7339_v60 = vrot.slane %v5086_v34, 1  ;;  %v5298_v30 = vld [vmem:[#allocation2 + $0x38] sm:$0xf0] }
 0x18c   : > { %1186 = vrot.lane.b32.xlu1 %v5003_v57, %s4545_s15  ;;  %1190 = vrot.lane.b32.xlu0 %v4989_v54, %s4545_s15  ;;  %v7343_v33 = vrot.slane %v5090_v35, 1  ;;  %v1847_v34 = vmul.f32 %v5047_v16, %v4981_v50  ;;  %7346 = vst [vmem:[#allocation45_spill] sm:$0xff] %v5298_v30  ;;  %v1849_v35 = vmul.f32 %v5053_v18, %v4983_v51 }
 0x18d   : > { %v5269_v54 = vsel %vm1309_vm1, %v7337_v48, %v1525_v11  ;;  %v5274_v39 = vsel %vm1309_vm1, %v7339_v60, %v1527_v4  ;;  %v1848_v60 = vmul.f32 %v5044_v15, %v4985_v52  ;;  %v5296_v48 = vld [vmem:[#allocation2 + $0x50] sm:$0xf0]  ;;  %v5307_v16 = vmul.f32 %v5056_v19, %v5254_v24 }
 0x18e   : > { %7338 = vst [vmem:[#allocation39_spill] sm:$0xff] %v5269_v54  ;;  %7340 = vst [vmem:[#allocation40_spill] sm:$0xff] %v5274_v39  ;;  %v5288_v11 = vsel %vm1309_vm1, %v7343_v33, %v1529_v59  ;;  %v1850_v59 = vmul.f32 %v5050_v17, %v4987_v53  ;;  %v2207_v15 = vmul.f32 %v5059_v20, %v5257_v13  ;;  %v1868_v17 = vrot.slane %v1847_v34, 2  ;;  %v5321_v39 = vld [vmem:[#allocation2 + $0x30] sm:$0xf] }
 0x18f   : > { %7344 = vst [vmem:[#allocation43_spill] sm:$0xff] %v5288_v11  ;;  %7345 = vst [vmem:[#allocation44_spill] sm:$0xff] %v5296_v48  ;;  %v5313_v4 = vmul.f32 %v5062_v21, %v5259_v9  ;;  %v1871_v11 = vrot.slane %v1848_v60, 2  ;;  %v1874_v33 = vrot.slane %v1849_v35, 2  ;;  %v2555_v54 = vmul.f32 %v5099_v40, %v5296_v48 }
 0x190   : > { %1194 = vrot.lane.b32.xlu1 %v4997_v56, %s4545_s15  ;;  %1018 = vrot.lane.b32.xlu0 %v5003_v57, %s4543_s16  ;;  %v1870_v57 = vrot.slane %v5176_v31, 2  ;;  %v1873_v56 = vrot.slane %v5196_v3, 2  ;;  %v1883_v3 = vrot.slane %v5223_v63, 2  ;;  %v5264_v31 = vsel %vm1309_vm1, %v7335_v10, %v1523_v0  ;;  %v5281_v10 = vld [vmem:[#allocation2 + $0x8] sm:$0x7]  ;;  %7348 = vst [vmem:[#allocation47_spill] sm:$0xff] %v5321_v39 }
 0x191   : > { %7336 = vst [vmem:[#allocation38_spill] sm:$0xff] %v5264_v31  ;;  %7341 = vst [vmem:[#allocation41_spill] sm:$0xff] %v5281_v10  ;;  %v5283_v0 = vld [vmem:[#allocation2] sm:$0xf0]  ;;  %v5315_v63 = vld [vmem:[#allocation2 + $0x40] sm:$0xf]  ;;  %v5319_v18 = vmul.f32 %v5071_v25, %v5281_v10  ;;  %v5337_v34 = vmul.f32 %v5102_v41, %v5298_v30  ;;  %v5340_v35 = vsel %vm1665_vm2, %v1867_v61, %v1868_v17 }
 0x192   : > { %7342 = vst [vmem:[#allocation42_spill] sm:$0xff] %v5283_v0  ;;  %7347 = vst [vmem:[#allocation46_spill] sm:$0xff] %v5315_v63  ;;  %v5329_v31 = vmul.f32 %v5074_v26, %v5283_v0  ;;  %v5333_v10 = vld [vmem:[#allocation2 + $0x18] sm:$0xf0]  ;;  %v1877_v60 = vrot.slane %v1850_v59, 2  ;;  %v5343_v9 = vsel %vm1665_vm2, %v1870_v57, %v1871_v11  ;;  %v5346_v13 = vsel %vm1665_vm2, %v1873_v56, %v1874_v33 }
 0x193   : > { %7349 = vst [vmem:[#allocation48_spill] sm:$0xff] %v5340_v35  ;;  %7350 = vst [vmem:[#allocation49_spill] sm:$0xff] %v5343_v9  ;;  %v2564_v0 = vmul.f32 %v5074_v26, %v5315_v63  ;;  %v2237_v48 = vrot.slane %v5307_v16, 3  ;;  %v2235_v24 = vrot.slane %v2207_v15, 3  ;;  %v2563_v61 = vmul.f32 %v5099_v40, %v5321_v39  ;;  %v5371_v15 = vld [vmem:[#allocation2 + $0x58] sm:$0xf] }
 0x194   : > { %1020 = vrot.lane.b32.xlu1 %v4985_v52, %s4543_s16  ;;  %1016 = vrot.lane.b32.xlu0 %v4981_v50, %s4543_s16  ;;  %7351 = vst [vmem:[#allocation50_spill] sm:$0xff] %v5346_v13  ;;  %v5352_v30 = vsel %vm1665_vm2, %v1876_v22, %v1877_v60  ;;  %v2241_v59 = vrot.slane %v5313_v4, 3  ;;  %v2239_v57 = vrot.slane %v5319_v18, 3  ;;  %v2558_v56 = vmul.f32 %v5126_v2, %v5333_v10  ;;  %v5360_v13 = vld [vmem:[#allocation2 + $0x8] sm:$0xf] }
 0x195   : > { %7352 = vst [vmem:[#allocation51_spill] sm:$0xff] %v5352_v30  ;;  %7353 = vst [vmem:[#allocation52_spill] sm:$0xff] %v5360_v13  ;;  %v5363_v35 = vsel %vm1665_vm2, %v1868_v17, %v1879_v27  ;;  %v2582_v22 = vrot.slane %v5329_v31, 4  ;;  %v2579_v16 = vrot.slane %v2555_v54, 4  ;;  %v2585_v4 = vrot.slane %v5337_v34, 4 }
 0x196   : > { %7354 = vst [vmem:[#allocation53_spill] sm:$0xff] %v5363_v35  ;;  %7355 = vst [vmem:[#allocation54_spill] sm:$0xff] %v5371_v15  ;;  %v7356_v18 = vrot.slane %v5207_v23, 2  ;;  %v2593_v27 = vrot.slane %v2564_v0, 4  ;;  %v5379_v17 = vsel %vm1665_vm2, %v1874_v33, %v1883_v3  ;;  %v7359_v35 = vrot.slane %v5215_v42, 2 }
 0x197   : > { %7358 = vst [vmem:[#allocation56_spill] sm:$0xff] %v5379_v17  ;;  %v2203_v54 = vmul.f32 %v5059_v20, %v4981_v50  ;;  %v2591_v31 = vrot.slane %v2563_v61, 4  ;;  %v2565_v34 = vmul.f32 %v5102_v41, %v5360_v13  ;;  %v2204_v23 = vmul.f32 %v5056_v19, %v4985_v52  ;;  %v7406_v17 = vld [vmem:[#allocation28_spill] sm:$0xff] }
 0x198   : > { %1028 = vrot.lane.b32.xlu1 %v4987_v53, %s4543_s16  ;;  %1024 = vrot.lane.b32.xlu0 %v4983_v51, %s4543_s16  ;;  %v5376_v30 = vsel %vm1665_vm2, %v1871_v11, %v7356_v18  ;;  %v5384_v9 = vsel %vm1665_vm2, %v1877_v60, %v7359_v35  ;;  %v2205_v0 = vmul.f32 %v5071_v25, %v4983_v51  ;;  %v7361_v35 = vrot.slane %v5241_v55, 3  ;;  %v7414_v63 = vld [vmem:[#allocation41_spill] sm:$0xff] }
 0x199   : > { %7357 = vst [vmem:[#allocation55_spill] sm:$0xff] %v5376_v30  ;;  %7360 = vst [vmem:[#allocation57_spill] sm:$0xff] %v5384_v9  ;;  %v2566_v3 = vmul.f32 %v5126_v2, %v5371_v15  ;;  %v2224_v42 = vrot.slane %v2203_v54, 3  ;;  %v2206_v11 = vmul.f32 %v5062_v21, %v4987_v53  ;;  %v2559_v20 = vmul.f32 %v5099_v40, %v4981_v50 }
 0x19a   : > { %v2227_v19 = vrot.slane %v2204_v23, 3  ;;  %v2230_v33 = vrot.slane %v2205_v0, 3  ;;  %v2560_v25 = vmul.f32 %v5074_v26, %v4985_v52  ;;  %v2561_v60 = vmul.f32 %v5102_v41, %v4983_v51 }
 0x19b   : > { %v5411_v21 = vsel %vm2021_vm3, %v7361_v35, %v2224_v42  ;;  %v2233_v40 = vrot.slane %v2206_v11, 3  ;;  %v5414_v61 = vsel %vm2021_vm3, %v2224_v42, %v2235_v24  ;;  %v2580_v18 = vrot.slane %v2559_v20, 4 }
 0x19c   : > { %1085 = vrot.lane.b32.xlu1 %v4985_v52, %s4544_s9  ;;  %1081 = vrot.lane.b32.xlu0 %v4981_v50, %s4544_s9  ;;  %7362 = vst [vmem:[#allocation58_spill] sm:$0xff] %v5411_v21  ;;  %7363 = vst [vmem:[#allocation59_spill] sm:$0xff] %v5414_v61  ;;  %v2595_v54 = vrot.slane %v2565_v34, 4  ;;  %v7364_v23 = vrot.slane %v5235_v14, 3  ;;  %v7366_v26 = vrot.slane %v5252_v12, 3  ;;  %v5427_v55 = vsel %vm2021_vm3, %v2227_v19, %v2237_v48 }
 0x19d   : > { %7368 = vst [vmem:[#allocation62_spill] sm:$0xff] %v5427_v55  ;;  %v7369_v11 = vrot.slane %v5245_v1, 3  ;;  %v5435_v34 = vsel %vm2021_vm3, %v2230_v33, %v2239_v57  ;;  %v5438_v14 = vsel %vm2021_vm3, %v2233_v40, %v2241_v59  ;;  %v5441_v42 = vsel %vm2377_vm4, %v2579_v16, %v2580_v18  ;;  %v1208_v61 = vld [vmem:[#allocation8 + $0x3] ss:$8 sm:$0xf] }
 0x19e   : > { %v5419_v0 = vsel %vm2021_vm3, %v7364_v23, %v2227_v19  ;;  %v5424_v41 = vsel %vm2021_vm3, %v7366_v26, %v2230_v33  ;;  %7371 = vst [vmem:[#allocation64_spill] sm:$0xff] %v5435_v34  ;;  %7372 = vst [vmem:[#allocation65_spill] sm:$0xff] %v5438_v14  ;;  %v2562_v12 = vmul.f32 %v5126_v2, %v4987_v53  ;;  %v2583_v1 = vrot.slane %v2560_v25, 4  ;;  %v7402_v55 = vld [vmem:[#allocation25_spill] sm:$0xff] }
 0x19f   : > { %7365 = vst [vmem:[#allocation60_spill] sm:$0xff] %v5419_v0  ;;  %7367 = vst [vmem:[#allocation61_spill] sm:$0xff] %v5424_v41  ;;  %v5432_v24 = vsel %vm2021_vm3, %v7369_v11, %v2233_v40  ;;  %v2586_v48 = vrot.slane %v2561_v60, 4  ;;  %v5450_v57 = vsel %vm2377_vm4, %v2580_v18, %v2591_v31  ;;  %v2588_v20 = vrot.slane %v2558_v56, 4  ;;  %v7404_v41 = vld [vmem:[#allocation26_spill] sm:$0xff]  ;;  %v7405_v0 = vld [vmem:[#allocation27_spill] sm:$0xff] }
 0x1a0   : > { %1093 = vrot.lane.b32.xlu1 %v4987_v53, %s4544_s9  ;;  %1089 = vrot.lane.b32.xlu0 %v4983_v51, %s4544_s9  ;;  %7370 = vst [vmem:[#allocation63_spill] sm:$0xff] %v5432_v24  ;;  %7373 = vst [vmem:[#allocation66_spill] sm:$0xff] %v5441_v42  ;;  %v2597_v59 = vrot.slane %v2566_v3, 4  ;;  %v5453_v19 = vsel %vm2377_vm4, %v2582_v22, %v2583_v1  ;;  %v2589_v33 = vrot.slane %v2562_v12, 4  ;;  %v1324_v22 = vrot.slane %v5093_v37, 1 }
 0x1a1   : > { %7374 = vst [vmem:[#allocation67_spill] sm:$0xff] %v5450_v57  ;;  %7375 = vst [vmem:[#allocation68_spill] sm:$0xff] %v5453_v19  ;;  %v5456_v16 = vsel %vm2377_vm4, %v2585_v4, %v2586_v48  ;;  %v5459_v35 = vsel %vm2377_vm4, %v2583_v1, %v2593_v27  ;;  %v5462_v40 = vsel %vm2377_vm4, %v2586_v48, %v2595_v54  ;;  %v1322_v4 = vrot.slane %v5095_v38, 1 }
 0x1a2   : > { %7376 = vst [vmem:[#allocation69_spill] sm:$0xff] %v5456_v16  ;;  %7377 = vst [vmem:[#allocation70_spill] sm:$0xff] %v5459_v35  ;;  %v5469_v2 = vsel %vm2377_vm4, %v2588_v20, %v2589_v33  ;;  %v5472_v56 = vsel %vm2377_vm4, %v2589_v33, %v2597_v59  ;;  %v7381_v27 = vrot.slane %v4985_v52, 1  ;;  %v7382_v3 = vrot.slane %v4981_v50, 1 }
 0x1a3   : > { %7378 = vst [vmem:[#allocation71_spill] sm:$0xff] %v5462_v40  ;;  %7379 = vst [vmem:[#allocation72_spill] sm:$0xff] %v5469_v2  ;;  %v1326_v37 = vrot.slane %v5109_v43, 1  ;;  %v7383_v38 = vrot.slane %v4987_v53, 1  ;;  %v1669_v43 = vrot.slane %v5118_v58, 2  ;;  %v1670_v60 = vrot.slane %v4985_v52, 2 }
 0x1a4   : > { %1188 = vrot.lane.b32.xlu1 %v4985_v52, %s4545_s15  ;;  %1184 = vrot.lane.b32.xlu0 %v4981_v50, %s4545_s15  ;;  %7380 = vst [vmem:[#allocation73_spill] sm:$0xff] %v5472_v56  ;;  %v1325_v31 = vsel %vm1309_vm1, %v7381_v27, %v1324_v22  ;;  %v1667_v18 = vrot.slane %v4981_v50, 2  ;;  %v1675_v26 = vrot.slane %v5129_v5, 2  ;;  %v1672_v11 = vrot.slane %v5131_v8, 2 }
 0x1a5   : > { %v1671_v54 = vsel %vm1665_vm2, %v1669_v43, %v1670_v60  ;;  %v1673_v58 = vrot.slane %v4983_v51, 2  ;;  %v1680_v5 = vrot.slane %v5156_v28, 2  ;;  %v1678_v8 = vrot.slane %v5158_v29, 2  ;;  %v1247_v40 = vld [vmem:[#allocation8 + $0x4] ss:$8 sm:$0xf] }
 0x1a6   : > { %v1684_v59 = vrot.slane %v5160_v6, 2  ;;  %v1682_v33 = vrot.slane %v5178_v7, 2 }
 0x1a7   : > { %v1674_v1 = vsel %vm1665_vm2, %v1672_v11, %v1673_v58  ;;  %v5533_v48 = vsel %vm1665_vm2, %v1670_v60, %v1680_v5  ;;  %v5536_v20 = vsel %vm1665_vm2, %v1667_v18, %v1678_v8  ;;  %v7385_v60 = vld [vmem:[#allocation33_spill] sm:$0xff] }
 0x1a8   : > { %1196 = vrot.lane.b32.xlu1 %v4987_v53, %s4545_s15  ;;  %1192 = vrot.lane.b32.xlu0 %v4983_v51, %s4545_s15  ;;  %v1144_v11 = vld [vmem:[#allocation8 + $0x2] ss:$8 sm:$0xf] }
 0x1ac   : > { %1342 = vrot.lane.b32.xlu1 %v5183_v46, %s4543_s16  ;;  %1338 = vrot.lane.b32.xlu0 %v5169_v62, %s4543_s16 }
 0x1b0   : > { %1350 = vrot.lane.b32.xlu1 %v5188_v36, %s4543_s16  ;;  %1346 = vrot.lane.b32.xlu0 %v5203_v47, %s4543_s16 }
 0x1b4   : > { %1405 = vrot.lane.b32.xlu1 %v5183_v46, %s4544_s9  ;;  %1401 = vrot.lane.b32.xlu0 %v5169_v62, %s4544_s9 }
 0x1b8   : > { %1413 = vrot.lane.b32.xlu1 %v5188_v36, %s4544_s9  ;;  %1409 = vrot.lane.b32.xlu0 %v5203_v47, %s4544_s9 }
 0x1bc   : > { %1551 = vrot.lane.b32.xlu1 %v5183_v46, %s4545_s15  ;;  %1547 = vrot.lane.b32.xlu0 %v5169_v62, %s4545_s15  ;;  %v1323_v46 = vsel %vm1309_vm1, %v7382_v3, %v1322_v4  ;;  %v1328_v62 = vrot.slane %v5116_v49, 1  ;;  %v1666_v49 = vrot.slane %v5079_v32, 2  ;;  %v1676_v32 = vrot.slane %v4987_v53, 2 }
 0x1bd   : > { %v5552_v4 = vsel %vm1665_vm2, %v1673_v58, %v1682_v33 }
 0x1be   : > { %v1668_v23 = vsel %vm1665_vm2, %v1666_v49, %v1667_v18  ;;  %v1677_v12 = vsel %vm1665_vm2, %v1675_v26, %v1676_v32  ;;  %v5549_v22 = vsel %vm1665_vm2, %v1676_v32, %v1684_v59  ;;  %v7251_v49 = vrot.slane %v4981_v50, 3  ;;  %v1041_v59 = vld [vmem:[#allocation8] ss:$8 sm:$0xf] }
 0x1bf   : > { %v2031_v18 = vrot.slane %v7385_v60, 3  ;;  %v7253_v26 = vrot.slane %v4987_v53, 3  ;;  %v7391_v60 = vld [vmem:[#allocation18_spill] sm:$0xff] }
 0x1c0   : > { %1559 = vrot.lane.b32.xlu1 %v5188_v36, %s4545_s15  ;;  %1555 = vrot.lane.b32.xlu0 %v5203_v47, %s4545_s15  ;;  %v1329_v36 = vsel %vm1309_vm1, %v7383_v38, %v1328_v62  ;;  %v7384_v47 = vrot.slane %v4983_v51, 1  ;;  %v2025_v38 = vrot.slane %v5198_v45, 3 }
 0x1c1   : > { %v5622_v8 = vsel %vm2021_vm3, %v2031_v18, %v7253_v26  ;;  %v1105_v18 = vld [vmem:[#allocation8 + $0x1] ss:$8 sm:$0xf] }
 0x1c2   : > { %v1327_v25 = vsel %vm1309_vm1, %v7384_v47, %v1326_v37  ;;  %v7252_v47 = vrot.slane %v4985_v52, 3  ;;  %v5694_v39 = vrot.slane %v1105_v18, %v7391_v60 }
 0x1c4   : > { %1344 = vrot.lane.b32.xlu1 %v1325_v31, %s4543_s16  ;;  %1340 = vrot.lane.b32.xlu0 %v1323_v46, %s4543_s16  ;;  %v5597_v45 = vsel %vm2021_vm3, %v2025_v38, %v7252_v47  ;;  %v7390_v38 = vld [vmem:[#allocation19_spill] sm:$0xff]  ;;  %v7393_v47 = vld [vmem:[#allocation20_spill] sm:$0xff] }
 0x1c5   : > { %v1153_v56 = vrot.slane %v1144_v11, %v7393_v47  ;;  %v5649_v35 = vrot.slane %v1247_v40, %v7390_v38  ;;  %v5655_v2 = vrot.slane %v1105_v18, %v7393_v47  ;;  %v5658_v16 = vrot.slane %v1105_v18, %v7390_v38 }
 0x1c7   : > { %7397 = vst [vmem:[#allocation76_spill] sm:$0xff] %v5658_v16  ;;  %v5663_v42 = vmul.f32 %v1153_v56, %v4985_v52  ;;  %v5686_v30 = vmul.f32 %v1153_v56, %v7406_v17  ;;  %v5703_v17 = vrot.slane %v1208_v61, %v7391_v60  ;;  %v7413_v56 = vld [vmem:[#allocation37_spill] sm:$0xff] }
 0x1c8   : > { %1352 = vrot.lane.b32.xlu1 %v1329_v36, %s4543_s16  ;;  %1348 = vrot.lane.b32.xlu0 %v1327_v25, %s4543_s16 }
 0x1c9   : > { %7398 = vst [vmem:[#allocation77_spill] sm:$0xff] %v5663_v42 }
 0x1cc   : > { %1407 = vrot.lane.b32.xlu1 %v1325_v31, %s4544_s9  ;;  %1403 = vrot.lane.b32.xlu0 %v1323_v46, %s4544_s9 }
 0x1d0   : > { %1415 = vrot.lane.b32.xlu1 %v1329_v36, %s4544_s9  ;;  %1411 = vrot.lane.b32.xlu0 %v1327_v25, %s4544_s9 }
 0x1d4   : > { %1698 = vrot.lane.b32.xlu1 %v1671_v54, %s4543_s16  ;;  %1694 = vrot.lane.b32.xlu0 %v1668_v23, %s4543_s16 }
 0x1d8   : > { %1706 = vrot.lane.b32.xlu1 %v1677_v12, %s4543_s16  ;;  %1702 = vrot.lane.b32.xlu0 %v1674_v1, %s4543_s16 }
 0x1dc   : > { %1553 = vrot.lane.b32.xlu1 %v1325_v31, %s4545_s15  ;;  %1549 = vrot.lane.b32.xlu0 %v1323_v46, %s4545_s15 }
 0x1e0   : > { %1561 = vrot.lane.b32.xlu1 %v1329_v36, %s4545_s15  ;;  %1557 = vrot.lane.b32.xlu0 %v1327_v25, %s4545_s15  ;;  %v2022_v36 = vrot.slane %v5217_v44, 3 }
 0x1e2   : > { %v5605_v44 = vsel %vm2021_vm3, %v2022_v36, %v7251_v49  ;;  %v1157_v36 = vrot.slane %v1144_v11, %v7390_v38 }
 0x1e4   : > { %1761 = vrot.lane.b32.xlu1 %v1671_v54, %s4544_s9  ;;  %1757 = vrot.lane.b32.xlu0 %v1668_v23, %s4544_s9  ;;  %v5672_v34 = vmul.f32 %v1157_v36, %v4983_v51  ;;  %v5677_v24 = vmul.f32 %v1157_v36, %v7402_v55 }
 0x1e6   : > { %7401 = vst [vmem:[#allocation80_spill] sm:$0xff] %v5672_v34  ;;  %7403 = vst [vmem:[#allocation25_spill] sm:$0xff] %v5677_v24  ;;  %v5710_v34 = vrot.slane %v1208_v61, %v7393_v47 }
 0x1e8   : > { %1769 = vrot.lane.b32.xlu1 %v1677_v12, %s4544_s9  ;;  %1765 = vrot.lane.b32.xlu0 %v1674_v1, %s4544_s9 }
 0x1ec   : > { %1700 = vrot.lane.b32.xlu1 %v5533_v48, %s4543_s16  ;;  %1696 = vrot.lane.b32.xlu0 %v5536_v20, %s4543_s16 }
 0x1ee   : > { %v5544_v28 = vpop.permute.xlu1 %1022  ;;  %v5546_v29 = vpop.permute.xlu0 %1014 }
 0x1f0   : > { %1708 = vrot.lane.b32.xlu1 %v5549_v22, %s4543_s16  ;;  %1704 = vrot.lane.b32.xlu0 %v5552_v4, %s4543_s16 }
 0x1f2   : > { %v5558_v6 = vpop.permute.xlu1 %1026  ;;  %v5560_v7 = vpop.permute.xlu0 %1079 }
 0x1f4   : > { %1907 = vrot.lane.b32.xlu1 %v1671_v54, %s4545_s15  ;;  %1903 = vrot.lane.b32.xlu0 %v1668_v23, %s4545_s15  ;;  %v7386_v54 = vld [vmem:[#allocation34_spill] sm:$0xff] }
 0x1f5   : > { %v2028_v23 = vrot.slane %v7386_v54, 3  ;;  %v1149_v54 = vrot.slane %v1144_v11, %v7391_v60 }
 0x1f6   : > { %v5564_v27 = vpop.permute.xlu1 %1083  ;;  %v5566_v31 = vpop.permute.xlu0 %1087 }
 0x1f7   : > { %v5666_v19 = vmul.f32 %v1149_v54, %v4981_v50  ;;  %v5680_v21 = vmul.f32 %v1149_v54, %v7404_v41  ;;  %v7410_v41 = vld [vmem:[#allocation35_spill] sm:$0xff]  ;;  %v7411_v54 = vld [vmem:[#allocation36_spill] sm:$0xff] }
 0x1f8   : > { %1915 = vrot.lane.b32.xlu1 %v1677_v12, %s4545_s15  ;;  %1911 = vrot.lane.b32.xlu0 %v1674_v1, %s4545_s15  ;;  %v7254_v12 = vrot.slane %v4983_v51, 3  ;;  %v7389_v1 = vlaneseq  ;;  %v2036_v36 = vrot.slane %v7410_v41, 3  ;;  %7412 = vst [vmem:[#allocation35_spill] sm:$0xff] %v5703_v17 }
 0x1f9   : > { %7399 = vst [vmem:[#allocation78_spill] sm:$0xff] %v5666_v19  ;;  %v5731_v19 = vrot.slane %v1247_v40, %v7393_v47 }
 0x1fa   : > { %v5570_v3 = vpop.permute.xlu1 %1091  ;;  %v5572_v46 = vpop.permute.xlu0 %1182  ;;  %v5617_v5 = vand.u32 127, %v7389_v1  ;;  %v5629_v33 = vsel %vm2021_vm3, %v2028_v23, %v7254_v12  ;;  %v7392_v1 = vld [vmem:[#allocation21_spill] sm:$0xff]  ;;  %v5643_v23 = vrot.slane %v1041_v59, %v7391_v60 }
 0x1fb   : > { %v1161_v49 = vrot.slane %v1144_v11, %v7392_v1  ;;  %v5646_v12 = vrot.slane %v1041_v59, %v7392_v1  ;;  %v5652_v11 = vrot.slane %v1247_v40, %v7392_v1  ;;  %v5697_v55 = vrot.slane %v1105_v18, %v7392_v1  ;;  %7416 = vst [vmem:[#allocation36_spill] sm:$0xff] %v5731_v19 }
 0x1fc   : > { %1763 = vrot.lane.b32.xlu1 %v5533_v48, %s4544_s9  ;;  %1759 = vrot.lane.b32.xlu0 %v5536_v20, %s4544_s9  ;;  %vm1032_vm5 = vcmp.lt.s32.totalorder %v5617_v5, 64  ;;  %vm1095_vm6 = vcmp.lt.s32.totalorder %v5617_v5, 32  ;;  %vm1198_vm7 = vcmp.lt.s32.totalorder %v5617_v5, 96  ;;  %v5713_v18 = vrot.slane %v1208_v61, %v7390_v38 }
 0x1fd   : > { %7396 = vst [vmem:[#allocation75_spill] sm:$0xff] %v5646_v12  ;;  %v5669_v14 = vmul.f32 %v1161_v49, %v4987_v53  ;;  %v5683_v9 = vmul.f32 %v1161_v49, %v7405_v0  ;;  %7409 = vst [vmem:[#allocation28_spill] sm:$0xff] %v5697_v55  ;;  %v2034_v0 = vrot.slane %v7411_v54, 3  ;;  %v2040_v49 = vrot.slane %v7413_v56, 3  ;;  %v7415_v54 = vld [vmem:[#allocation42_spill] sm:$0xff] }
 0x1fe   : > { %v5578_v62 = vpop.permute.xlu1 %1186  ;;  %v5580_v37 = vpop.permute.xlu0 %1190  ;;  %v5716_v41 = vrot.slane %v1208_v61, %v7392_v1  ;;  %v5725_v56 = vrot.slane %v1041_v59, %v7390_v38 }
 0x1ff   : > { %7400 = vst [vmem:[#allocation79_spill] sm:$0xff] %v5669_v14  ;;  %v2038_v14 = vrot.slane %v7414_v63, 3  ;;  %v5728_v63 = vrot.slane %v1247_v40, %v7391_v60  ;;  %v7422_v40 = vld [vmem:[#allocation44_spill] sm:$0xff] }
 0x200   : > { %1771 = vrot.lane.b32.xlu1 %v5549_v22, %s4544_s9  ;;  %1767 = vrot.lane.b32.xlu0 %v5552_v4, %s4544_s9  ;;  %v2378_v19 = vrot.slane %v7422_v40, 4  ;;  %v2387_v40 = vrot.slane %v5333_v10, 4 }
 0x202   : > { %v5589_v25 = vpop.permute.xlu1 %1194  ;;  %v5591_v43 = vpop.permute.xlu0 %1018 }
 0x204   : > { %2054 = vrot.lane.b32.xlu1 %v5597_v45, %s4543_s16  ;;  %2050 = vrot.lane.b32.xlu0 %v5605_v44, %s4543_s16 }
 0x206   : > { %v5611_v32 = vpop.permute.xlu1 %1020  ;;  %v5613_v58 = vpop.permute.xlu0 %1016 }
 0x207   : > { %7387 = vst [vmem:[#allocation33_spill] sm:$0xff] %v5611_v32  ;;  %7388 = vst [vmem:[#allocation34_spill] sm:$0xff] %v5613_v58 }
 0x208   : > { %2062 = vrot.lane.b32.xlu1 %v5622_v8, %s4543_s16  ;;  %2058 = vrot.lane.b32.xlu0 %v5629_v33, %s4543_s16 }
 0x20a   : > { %v5637_v26 = vpop.permute.xlu1 %1028  ;;  %v5639_v57 = vpop.permute.xlu0 %1024 }
 0x20b   : > { %7394 = vst [vmem:[#allocation21_spill] sm:$0xff] %v5637_v26  ;;  %7395 = vst [vmem:[#allocation74_spill] sm:$0xff] %v5639_v57  ;;  %v1363_v57 = vld [vmem:[#allocation8 + $0x5] ss:$8 sm:$0xf] }
 0x20c   : > { %2117 = vrot.lane.b32.xlu1 %v5597_v45, %s4544_s9  ;;  %2113 = vrot.lane.b32.xlu0 %v5605_v44, %s4544_s9  ;;  %v1611_v26 = vld [vmem:[#allocation8 + $0x21] ss:$8 sm:$0xf]  ;;  %v5769_v24 = vrot.slane %v1363_v57, %v7393_v47  ;;  %v5785_v10 = vrot.slane %v1363_v57, %v7391_v60 }
 0x20e   : > { %v5688_v13 = vpop.permute.xlu1 %1085  ;;  %v5690_v15 = vpop.permute.xlu0 %1081  ;;  %7427 = vst [vmem:[#allocation82_spill] sm:$0xff] %v5769_v24  ;;  %7433 = vst [vmem:[#allocation87_spill] sm:$0xff] %v5785_v10 }
 0x20f   : > { %7407 = vst [vmem:[#allocation26_spill] sm:$0xff] %v5688_v13  ;;  %7408 = vst [vmem:[#allocation27_spill] sm:$0xff] %v5690_v15  ;;  %v2381_v15 = vrot.slane %v7415_v54, 4  ;;  %v5722_v13 = vrot.slane %v1041_v59, %v7393_v47  ;;  %v7419_v54 = vrot.slane %v4985_v52, 3  ;;  %v7420_v59 = vrot.slane %v4981_v50, 3 }
 0x210   : > { %2125 = vrot.lane.b32.xlu1 %v5622_v8, %s4544_s9  ;;  %2121 = vrot.lane.b32.xlu0 %v5629_v33, %s4544_s9 }
 0x211   : > { %v5740_v58 = vsel %vm2021_vm3, %v7419_v54, %v2036_v36  ;;  %v5745_v32 = vsel %vm2021_vm3, %v7420_v59, %v2034_v0  ;;  %v7423_v36 = vrot.slane %v4987_v53, 3  ;;  %v7425_v0 = vrot.slane %v4983_v51, 3 }
 0x212   : > { %v5733_v42 = vpop.permute.xlu1 %1093  ;;  %v5735_v61 = vpop.permute.xlu0 %1089  ;;  %7421 = vst [vmem:[#allocation42_spill] sm:$0xff] %v5745_v32  ;;  %v5806_v32 = vrot.slane %v1363_v57, %v7390_v38 }
 0x213   : > { %7417 = vst [vmem:[#allocation37_spill] sm:$0xff] %v5733_v42  ;;  %7418 = vst [vmem:[#allocation41_spill] sm:$0xff] %v5735_v61  ;;  %v1033_v61 = vsel %vm1032_vm5, %v5544_v28, %v5558_v6  ;;  %v5758_v54 = vsel %vm2021_vm3, %v7423_v36, %v2040_v49  ;;  %v5763_v59 = vsel %vm2021_vm3, %v7425_v0, %v2038_v14  ;;  %v7429_v42 = vrot.slane %v4985_v52, 4 }
 0x214   : > { %1909 = vrot.lane.b32.xlu1 %v5533_v48, %s4545_s15  ;;  %7424 = vst [vmem:[#allocation44_spill] sm:$0xff] %v5758_v54  ;;  %7426 = vst [vmem:[#allocation81_spill] sm:$0xff] %v5763_v59  ;;  %1905 = vrot.lane.b32.xlu0 %v5536_v20, %s4545_s15  ;;  %v5772_v48 = vrot.slane %v1611_v26, %v7391_v60  ;;  %v1426_v20 = vld [vmem:[#allocation8 + $0x6] ss:$8 sm:$0xf]  ;;  %v7276_v59 = vrot.slane %v4987_v53, 4  ;;  %v5796_v36 = vrot.slane %v1611_v26, %v7392_v1 }
 0x215   : > { %v5777_v49 = vsel %vm2377_vm4, %v2381_v15, %v7429_v42  ;;  %v7434_v54 = vld [vmem:[#allocation45_spill] sm:$0xff]  ;;  %v1039_v15 = vsel %vm1032_vm5, %v5558_v6, %v5546_v29  ;;  %v1066_v42 = vmul.f32 %v5646_v12, %v1033_v61  ;;  %v7435_v52 = vrot.slane %v4981_v50, 4  ;;  %7437 = vst [vmem:[#allocation88_spill] sm:$0xff] %v5806_v32 }
 0x216   : > { %7428 = vst [vmem:[#allocation83_spill] sm:$0xff] %v5772_v48  ;;  %7430 = vst [vmem:[#allocation84_spill] sm:$0xff] %v5777_v49  ;;  %v5780_v14 = vpop.permute.xlu1 %1188  ;;  %v5782_v0 = vpop.permute.xlu0 %1184  ;;  %v5809_v48 = vrot.slane %v1363_v57, %v7392_v1  ;;  %v5812_v6 = vrot.slane %v1611_v26, %v7393_v47  ;;  %v5829_v57 = vrot.slane %v1426_v20, %v7393_v47  ;;  %v5834_v53 = vld [vmem:[#allocation8 + $0x20] ss:$8 sm:$0xf] }
 0x217   : > { %7431 = vst [vmem:[#allocation85_spill] sm:$0xff] %v5780_v14  ;;  %7432 = vst [vmem:[#allocation86_spill] sm:$0xff] %v5782_v0  ;;  %v5801_v49 = vsel %vm2377_vm4, %v2378_v19, %v7435_v52  ;;  %v5817_v0 = vsel %vm2377_vm4, %v2387_v40, %v7276_v59  ;;  %v1201_v52 = vsel %vm1198_vm7, %v5578_v62, %v5580_v37 }
 0x218   : > { %7436 = vst [vmem:[#allocation45_spill] sm:$0xff] %v5801_v49  ;;  %1917 = vrot.lane.b32.xlu1 %v5549_v22, %s4545_s15  ;;  %7438 = vst [vmem:[#allocation89_spill] sm:$0xff] %v5809_v48  ;;  %1913 = vrot.lane.b32.xlu0 %v5552_v4, %s4545_s15  ;;  %v5826_v19 = vrot.slane %v1611_v26, %v7390_v38  ;;  %v5832_v22 = vrot.slane %v1426_v20, %v7391_v60 }
 0x219   : > { %7439 = vst [vmem:[#allocation90_spill] sm:$0xff] %v5812_v6  ;;  %7440 = vst [vmem:[#allocation91_spill] sm:$0xff] %v5817_v0  ;;  %v1063_v40 = vmul.f32 %v5643_v23, %v1039_v15  ;;  %v1100_v59 = vsel %vm1095_vm6, %v5560_v7, %v5564_v27  ;;  %v5846_v26 = vrot.slane %v1426_v20, %v7390_v38 }
 0x21a   : > { %v5841_v50 = vpop.permute.xlu1 %1196  ;;  %v5843_v4 = vpop.permute.xlu0 %1192  ;;  %v5849_v0 = vrot.slane %v1426_v20, %v7392_v1  ;;  %v1177_v49 = vadd.f32 %v5683_v9, %v1066_v42  ;;  %v1203_v14 = vsel %vm1198_vm7, %v5572_v46, %v5578_v62  ;;  %v1037_v12 = vsel %vm1032_vm5, %v5546_v29, %v5591_v43 }
 0x21b   : > { %v5864_v38 = vsel %vm1198_vm7, %v5843_v4, %v5841_v50  ;;  %v1272_v20 = vmul.f32 %v5652_v11, %v1039_v15  ;;  %v1098_v9 = vsel %vm1095_vm6, %v5564_v27, %v5566_v31  ;;  %v1231_v62 = vmul.f32 %v5710_v34, %v1201_v52 }
 0x21c   : > { %7441 = vst [vmem:[#allocation92_spill] sm:$0xff] %v5864_v38  ;;  %2263 = vrot.lane.b32.xlu1 %v5597_v45, %s4545_s15  ;;  %v5876_v29 = vrot.slane %v5834_v53, %v7391_v60  ;;  %v1128_v42 = vmul.f32 %v5655_v2, %v1100_v59  ;;  %v1096_v15 = vsel %vm1095_vm6, %v5566_v31, %v5570_v3 }
 0x21d   : > { %v1102_v27 = vsel %vm1095_vm6, %v5570_v3, %v5560_v7  ;;  %v1199_v45 = vsel %vm1198_vm7, %v5580_v37, %v5589_v25  ;;  %2259 = vrot.lane.b32.xlu0 %v5605_v44, %s4545_s15  ;;  %v1230_v59 = vmul.f32 %v5703_v17, %v1203_v14  ;;  %v1205_v31 = vsel %vm1198_vm7, %v5589_v25, %v5572_v46 }
 0x21e   : > { %v1035_v7 = vsel %vm1032_vm5, %v5591_v43, %v5544_v28  ;;  %v1064_v3 = vmul.f32 %v5722_v13, %v1037_v12  ;;  %v1343_v52 = vpop.permute.xlu1 %1342  ;;  %v1339_v60 = vpop.permute.xlu0 %1338  ;;  %v1174_v37 = vadd.f32 %v5680_v21, %v1063_v40  ;;  %v5905_v44 = vmul.f32 %v5649_v35, %v1033_v61 }
 0x21f   : > { %v5907_v14 = vadd.f32 %v1272_v20, %v1177_v49  ;;  %v1358_v38 = vsel %vm1032_vm5, %v1339_v60, %v1343_v52  ;;  %v1127_v46 = vmul.f32 %v5694_v39, %v1102_v27  ;;  %v1239_v25 = vadd.f32 %v1231_v62, %v1128_v42 }
 0x220   : > { %v1232_v17 = vmul.f32 %v5713_v18, %v1199_v45  ;;  %v1386_v28 = vmul.f32 %v5769_v24, %v1358_v38  ;;  %2271 = vrot.lane.b32.xlu1 %v5622_v8, %s4545_s15  ;;  %v1129_v21 = vmul.f32 %v5658_v16, %v1098_v9  ;;  %v1130_v43 = vmul.f32 %v5697_v55, %v1096_v15  ;;  %v7442_v8 = vld [vmem:[#allocation36_spill] sm:$0xff] }
 0x221   : > { %v1233_v61 = vmul.f32 %v5716_v41, %v1205_v31  ;;  %v1065_v49 = vmul.f32 %v5725_v56, %v1035_v7  ;;  %2267 = vrot.lane.b32.xlu0 %v5629_v33, %s4545_s15  ;;  %v1238_v40 = vadd.f32 %v1230_v59, %v1127_v46  ;;  %v1175_v20 = vadd.f32 %v5686_v30, %v1064_v3  ;;  %v7443_v30 = vld [vmem:[#allocation30_spill] sm:$0xff]  ;;  %v7444_v46 = vld [vmem:[#allocation25_spill] sm:$0xff] }
 0x222   : > { %v1269_v62 = vmul.f32 %v5728_v63, %v1037_v12  ;;  %v1394_v42 = vadd.f32 %v1386_v28, %v1239_v25  ;;  %v1351_v27 = vpop.permute.xlu1 %1350  ;;  %v1347_v45 = vpop.permute.xlu0 %1346  ;;  %v1270_v24 = vmul.f32 %v7442_v8, %v1035_v7  ;;  %v1240_v33 = vadd.f32 %v1232_v17, %v1129_v21  ;;  %v7447_v21 = vld [vmem:[#allocation34_spill] sm:$0xff] }
 0x223   : > { %v1360_v9 = vsel %vm1032_vm5, %v1351_v27, %v1339_v60  ;;  %v1354_v15 = vsel %vm1032_vm5, %v1347_v45, %v1351_v27  ;;  %v1356_v31 = vsel %vm1032_vm5, %v1343_v52, %v1347_v45  ;;  %v1241_v7 = vadd.f32 %v1233_v61, %v1130_v43  ;;  %v7445_v27 = vld [vmem:[#allocation42_spill] sm:$0xff]  ;;  %v7446_v52 = vld [vmem:[#allocation33_spill] sm:$0xff]  ;;  %v7448_v43 = vld [vmem:[#allocation83_spill] sm:$0xff] }
 0x224   : > { %v1385_v59 = vmul.f32 %v5785_v10, %v1360_v9  ;;  %v1540_v3 = vadd.f32 %v7443_v30, %v1394_v42  ;;  %v1387_v12 = vmul.f32 %v5806_v32, %v1356_v31  ;;  %2056 = vrot.lane.b32.xlu1 %v5740_v58, %s4543_s16  ;;  %v1176_v25 = vadd.f32 %v7444_v46, %v1065_v49 }
 0x225   : > { %v1388_v60 = vmul.f32 %v5809_v48, %v1354_v15  ;;  %v1634_v28 = vmul.f32 %v5812_v6, %v1356_v31  ;;  %2052 = vrot.lane.b32.xlu0 %v7445_v27, %s4543_s16  ;;  %v1278_v17 = vadd.f32 %v1270_v24, %v1175_v20  ;;  %v1038_v42 = vsel %vm1032_vm5, %v7447_v21, %v7446_v52  ;;  %v7449_v6 = vld [vmem:[#allocation29_spill] sm:$0xff]  ;;  %v7450_v24 = vld [vmem:[#allocation31_spill] sm:$0xff] }
 0x226   : > { %v1393_v45 = vadd.f32 %v1385_v59, %v1238_v40  ;;  %v1395_v30 = vadd.f32 %v1387_v12, %v1240_v33  ;;  %v1406_v32 = vpop.permute.xlu1 %1405  ;;  %v1402_v10 = vpop.permute.xlu0 %1401  ;;  %v1633_v61 = vmul.f32 %v7448_v43, %v1358_v38  ;;  %v1635_v16 = vmul.f32 %v5826_v19, %v1354_v15  ;;  %v7451_v40 = vld [vmem:[#allocation44_spill] sm:$0xff] }
 0x227   : > { %v1396_v49 = vadd.f32 %v1388_v60, %v1241_v7  ;;  %v5946_v46 = vadd.f32 %v1634_v28, %v1540_v3  ;;  %v1421_v31 = vsel %vm1095_vm6, %v1402_v10, %v1406_v32  ;;  %v1277_v33 = vadd.f32 %v1269_v62, %v1174_v37  ;;  %v7452_v3 = vld [vmem:[#allocation32_spill] sm:$0xff]  ;;  %v7453_v7 = vld [vmem:[#allocation81_spill] sm:$0xff] }
 0x228   : > { %v1539_v48 = vadd.f32 %v7449_v6, %v1393_v45  ;;  %v1541_v20 = vadd.f32 %v7450_v24, %v1395_v30  ;;  %v1449_v55 = vmul.f32 %v5829_v57, %v1421_v31  ;;  %2064 = vrot.lane.b32.xlu1 %v7451_v40, %s4543_s16  ;;  %v1068_v38 = vmul.f32 %v5722_v13, %v1038_v42  ;;  %v7454_v6 = vld [vmem:[#allocation21_spill] sm:$0xff] }
 0x229   : > { %v1636_v59 = vmul.f32 %v5796_v36, %v1360_v9  ;;  %v1542_v12 = vadd.f32 %v7452_v3, %v1396_v49  ;;  %2060 = vrot.lane.b32.xlu0 %v7453_v7, %s4543_s16  ;;  %v1040_v15 = vsel %vm1032_vm5, %v7454_v6, %v7447_v21  ;;  %v7460_v31 = vrot.slane %v7434_v54, 4 }
 0x22a   : > { %v5965_v60 = vadd.f32 %v1635_v16, %v1541_v20  ;;  %v1457_v28 = vadd.f32 %v1449_v55, %v1278_v17  ;;  %v1414_v45 = vpop.permute.xlu1 %1413  ;;  %v1410_v30 = vpop.permute.xlu0 %1409  ;;  %v5967_v37 = vadd.f32 %v1633_v61, %v1539_v48  ;;  %v1279_v16 = vadd.f32 %v5905_v44, %v1176_v25  ;;  %v7458_v17 = vld [vmem:[#allocation74_spill] sm:$0xff] }
 0x22b   : > { %v1423_v13 = vsel %vm1095_vm6, %v1414_v45, %v1402_v10  ;;  %v1417_v62 = vsel %vm1095_vm6, %v1410_v30, %v1414_v45  ;;  %v1419_v9 = vsel %vm1095_vm6, %v1406_v32, %v1410_v30  ;;  %v5975_v49 = vadd.f32 %v1636_v59, %v1542_v12  ;;  %v5983_v10 = vld [vmem:[#allocation8 + $0x22] ss:$8 sm:$0xf] }
 0x22c   : > { %7455 = vst [vmem:[#allocation36_spill] sm:$0xff] %v5965_v60  ;;  %7456 = vst [vmem:[#allocation30_spill] sm:$0xff] %v5967_v37  ;;  %v1448_v21 = vmul.f32 %v5832_v22, %v1423_v13  ;;  %v1450_v55 = vmul.f32 %v5846_v26, %v1419_v9  ;;  %v1451_v48 = vmul.f32 %v5849_v0, %v1417_v62  ;;  %2119 = vrot.lane.b32.xlu1 %v5740_v58, %s4544_s9  ;;  %v7461_v13 = vld [vmem:[#allocation19_spill] sm:$0xff] }
 0x22d   : > { %7457 = vst [vmem:[#allocation25_spill] sm:$0xff] %v5975_v49  ;;  %v1034_v32 = vsel %vm1032_vm5, %v7458_v17, %v7454_v6  ;;  %v1036_v61 = vsel %vm1032_vm5, %v7446_v52, %v7458_v17  ;;  %2115 = vrot.lane.b32.xlu0 %v7445_v27, %s4544_s9  ;;  %v5997_v44 = vrot.slane %v5834_v53, %v7392_v1  ;;  %v7459_v25 = vrot.slane %v4983_v51, 4  ;;  %v7464_v17 = vld [vmem:[#allocation85_spill] sm:$0xff]  ;;  %v7469_v49 = vld [vmem:[#allocation84_spill] sm:$0xff] }
 0x22e   : > { %v1067_v20 = vmul.f32 %v5643_v23, %v1040_v15  ;;  %v1456_v59 = vadd.f32 %v1448_v21, %v1277_v33  ;;  %v1458_v3 = vadd.f32 %v1450_v55, %v1279_v16  ;;  %v1459_v52 = vadd.f32 %v1451_v48, %v5907_v14  ;;  %v1552_v12 = vpop.permute.xlu1 %1551  ;;  %v1548_v6 = vpop.permute.xlu0 %1547  ;;  %v7462_v33 = vld [vmem:[#allocation77_spill] sm:$0xff] }
 0x22f   : > { %v6004_v24 = vsel %vm2377_vm4, %v7460_v31, %v7459_v25  ;;  %v1567_v45 = vsel %vm1198_vm7, %v1548_v6, %v1552_v12  ;;  %v6012_v30 = vrot.slane %v5834_v53, %v7393_v47  ;;  %v6016_v54 = vrot.slane %v5834_v53, %v7461_v13  ;;  %v7463_v53 = vld [vmem:[#allocation75_spill] sm:$0xff] }
 0x230   : > { %v6020_v23 = vrot.slane %v5983_v10, %v7393_v47  ;;  %v1179_v62 = vadd.f32 %v7462_v33, %v1068_v38  ;;  %v1273_v14 = vmul.f32 %v5728_v63, %v1038_v42  ;;  %v6025_v9 = vmul.f32 %v5652_v11, %v1040_v15  ;;  %2127 = vrot.lane.b32.xlu1 %v7451_v40, %s4544_s9  ;;  %v7465_v11 = vld [vmem:[#allocation78_spill] sm:$0xff]  ;;  %v7467_v15 = vld [vmem:[#allocation27_spill] sm:$0xff] }
 0x231   : > { %v1594_v21 = vmul.f32 %v5876_v29, %v1567_v45  ;;  %v1069_v16 = vmul.f32 %v5725_v56, %v1036_v61  ;;  %v1070_v55 = vmul.f32 %v7463_v53, %v1034_v32  ;;  %v1274_v48 = vmul.f32 %v7442_v8, %v1036_v61  ;;  %2123 = vrot.lane.b32.xlu0 %v7453_v7, %s4544_s9  ;;  %v7466_v42 = vld [vmem:[#allocation26_spill] sm:$0xff] }
 0x232   : > { %v1202_v38 = vsel %vm1198_vm7, %v7464_v17, %v5843_v4  ;;  %v1178_v63 = vadd.f32 %v7465_v11, %v1067_v20  ;;  %v1101_v25 = vsel %vm1095_vm6, %v7467_v15, %v7466_v42  ;;  %v7468_v56 = vld [vmem:[#allocation86_spill] sm:$0xff]  ;;  %v1560_v31 = vpop.permute.xlu1 %1559  ;;  %v1556_v45 = vpop.permute.xlu0 %1555 }
 0x233   : > { %v1204_v8 = vsel %vm1198_vm7, %v7468_v56, %v7464_v17  ;;  %v6048_v61 = vadd.f32 %v1594_v21, %v1456_v59  ;;  %v1206_v4 = vsel %vm1198_vm7, %v5841_v50, %v7468_v56  ;;  %v1569_v20 = vsel %vm1198_vm7, %v1560_v31, %v1548_v6  ;;  %v7470_v50 = vld [vmem:[#allocation80_spill] sm:$0xff] }
 0x234   : > { %v1563_v33 = vsel %vm1198_vm7, %v1556_v45, %v1560_v31  ;;  %v1565_v53 = vsel %vm1198_vm7, %v1552_v12, %v1556_v45  ;;  %v1235_v17 = vmul.f32 %v5710_v34, %v1202_v38  ;;  %v1597_v59 = vmul.f32 %v5997_v44, %v1569_v20  ;;  %2410 = vrot.lane.b32.xlu1 %v7469_v49, %s4543_s16  ;;  %v7471_v31 = vld [vmem:[#allocation37_spill] sm:$0xff]  ;;  %v7474_v20 = vld [vmem:[#allocation35_spill] sm:$0xff] }
 0x235   : > { %v1595_v21 = vmul.f32 %v6012_v30, %v1565_v53  ;;  %v1596_v11 = vmul.f32 %v6016_v54, %v1563_v33  ;;  %v1180_v56 = vadd.f32 %v7470_v50, %v1069_v16  ;;  %v1132_v6 = vmul.f32 %v5655_v2, %v1101_v25  ;;  %v7472_v34 = vld [vmem:[#allocation41_spill] sm:$0xff] }
 0x236   : > { %v1103_v12 = vsel %vm1095_vm6, %v7471_v31, %v7467_v15  ;;  %v1097_v38 = vsel %vm1095_vm6, %v7472_v34, %v7471_v31  ;;  %v7473_v45 = vld [vmem:[#allocation45_spill] sm:$0xff]  ;;  %v1234_v33 = vmul.f32 %v7474_v20, %v1204_v8  ;;  %v6079_v53 = vadd.f32 %v1597_v59, %v1459_v52  ;;  %v1345_v25 = vpop.permute.xlu1 %1344  ;;  %v1341_v50 = vpop.permute.xlu0 %1340 }
 0x237   : > { %2406 = vrot.lane.b32.xlu0 %v7473_v45, %s4543_s16  ;;  %v6081_v16 = vadd.f32 %v1595_v21, %v1457_v28  ;;  %v6083_v2 = vadd.f32 %v1596_v11, %v1458_v3  ;;  %v1275_v15 = vmul.f32 %v5649_v35, %v1034_v32  ;;  %v1099_v31 = vsel %vm1095_vm6, %v7466_v42, %v7472_v34  ;;  %v7475_v28 = vld [vmem:[#allocation92_spill] sm:$0xff]  ;;  %v7476_v21 = vld [vmem:[#allocation82_spill] sm:$0xff]  ;;  %v7477_v35 = vld [vmem:[#allocation91_spill] sm:$0xff] }
 0x238   : > { %v1237_v60 = vmul.f32 %v5716_v41, %v1206_v4  ;;  %v1359_v8 = vsel %vm1032_vm5, %v1341_v50, %v1345_v25  ;;  %v1131_v52 = vmul.f32 %v5694_v39, %v1103_v12  ;;  %v1236_v3 = vmul.f32 %v5713_v18, %v7475_v28  ;;  %2418 = vrot.lane.b32.xlu1 %v7477_v35, %s4543_s16  ;;  %v7478_v32 = vld [vmem:[#allocation79_spill] sm:$0xff]  ;;  %v7479_v41 = vld [vmem:[#allocation28_spill] sm:$0xff] }
 0x239   : > { %v1243_v59 = vadd.f32 %v1235_v17, %v1132_v6  ;;  %v1390_v11 = vmul.f32 %v7476_v21, %v1359_v8  ;;  %v1181_v20 = vadd.f32 %v7478_v32, %v1070_v55  ;;  %v1282_v37 = vadd.f32 %v1274_v48, %v1179_v62  ;;  %v7480_v39 = vld [vmem:[#allocation76_spill] sm:$0xff] }
 0x23a   : > { %v6100_v42 = vadd.f32 %v1275_v15, %v1180_v56  ;;  %v1134_v4 = vmul.f32 %v7479_v41, %v1097_v38  ;;  %v1133_v12 = vmul.f32 %v7480_v39, %v1099_v31  ;;  %v1242_v34 = vadd.f32 %v1234_v33, %v1131_v52  ;;  %v1353_v17 = vpop.permute.xlu1 %1352  ;;  %v1349_v6 = vpop.permute.xlu0 %1348  ;;  %v2794_v56 = vld [vmem:[%s7206_s5 + $0xf8] sm:$0xff]  ;;  %v7485_v41 = vld [vmem:[#allocation90_spill] sm:$0xff] }
 0x23b   : > { %2414 = vrot.lane.b32.xlu0 %v6004_v24, %s4543_s16  ;;  %v1398_v18 = vadd.f32 %v1390_v11, %v1243_v59  ;;  %v6106_v28 = vadd.f32 %v1273_v14, %v1178_v63  ;;  %v1361_v55 = vsel %vm1032_vm5, %v1353_v17, %v1341_v50  ;;  %v1355_v62 = vsel %vm1032_vm5, %v1349_v6, %v1353_v17  ;;  %v2826_v38 = vld [vmem:[%s7206_s5 + $0x1f8] sm:$0xff]  ;;  %v7481_v63 = vld [vmem:[#allocation87_spill] sm:$0xff] }
 0x23c   : > { %v1245_v21 = vadd.f32 %v1237_v60, %v1134_v4  ;;  %v1357_v48 = vsel %vm1032_vm5, %v1345_v25, %v1349_v6  ;;  %v2778_v60 = vld [vmem:[%s7206_s5 + $0x78] sm:$0xff]  ;;  %v1244_v14 = vadd.f32 %v1236_v3, %v1133_v12  ;;  %v1389_v33 = vmul.f32 %v7481_v63, %v1361_v55  ;;  %v7482_v50 = vld [vmem:[#allocation39_spill] sm:$0xff]  ;;  %2265 = vrot.lane.b32.xlu1 %v5740_v58, %s4545_s15 }
 0x23d   : > { %v1544_v15 = vadd.f32 %v7482_v50, %v1398_v18  ;;  %v7483_v31 = vld [vmem:[#allocation88_spill] sm:$0xff]  ;;  %v1637_v11 = vmul.f32 %v7448_v43, %v1359_v8  ;;  %v7484_v3 = vld [vmem:[#allocation89_spill] sm:$0xff]  ;;  %v1638_v4 = vmul.f32 %v7485_v41, %v1357_v48  ;;  %3975 = vmatprep.subr.mxu0 %v2794_v56  ;;  %v1639_v18 = vmul.f32 %v5826_v19, %v1355_v62 }
 0x23e   : > { %v1391_v52 = vmul.f32 %v7483_v31, %v1357_v48  ;;  %v2810_v25 = vld [vmem:[%s7206_s5 + $0x178] sm:$0xff]  ;;  %v2793_v59 = vld [vmem:[%s7206_s5 + $0xf0] sm:$0xff]  ;;  %v1392_v32 = vmul.f32 %v7484_v3, %v1355_v62  ;;  %v1397_v39 = vadd.f32 %v1389_v33, %v1242_v34  ;;  %v1408_v17 = vpop.permute.xlu1 %1407  ;;  %v1404_v6 = vpop.permute.xlu0 %1403  ;;  %4013 = vmatprep.subr.mxu1 %v2826_v38  ;;  %3976 = vmatpush3.msra.mxu0 %v2778_v60  ;;  %v2792_v34 = vld [vmem:[%s7206_s5 + $0xe8] sm:$0xff] }
 0x23f   : > { %2261 = vrot.lane.b32.xlu0 %v7445_v27, %s4545_s15  ;;  %v2825_v58 = vld [vmem:[%s7206_s5 + $0x1f0] sm:$0xff]  ;;  %v6146_v48 = vadd.f32 %v1638_v4, %v1544_v15  ;;  %v1422_v27 = vsel %vm1095_vm6, %v1404_v6, %v1408_v17  ;;  %4014 = vmatpush3.msra.mxu1 %v2810_v25  ;;  %v7486_v62 = vld [vmem:[#allocation38_spill] sm:$0xff]  ;;  %v1640_v50 = vmul.f32 %v5796_v36, %v1361_v55 }
 0x240   : > { %v1399_v12 = vadd.f32 %v1391_v52, %v1244_v14  ;;  %v2777_v43 = vld [vmem:[%s7206_s5 + $0x70] sm:$0xff]  ;;  %v1400_v8 = vadd.f32 %v1392_v32, %v1245_v21  ;;  %3977 = vmatprep.subr.mxu0 %v2793_v59  ;;  %v1543_v56 = vadd.f32 %v7486_v62, %v1397_v39  ;;  %v1453_v21 = vmul.f32 %v5829_v57, %v1422_v27  ;;  %v7488_v14 = vld [vmem:[#allocation46_spill] sm:$0xff] }
 0x241   : > { %v2809_v19 = vld [vmem:[%s7206_s5 + $0x170] sm:$0xff]  ;;  %2273 = vrot.lane.b32.xlu1 %v7451_v40, %s4545_s15  ;;  %v2392_v63 = vrot.slane %v7488_v14, 4  ;;  %4015 = vmatprep.subr.mxu1 %v2825_v58  ;;  %v2824_v33 = vld [vmem:[%s7206_s5 + $0x1e8] sm:$0xff]  ;;  %v1284_v52 = vadd.f32 %v6025_v9, %v1181_v20  ;;  %v2823_v39 = vld [vmem:[%s7206_s5 + $0x1e0] sm:$0xff] }
 0x242   : > { %v7487_v38 = vld [vmem:[#allocation40_spill] sm:$0xff]  ;;  %v7489_v15 = vld [vmem:[#allocation43_spill] sm:$0xff]  ;;  %3978 = vmatpush3.msra.mxu0 %v2777_v43  ;;  %v6176_v3 = vadd.f32 %v1453_v21, %v1282_v37  ;;  %v1416_v32 = vpop.permute.xlu1 %1415  ;;  %v1412_v36 = vpop.permute.xlu0 %1411  ;;  %v7491_v55 = vld [vmem:[#allocation54_spill] sm:$0xff]  ;;  %v6179_v4 = vadd.f32 %v1637_v11, %v1543_v56  ;;  %4016 = vmatpush3.msra.mxu1 %v2809_v19 }
 0x243   : > { %v1545_v60 = vadd.f32 %v7487_v38, %v1399_v12  ;;  %v1546_v31 = vadd.f32 %v7489_v15, %v1400_v8  ;;  %2269 = vrot.lane.b32.xlu0 %v7453_v7, %s4545_s15  ;;  %v7490_v57 = vld [vmem:[#allocation47_spill] sm:$0xff]  ;;  %v2396_v41 = vrot.slane %v7491_v55, 4  ;;  %3979 = vmatprep.subr.mxu0 %v2792_v34  ;;  %v1424_v9 = vsel %vm1095_vm6, %v1416_v32, %v1404_v6  ;;  %v2791_v11 = vld [vmem:[%s7206_s5 + $0xe0] sm:$0xff]  ;;  %v2822_v14 = vld [vmem:[%s7206_s5 + $0x1d8] sm:$0xff] }
 0x244   : > { %v2390_v25 = vrot.slane %v7490_v57, 4  ;;  %v2776_v40 = vld [vmem:[%s7206_s5 + $0x68] sm:$0xff]  ;;  %v1418_v20 = vsel %vm1095_vm6, %v1412_v36, %v1416_v32  ;;  %v1420_v37 = vsel %vm1095_vm6, %v1408_v17, %v1412_v36  ;;  %4017 = vmatprep.subr.mxu1 %v2824_v33  ;;  %v1452_v12 = vmul.f32 %v5832_v22, %v1424_v9  ;;  %v2775_v17 = vld [vmem:[%s7206_s5 + $0x60] sm:$0xff]  ;;  %v2806_v57 = vld [vmem:[%s7206_s5 + $0x158] sm:$0xff] }
 0x245   : > { %v6174_v59 = vadd.f32 %v1639_v18, %v1545_v60  ;;  %v2808_v7 = vld [vmem:[%s7206_s5 + $0x168] sm:$0xff]  ;;  %v6190_v58 = vadd.f32 %v1640_v50, %v1546_v31  ;;  %v1454_v18 = vmul.f32 %v5846_v26, %v1420_v37  ;;  %v1455_v6 = vmul.f32 %v5849_v0, %v1418_v20  ;;  %2473 = vrot.lane.b32.xlu1 %v7469_v49, %s4544_s9  ;;  %v2807_v43 = vld [vmem:[%s7206_s5 + $0x160] sm:$0xff]  ;;  %v2790_v0 = vld [vmem:[%s7206_s5 + $0xd8] sm:$0xff] }
 0x246   : > { %3980 = vmatpush3.msra.mxu0 %v2776_v40  ;;  %v7492_v22 = vld [vmem:[#allocation23_spill] sm:$0xff]  ;;  %4018 = vmatpush3.msra.mxu1 %v2808_v7  ;;  %v6220_v27 = vadd.f32 %v1452_v12, %v6106_v28  ;;  %v1699_v62 = vpop.permute.xlu1 %1698  ;;  %v1695_v38 = vpop.permute.xlu0 %1694  ;;  %v7494_v60 = vld [vmem:[#allocation52_spill] sm:$0xff]  ;;  %v6258_v36 = vrot.slane %v5983_v10, %v7461_v13  ;;  %v6273_v9 = vrot.slane %v5983_v10, %v7392_v1 }
 0x247   : > { %2469 = vrot.lane.b32.xlu0 %v7473_v45, %s4544_s9  ;;  %v7493_v8 = vrot.slane %v7492_v22, 4  ;;  %v6223_v19 = vadd.f32 %v1454_v18, %v6100_v42  ;;  %v6225_v34 = vadd.f32 %v1455_v6, %v1284_v52  ;;  %v1967_v56 = vld [vmem:[#allocation8 + $0x26] ss:$8 sm:$0xf]  ;;  %v2394_v21 = vrot.slane %v7494_v60, 4  ;;  %3981 = vmatprep.subr.mxu0 %v2791_v11 }
 0x248   : > { %4019 = vmatprep.subr.mxu1 %v2823_v39  ;;  %v1714_v28 = vsel %vm1032_vm5, %v1695_v38, %v1699_v62  ;;  %v7497_v50 = vld [vmem:[#allocation24_spill] sm:$0xff]  ;;  %3982 = vmatpush3.msra.mxu0 %v2775_v17  ;;  %v6276_v20 = vrot.slane %v1967_v56, %v7393_v47  ;;  %v6280_v39 = vrot.slane %v1967_v56, %v7461_v13  ;;  %v7500_v18 = vrot.slane %v4983_v51, 4  ;;  %v2788_v22 = vld [vmem:[%s7206_s5 + $0xc8] sm:$0xff] }
 0x249   : > { %v6214_v26 = vsel %vm2377_vm4, %v7493_v8, %v2392_v63  ;;  %v7495_v63 = vld [vmem:[#allocation22_spill] sm:$0xff]  ;;  %v7498_v15 = vrot.slane %v7497_v50, 4  ;;  %4020 = vmatpush3.msra.mxu1 %v2807_v43  ;;  %v2774_v52 = vld [vmem:[%s7206_s5 + $0x58] sm:$0xff]  ;;  %v1742_v40 = vmul.f32 %v6020_v23, %v1714_v28  ;;  %2481 = vrot.lane.b32.xlu1 %v7477_v35, %s4544_s9  ;;  %v2789_v55 = vld [vmem:[%s7206_s5 + $0xd0] sm:$0xff]  ;;  %v6303_v8 = vrot.slane %v1967_v56, %v7392_v1 }
 0x24a   : > { %v7496_v33 = vrot.slane %v7495_v63, 4  ;;  %3983 = vmatprep.subr.mxu0 %v2790_v0  ;;  %4021 = vmatprep.subr.mxu1 %v2822_v14  ;;  %v1707_v11 = vpop.permute.xlu1 %1706  ;;  %v1703_v12 = vpop.permute.xlu0 %1702  ;;  %v6285_v6 = vsel %vm2377_vm4, %v7500_v18, %v2394_v21  ;;  %v2805_v51 = vld [vmem:[%s7206_s5 + $0x150] sm:$0xff]  ;;  %v2772_v14 = vld [vmem:[%s7206_s5 + $0x48] sm:$0xff] }
 0x24b   : > { %v6241_v31 = vsel %vm2377_vm4, %v7498_v15, %v2396_v41  ;;  %v2821_v41 = vld [vmem:[%s7206_s5 + $0x1d0] sm:$0xff]  ;;  %2477 = vrot.lane.b32.xlu0 %v6004_v24, %s4544_s9  ;;  %v1750_v37 = vadd.f32 %v1742_v40, %v6081_v16  ;;  %3984 = vmatpush3.msra.mxu0 %v2774_v52  ;;  %v1716_v17 = vsel %vm1032_vm5, %v1707_v11, %v1695_v38  ;;  %v7501_v38 = vld [vmem:[#allocation49_spill] sm:$0xff]  ;;  %v2804_v50 = vld [vmem:[%s7206_s5 + $0x148] sm:$0xff] }
 0x24c   : > { %v6236_v42 = vsel %vm2377_vm4, %v7496_v33, %v2390_v25  ;;  %v7499_v25 = vld [vmem:[#allocation18_spill] sm:$0xff]  ;;  %4022 = vmatpush3.msra.mxu1 %v2806_v57  ;;  %v1710_v16 = vsel %vm1032_vm5, %v1703_v12, %v1707_v11  ;;  %v1712_v43 = vsel %vm1032_vm5, %v1699_v62, %v1703_v12  ;;  %3985 = vmatprep.subr.mxu0 %v2789_v55  ;;  %v7502_v18 = vld [vmem:[#allocation48_spill] sm:$0xff] }
 0x24d   : > { %v6254_v32 = vrot.slane %v5983_v10, %v7499_v25  ;;  %v6267_v7 = vrot.slane %v1967_v56, %v7499_v25  ;;  %v2773_v10 = vld [vmem:[%s7206_s5 + $0x50] sm:$0xff]  ;;  %4023 = vmatprep.subr.mxu1 %v2821_v41  ;;  %v1896_v60 = vadd.f32 %v7501_v38, %v1750_v37  ;;  %v1743_v21 = vmul.f32 %v6258_v36, %v1712_v43  ;;  %v2820_v62 = vld [vmem:[%s7206_s5 + $0x1c8] sm:$0xff]  ;;  %v2787_v41 = vld [vmem:[%s7206_s5 + $0xc0] sm:$0xff] }
 0x24e   : > { %2412 = vrot.lane.b32.xlu1 %v6214_v26, %s4543_s16  ;;  %v1744_v63 = vmul.f32 %v6273_v9, %v1710_v16  ;;  %v1990_v33 = vmul.f32 %v6276_v20, %v1712_v43  ;;  %3986 = vmatpush3.msra.mxu0 %v2773_v10  ;;  %v1991_v57 = vmul.f32 %v6280_v39, %v1710_v16  ;;  %v1554_v40 = vpop.permute.xlu1 %1553  ;;  %v6327_v55 = vld [vmem:[#allocation8 + $0x23] ss:$8 sm:$0xf] }
 0x24f   : > { %v1741_v0 = vmul.f32 %v6254_v32, %v1716_v17  ;;  %v1989_v56 = vmul.f32 %v6267_v7, %v1714_v28  ;;  %2408 = vrot.lane.b32.xlu0 %v6236_v42, %s4543_s16  ;;  %v1751_v52 = vadd.f32 %v1743_v21, %v6083_v2  ;;  %v1550_v28 = vpop.permute.xlu0 %1549  ;;  %4024 = vmatpush3.msra.mxu1 %v2805_v51  ;;  %v2819_v2 = vld [vmem:[%s7206_s5 + $0x1c0] sm:$0xff] }
 0x250   : > { %3987 = vmatprep.subr.mxu0 %v2788_v22  ;;  %v1752_v37 = vadd.f32 %v1744_v63, %v6079_v53  ;;  %v6333_v11 = vadd.f32 %v1990_v33, %v1896_v60  ;;  %4025 = vmatprep.subr.mxu1 %v2820_v62  ;;  %v2771_v12 = vld [vmem:[%s7206_s5 + $0x40] sm:$0xff]  ;;  %v1992_v22 = vmul.f32 %v6303_v8, %v1716_v17  ;;  %v2818_v33 = vld [vmem:[%s7206_s5 + $0x1b8] sm:$0xff] }
 0x251   : > { %v1749_v15 = vadd.f32 %v1741_v0, %v6048_v61  ;;  %v1568_v61 = vsel %vm1198_vm7, %v1550_v28, %v1554_v40  ;;  %3988 = vmatpush3.msra.mxu0 %v2772_v14  ;;  %v7503_v16 = vld [vmem:[#allocation50_spill] sm:$0xff]  ;;  %4026 = vmatpush3.msra.mxu1 %v2804_v50  ;;  %v7504_v0 = vld [vmem:[#allocation51_spill] sm:$0xff]  ;;  %v6357_v60 = vrot.slane %v6327_v55, %v7393_v47 }
 0x252   : > { %v1897_v43 = vadd.f32 %v7503_v16, %v1751_v52  ;;  %v1598_v53 = vmul.f32 %v5876_v29, %v1568_v61  ;;  %2420 = vrot.lane.b32.xlu1 %v6241_v31, %s4543_s16  ;;  %v2803_v51 = vld [vmem:[%s7206_s5 + $0x140] sm:$0xff]  ;;  %v1898_v38 = vadd.f32 %v7504_v0, %v1752_v37  ;;  %3989 = vmatprep.subr.mxu0 %v2787_v41  ;;  %v2786_v29 = vld [vmem:[%s7206_s5 + $0xb8] sm:$0xff]  ;;  %v1562_v17 = vpop.permute.xlu1 %1561  ;;  %v2817_v61 = vld [vmem:[%s7206_s5 + $0x1b0] sm:$0xff] }
 0x253   : > { %v1895_v10 = vadd.f32 %v7502_v18, %v1749_v15  ;;  %2416 = vrot.lane.b32.xlu0 %v6285_v6, %s4543_s16  ;;  %v1558_v14 = vpop.permute.xlu0 %1557  ;;  %4027 = vmatprep.subr.mxu1 %v2819_v2  ;;  %v1570_v50 = vsel %vm1198_vm7, %v1562_v17, %v1550_v28  ;;  %v6431_v16 = vrot.slane %v6327_v55, %v7461_v13 }
 0x254   : > { %v6362_v21 = vadd.f32 %v1991_v57, %v1897_v43  ;;  %v6365_v62 = vadd.f32 %v1598_v53, %v6220_v27  ;;  %3990 = vmatpush3.msra.mxu0 %v2771_v12  ;;  %v1564_v15 = vsel %vm1198_vm7, %v1558_v14, %v1562_v17  ;;  %v1566_v27 = vsel %vm1198_vm7, %v1554_v40, %v1558_v14  ;;  %v2802_v57 = vld [vmem:[%s7206_s5 + $0x138] sm:$0xff]  ;;  %v2785_v40 = vld [vmem:[%s7206_s5 + $0xb0] sm:$0xff]  ;;  %v2768_v53 = vld [vmem:[%s7206_s5 + $0x28] sm:$0xff] }
 0x255   : > { %v6367_v63 = vadd.f32 %v1989_v56, %v1895_v10  ;;  %v6378_v52 = vadd.f32 %v1992_v22, %v1898_v38  ;;  %4028 = vmatpush3.msra.mxu1 %v2803_v51  ;;  %v2770_v56 = vld [vmem:[%s7206_s5 + $0x38] sm:$0xff]  ;;  %v1601_v41 = vmul.f32 %v5997_v44, %v1570_v50  ;;  %v1599_v28 = vmul.f32 %v6012_v30, %v1566_v27  ;;  %v2769_v44 = vld [vmem:[%s7206_s5 + $0x30] sm:$0xff]  ;;  %v2800_v51 = vld [vmem:[%s7206_s5 + $0x128] sm:$0xff] }
 0x256   : > { %v1600_v37 = vmul.f32 %v6016_v54, %v1564_v15  ;;  %2619 = vrot.lane.b32.xlu1 %v7469_v49, %s4545_s15  ;;  %3991 = vmatprep.subr.mxu0 %v2786_v29  ;;  %v1762_v2 = vpop.permute.xlu1 %1761  ;;  %v6435_v43 = vrot.slane %v6327_v55, %v7392_v1  ;;  %v2815_v38 = vld [vmem:[%s7206_s5 + $0x1a0] sm:$0xff]  ;;  %v2782_v27 = vld [vmem:[%s7206_s5 + $0x98] sm:$0xff] }
 0x257   : > { %2615 = vrot.lane.b32.xlu0 %v7473_v45, %s4545_s15  ;;  %4029 = vmatprep.subr.mxu1 %v2818_v33  ;;  %v6403_v30 = vadd.f32 %v1601_v41, %v6225_v34  ;;  %v6406_v49 = vadd.f32 %v1599_v28, %v6176_v3  ;;  %v1758_v12 = vpop.permute.xlu0 %1757  ;;  %v2801_v45 = vld [vmem:[%s7206_s5 + $0x130] sm:$0xff]  ;;  %v6418_v34 = vrot.slane %v6327_v55, %v7499_v25  ;;  %v2784_v3 = vld [vmem:[%s7206_s5 + $0xa8] sm:$0xff]  ;;  %v2799_v14 = vld [vmem:[%s7206_s5 + $0x120] sm:$0xff] }
 0x258   : > { %v6409_v54 = vadd.f32 %v1600_v37, %v6223_v19  ;;  %3992 = vmatpush3.msra.mxu0 %v2770_v56  ;;  %4030 = vmatpush3.msra.mxu1 %v2802_v57  ;;  %v1777_v18 = vsel %vm1095_vm6, %v1758_v12, %v1762_v2  ;;  %v2816_v19 = vld [vmem:[%s7206_s5 + $0x1a8] sm:$0xff]  ;;  %v2814_v56 = vld [vmem:[%s7206_s5 + $0x198] sm:$0xff] }
 0x259   : > { %3993 = vmatprep.subr.mxu0 %v2785_v40  ;;  %4031 = vmatprep.subr.mxu1 %v2817_v61  ;;  %v1805_v10 = vmul.f32 %v6357_v60, %v1777_v18  ;;  %v2766_v57 = vld [vmem:[%s7206_s5 + $0x18] sm:$0xff]  ;;  %v7505_v41 = vld [vmem:[#allocation30_spill] sm:$0xff] }
 0x25a   : > { %2627 = vrot.lane.b32.xlu1 %v7477_v35, %s4545_s15  ;;  %3994 = vmatpush3.msra.mxu0 %v2769_v44  ;;  %v2783_v35 = vld [vmem:[%s7206_s5 + $0xa0] sm:$0xff]  ;;  %v1770_v22 = vpop.permute.xlu1 %1769  ;;  %v7506_v37 = vld [vmem:[#allocation36_spill] sm:$0xff] }
 0x25b   : > { %2623 = vrot.lane.b32.xlu0 %v6004_v24, %s4545_s15  ;;  %4032 = vmatpush3.msra.mxu1 %v2801_v45  ;;  %v6449_v55 = vadd.f32 %v1805_v10, %v5946_v46  ;;  %v1766_v0 = vpop.permute.xlu0 %1765  ;;  %v1779_v29 = vsel %vm1095_vm6, %v1770_v22, %v1758_v12  ;;  %v2767_v46 = vld [vmem:[%s7206_s5 + $0x20] sm:$0xff]  ;;  %v2798_v45 = vld [vmem:[%s7206_s5 + $0x118] sm:$0xff]  ;;  %v2813_v10 = vld [vmem:[%s7206_s5 + $0x190] sm:$0xff] }
 0x25c   : > { %3995 = vmatprep.subr.mxu0 %v2784_v3  ;;  %4033 = vmatprep.subr.mxu1 %v2816_v19  ;;  %v1773_v24 = vsel %vm1095_vm6, %v1766_v0, %v1770_v22  ;;  %v1775_v17 = vsel %vm1095_vm6, %v1762_v2, %v1766_v0  ;;  %v1804_v33 = vmul.f32 %v6418_v34, %v1779_v29  ;;  %v7507_v61 = vld [vmem:[#allocation25_spill] sm:$0xff]  ;;  %v2781_v19 = vld [vmem:[%s7206_s5 + $0x90] sm:$0xff] }
 0x25d   : > { %3996 = vmatpush3.msra.mxu0 %v2768_v53  ;;  %4034 = vmatpush3.msra.mxu1 %v2800_v51  ;;  %v1806_v50 = vmul.f32 %v6431_v16, %v1775_v17  ;;  %v1807_v15 = vmul.f32 %v6435_v43, %v1773_v24  ;;  %v1928_v3 = vld [vmem:[#allocation8 + $0x25] ss:$8 sm:$0xf] }
 0x25e   : > { %2475 = vrot.lane.b32.xlu1 %v6214_v26, %s4544_s9  ;;  %3997 = vmatprep.subr.mxu0 %v2783_v35  ;;  %v6483_v28 = vadd.f32 %v1804_v33, %v7505_v41  ;;  %v1701_v2 = vpop.permute.xlu1 %1700  ;;  %v2765_v51 = vld [vmem:[%s7206_s5 + $0x10] sm:$0xff]  ;;  %v6518_v29 = vrot.slane %v1928_v3, %v7392_v1  ;;  %v2780_v24 = vld [vmem:[%s7206_s5 + $0x88] sm:$0xff] }
 0x25f   : > { %2471 = vrot.lane.b32.xlu0 %v6236_v42, %s4544_s9  ;;  %4035 = vmatprep.subr.mxu1 %v2815_v38  ;;  %v6486_v40 = vadd.f32 %v1806_v50, %v7506_v37  ;;  %v6489_v44 = vadd.f32 %v1807_v15, %v7507_v61  ;;  %v1697_v12 = vpop.permute.xlu0 %1696  ;;  %v2797_v35 = vld [vmem:[%s7206_s5 + $0x110] sm:$0xff]  ;;  %v6515_v38 = vrot.slane %v1928_v3, %v7499_v25  ;;  %v2764_v33 = vld [vmem:[%s7206_s5 + $0x8] sm:$0xff]  ;;  %v2779_v37 = vld [vmem:[%s7206_s5 + $0x80] sm:$0xff] }
 0x260   : > { %3998 = vmatpush3.msra.mxu0 %v2767_v46  ;;  %4036 = vmatpush3.msra.mxu1 %v2799_v14  ;;  %v1715_v18 = vsel %vm1032_vm5, %v1697_v12, %v1701_v2  ;;  %v2812_v14 = vld [vmem:[%s7206_s5 + $0x188] sm:$0xff] }
 0x261   : > { %3999 = vmatprep.subr.mxu0 %v2782_v27  ;;  %4037 = vmatprep.subr.mxu1 %v2814_v56  ;;  %v1746_v53 = vmul.f32 %v6020_v23, %v1715_v18  ;;  %v7508_v15 = vld [vmem:[#allocation55_spill] sm:$0xff] }
 0x262   : > { %2483 = vrot.lane.b32.xlu1 %v6241_v31, %s4544_s9  ;;  %4000 = vmatpush3.msra.mxu0 %v2766_v57  ;;  %v1709_v0 = vpop.permute.xlu1 %1708  ;;  %v6541_v57 = vrot.slane %v1928_v3, %v7393_v47  ;;  %v2796_v41 = vld [vmem:[%s7206_s5 + $0x108] sm:$0xff] }
 0x263   : > { %2479 = vrot.lane.b32.xlu0 %v6285_v6, %s4544_s9  ;;  %4038 = vmatpush3.msra.mxu1 %v2798_v45  ;;  %v1754_v22 = vadd.f32 %v1746_v53, %v6406_v49  ;;  %v1705_v23 = vpop.permute.xlu0 %1704  ;;  %v1717_v17 = vsel %vm1032_vm5, %v1709_v0, %v1697_v12  ;;  %s4458_s9 = scalar_lea.vmem %s7151_s12, 512 }
 0x264   : > { %4001 = vmatprep.subr.mxu0 %v2781_v19  ;;  %4039 = vmatprep.subr.mxu1 %v2813_v10  ;;  %v1711_v49 = vsel %vm1032_vm5, %v1705_v23, %v1709_v0  ;;  %v1713_v46 = vsel %vm1032_vm5, %v1701_v2, %v1705_v23  ;;  %v1745_v50 = vmul.f32 %v6254_v32, %v1717_v17  ;;  %p4459_p8 = scmp.ne.s32.totalorder %s7151_s12, %s4458_s9 }
 0x265   : > { %4002 = vmatpush3.msra.mxu0 %v2765_v51  ;;  %4040 = vmatpush3.msra.mxu1 %v2797_v35  ;;  %v1900_v27 = vadd.f32 %v7508_v15, %v1754_v22  ;;  %v1747_v56 = vmul.f32 %v6258_v36, %v1713_v46  ;;  %v1748_v32 = vmul.f32 %v6273_v9, %v1711_v49  ;;  %v2811_v36 = vld [vmem:[%s7206_s5 + $0x180] sm:$0xff] }
 0x266   : > { %2621 = vrot.lane.b32.xlu1 %v6214_v26, %s4545_s15  ;;  %v1994_v61 = vmul.f32 %v6276_v20, %v1713_v46  ;;  %v6554_v26 = vrot.slane %v1928_v3, %v7461_v13  ;;  %4003 = vmatprep.subr.mxu0 %v2780_v24  ;;  %v1993_v2 = vmul.f32 %v6267_v7, %v1715_v18  ;;  %v1908_v9 = vpop.permute.xlu1 %1907  ;;  %v2795_v7 = vld [vmem:[%s7206_s5 + $0x100] sm:$0xff]  ;;  %v7510_v18 = vld [vmem:[#allocation56_spill] sm:$0xff]  ;;  %p4460_p7 = pnand %p4459_p8, %p7542_p12 }
 0x267   : > { %2617 = vrot.lane.b32.xlu0 %v6236_v42, %s4545_s15  ;;  %v1753_v12 = vadd.f32 %v1745_v50, %v6365_v62  ;;  %v1755_v45 = vadd.f32 %v1747_v56, %v6409_v54  ;;  %4041 = vmatprep.subr.mxu1 %v2812_v14  ;;  %v2763_v42 = vld [vmem:[%s7206_s5] sm:$0xff]  ;;  %v1756_v20 = vadd.f32 %v1748_v32, %v6403_v30  ;;  %v1904_v10 = vpop.permute.xlu0 %1903 }
 0x268   : > { %4004 = vmatpush3.msra.mxu0 %v2764_v33  ;;  %v1995_v3 = vmul.f32 %v6280_v39, %v1711_v49  ;;  %v6567_v19 = vadd.f32 %v1994_v61, %v1900_v27  ;;  %4042 = vmatpush3.msra.mxu1 %v2796_v41  ;;  %v7509_v62 = vld [vmem:[#allocation53_spill] sm:$0xff]  ;;  %v1923_v51 = vsel %vm1198_vm7, %v1904_v10, %v1908_v9  ;;  %p4461_p10 = pneg %p4460_p7 }
 0x269   : > { %4005 = vmatprep.subr.mxu0 %v2779_v37  ;;  %v1899_v54 = vadd.f32 %v7509_v62, %v1753_v12  ;;  %v1901_v53 = vadd.f32 %v7510_v18, %v1755_v45  ;;  %4043 = vmatprep.subr.mxu1 %v2811_v36  ;;  %v1996_v39 = vmul.f32 %v6303_v8, %v1717_v17  ;;  %v7511_v30 = vld [vmem:[#allocation57_spill] sm:$0xff] }
 0x26a   : > { %2629 = vrot.lane.b32.xlu1 %v6241_v31, %s4545_s15  ;;  %v1902_v35 = vadd.f32 %v7511_v30, %v1756_v20  ;;  %v1950_v22 = vmul.f32 %v6515_v38, %v1923_v51  ;;  %4006 = vmatpush3.msra.mxu0 %v2763_v42  ;;  %v1916_v23 = vpop.permute.xlu1 %1915  ;;  %v2075_v36 = vld [vmem:[#allocation8 + $0x27] ss:$8 sm:$0xf] }
 0x26b   : > { %2625 = vrot.lane.b32.xlu0 %v6285_v6, %s4545_s15  ;;  %v6583_v0 = vadd.f32 %v1995_v3, %v1901_v53  ;;  %v6585_v24 = vadd.f32 %v1993_v2, %v1899_v54  ;;  %4044 = vmatpush3.msra.mxu1 %v2795_v7  ;;  %v1925_v31 = vsel %vm1198_vm7, %v1916_v23, %v1904_v10  ;;  %v1912_v8 = vpop.permute.xlu0 %1911  ;;  %v2323_v10 = vld [vmem:[#allocation8 + $0x43] ss:$8 sm:$0xf]  ;;  %s4464_s15 = scalar_lea.vmem %s4463_s3, 1024 }
 0x26c   : > { %v1958_v49 = vadd.f32 %v1950_v22, %v6483_v28  ;;  %v6590_v17 = vadd.f32 %v1996_v39, %v1902_v35  ;;  %v1953_v46 = vmul.f32 %v6518_v29, %v1925_v31  ;;  %v1919_v6 = vsel %vm1198_vm7, %v1912_v8, %v1916_v23  ;;  %p4466_p0 = scmp.lt.s32.totalorder %s4464_s15, %s4458_s9 }
 0x26d   : > { %v1921_v14 = vsel %vm1198_vm7, %v1908_v9, %v1912_v8  ;;  %v1952_v50 = vmul.f32 %v6554_v26, %v1919_v6  ;;  %v6618_v42 = vrot.slane %v2075_v36, %v7393_v47  ;;  %v6639_v54 = vrot.slane %v2075_v36, %v7392_v1  ;;  %v7512_v6 = vld [vmem:[#allocation60_spill] sm:$0xff] }
 0x26e   : > { %v1951_v33 = vmul.f32 %v6541_v57, %v1921_v14  ;;  %v1961_v28 = vadd.f32 %v1953_v46, %v6489_v44  ;;  %v1764_v15 = vpop.permute.xlu1 %1763  ;;  %v6645_v18 = vrot.slane %v2323_v10, %v7499_v25  ;;  %v6648_v39 = vrot.slane %v2323_v10, %v7392_v1  ;;  %p4467_p1 = por %p4466_p0, %p4465_p13 }
 0x26f   : > { %v1960_v56 = vadd.f32 %v1952_v50, %v6486_v40  ;;  %v1760_v41 = vpop.permute.xlu0 %1759  ;;  %v6653_v35 = vrot.slane %v2323_v10, %v7461_v13 }
 0x270   : > { %v1959_v27 = vadd.f32 %v1951_v33, %v6449_v55  ;;  %v1778_v37 = vsel %vm1095_vm6, %v1760_v41, %v1764_v15  ;;  %p4468_p3 = pnand %p4467_p1, %p4461_p10 }
 0x271   : > { %v1809_v32 = vmul.f32 %v6357_v60, %v1778_v37 }
 0x272   : > { %v1772_v61 = vpop.permute.xlu1 %1771 }
 0x273   : > { %v6606_v2 = vadd.f32 %v1809_v32, %v6146_v48  ;;  %v1780_v12 = vsel %vm1095_vm6, %v1772_v61, %v1760_v41  ;;  %v1768_v44 = vpop.permute.xlu0 %1767 }
 0x274   : > { %v1808_v45 = vmul.f32 %v6418_v34, %v1780_v12  ;;  %v1774_v55 = vsel %vm1095_vm6, %v1768_v44, %v1772_v61  ;;  %v1776_v40 = vsel %vm1095_vm6, %v1764_v15, %v1768_v44 }
 0x275   : > { %v1810_v9 = vmul.f32 %v6431_v16, %v1776_v40  ;;  %v1811_v60 = vmul.f32 %v6435_v43, %v1774_v55  ;;  %v6632_v43 = vrot.slane %v2075_v36, %v7499_v25  ;;  %v7513_v40 = vld [vmem:[#allocation58_spill] sm:$0xff] }
 0x276   : > { %v6621_v48 = vadd.f32 %v1808_v45, %v6179_v4  ;;  %v2055_v20 = vpop.permute.xlu1 %2054  ;;  %v6636_v4 = vrot.slane %v2075_v36, %v7461_v13 }
 0x277   : > { %v6624_v3 = vadd.f32 %v1810_v9, %v6174_v59  ;;  %v6627_v34 = vadd.f32 %v1811_v60, %v6190_v58  ;;  %v2051_v7 = vpop.permute.xlu0 %2050  ;;  %v6642_v59 = vrot.slane %v2323_v10, %v7393_v47  ;;  %v2138_v58 = vld [vmem:[#allocation8 + $0x40] ss:$8 sm:$0xf] }
 0x278   : > { %v2070_v16 = vsel %vm1032_vm5, %v2051_v7, %v2055_v20  ;;  %v6661_v46 = vrot.slane %v2138_v58, %v7393_v47  ;;  %v6668_v37 = vrot.slane %v2138_v58, %v7499_v25  ;;  %v6671_v32 = vrot.slane %v2138_v58, %v7461_v13 }
 0x279   : > { %v2098_v62 = vmul.f32 %v6618_v42, %v2070_v16  ;;  %v6676_v45 = vrot.slane %v2138_v58, %v7392_v1  ;;  %v2345_v55 = vmul.f32 %v6645_v18, %v2070_v16 }
 0x27a   : > { %v2063_v53 = vpop.permute.xlu1 %2062 }
 0x27b   : > { %v2106_v51 = vadd.f32 %v2098_v62, %v1959_v27  ;;  %v2072_v30 = vsel %vm1032_vm5, %v2063_v53, %v2051_v7  ;;  %v2059_v22 = vpop.permute.xlu0 %2058  ;;  %v7515_v7 = vld [vmem:[#allocation63_spill] sm:$0xff] }
 0x27c   : > { %v2097_v23 = vmul.f32 %v6632_v43, %v2072_v30  ;;  %v2066_v31 = vsel %vm1032_vm5, %v2059_v22, %v2063_v53  ;;  %v2068_v8 = vsel %vm1032_vm5, %v2055_v20, %v2059_v22  ;;  %v7514_v20 = vld [vmem:[#allocation61_spill] sm:$0xff] }
 0x27d   : > { %v2252_v14 = vadd.f32 %v7512_v6, %v2106_v51  ;;  %v2099_v33 = vmul.f32 %v6636_v4, %v2068_v8  ;;  %v2100_v50 = vmul.f32 %v6639_v54, %v2066_v31  ;;  %v2346_v15 = vmul.f32 %v6642_v59, %v2068_v8 }
 0x27e   : > { %v2105_v27 = vadd.f32 %v2097_v23, %v1958_v49  ;;  %v2118_v41 = vpop.permute.xlu1 %2117  ;;  %v2348_v49 = vmul.f32 %v6648_v39, %v2072_v30 }
 0x27f   : > { %v2107_v61 = vadd.f32 %v2099_v33, %v1960_v56  ;;  %v2108_v36 = vadd.f32 %v2100_v50, %v1961_v28  ;;  %v6673_v12 = vadd.f32 %v2346_v15, %v2252_v14  ;;  %v2114_v44 = vpop.permute.xlu0 %2113  ;;  %v2347_v28 = vmul.f32 %v6653_v35, %v2066_v31 }
 0x280   : > { %v2251_v9 = vadd.f32 %v7513_v40, %v2105_v27  ;;  %v2133_v60 = vsel %vm1095_vm6, %v2114_v44, %v2118_v41 }
 0x281   : > { %v2253_v10 = vadd.f32 %v7514_v20, %v2107_v61  ;;  %v2254_v56 = vadd.f32 %v7515_v7, %v2108_v36  ;;  %v2161_v62 = vmul.f32 %v6661_v46, %v2133_v60 }
 0x282   : > { %v2126_v53 = vpop.permute.xlu1 %2125  ;;  %v6687_v58 = vadd.f32 %v2345_v55, %v2251_v9 }
 0x283   : > { %v6689_v51 = vadd.f32 %v2347_v28, %v2253_v10  ;;  %v6692_v16 = vadd.f32 %v2161_v62, %v6333_v11  ;;  %v2135_v30 = vsel %vm1095_vm6, %v2126_v53, %v2114_v44  ;;  %v2122_v22 = vpop.permute.xlu0 %2121  ;;  %v6696_v23 = vadd.f32 %v2348_v49, %v2254_v56 }
 0x284   : > { %v2160_v8 = vmul.f32 %v6668_v37, %v2135_v30  ;;  %v2129_v31 = vsel %vm1095_vm6, %v2122_v22, %v2126_v53  ;;  %v2131_v6 = vsel %vm1095_vm6, %v2118_v41, %v2122_v22 }
 0x285   : > { %v2162_v14 = vmul.f32 %v6671_v32, %v2131_v6  ;;  %v2163_v33 = vmul.f32 %v6676_v45, %v2129_v31  ;;  %v7516_v31 = vld [vmem:[#allocation62_spill] sm:$0xff] }
 0x286   : > { %v6706_v11 = vadd.f32 %v2160_v8, %v6367_v63  ;;  %v1910_v50 = vpop.permute.xlu1 %1909 }
 0x287   : > { %v6709_v15 = vadd.f32 %v2162_v14, %v6362_v21  ;;  %v6712_v27 = vadd.f32 %v2163_v33, %v6378_v52  ;;  %v1906_v61 = vpop.permute.xlu0 %1905 }
 0x288   : > { %v1924_v36 = vsel %vm1198_vm7, %v1906_v61, %v1910_v50 }
 0x289   : > { %v1954_v41 = vmul.f32 %v6515_v38, %v1924_v36 }
 0x28a   : > { %v1918_v44 = vpop.permute.xlu1 %1917 }
 0x28b   : > { %v1962_v55 = vadd.f32 %v1954_v41, %v6621_v48  ;;  %v1926_v63 = vsel %vm1198_vm7, %v1918_v44, %v1906_v61  ;;  %v1914_v40 = vpop.permute.xlu0 %1913  ;;  %v2284_v41 = vld [vmem:[#allocation8 + $0x42] ss:$8 sm:$0xf] }
 0x28c   : > { %v1957_v9 = vmul.f32 %v6518_v29, %v1926_v63  ;;  %v1920_v21 = vsel %vm1198_vm7, %v1914_v40, %v1918_v44  ;;  %v1922_v52 = vsel %vm1198_vm7, %v1910_v50, %v1914_v40  ;;  %v7518_v44 = vld [vmem:[#allocation59_spill] sm:$0xff]  ;;  %v6761_v40 = vrot.slane %v2284_v41, %v7393_v47 }
 0x28d   : > { %v1955_v49 = vmul.f32 %v6541_v57, %v1922_v52  ;;  %v1956_v60 = vmul.f32 %v6554_v26, %v1920_v21  ;;  %v7522_v52 = vld [vmem:[#allocation65_spill] sm:$0xff] }
 0x28e   : > { %v1965_v38 = vadd.f32 %v1957_v9, %v6627_v34  ;;  %v2264_v20 = vpop.permute.xlu1 %2263  ;;  %v7520_v9 = vld [vmem:[#allocation64_spill] sm:$0xff] }
 0x28f   : > { %v1963_v48 = vadd.f32 %v1955_v49, %v6606_v2  ;;  %v1964_v10 = vadd.f32 %v1956_v60, %v6624_v3  ;;  %v2260_v7 = vpop.permute.xlu0 %2259  ;;  %v2431_v49 = vld [vmem:[#allocation8 + $0x44] ss:$8 sm:$0xf]  ;;  %v6772_v60 = vrot.slane %v2284_v41, %v7499_v25 }
 0x292   : > { %v2272_v56 = vpop.permute.xlu1 %2271 }
 0x293   : > { %v2268_v29 = vpop.permute.xlu0 %2267 }
 0x296   : > { %v2057_v28 = vpop.permute.xlu1 %2056 }
 0x297   : > { %v2053_v62 = vpop.permute.xlu0 %2052 }
 0x298   : > { %v6732_v53 = vsel %vm1032_vm5, %v2053_v62, %v2057_v28 }
 0x299   : > { %v2102_v57 = vmul.f32 %v6618_v42, %v6732_v53 }
 0x29a   : > { %v2065_v26 = vpop.permute.xlu1 %2064 }
 0x29b   : > { %v2110_v30 = vadd.f32 %v2102_v57, %v1963_v48  ;;  %v6738_v34 = vsel %vm1032_vm5, %v2065_v26, %v2053_v62  ;;  %v2061_v2 = vpop.permute.xlu0 %2060  ;;  %v2279_v48 = vsel %vm1198_vm7, %v2260_v7, %v2264_v20  ;;  %v6782_v62 = vrot.slane %v2284_v41, %v7461_v13 }
 0x29c   : > { %v2101_v3 = vmul.f32 %v6632_v43, %v6738_v34  ;;  %v6744_v22 = vsel %vm1032_vm5, %v2061_v2, %v2065_v26  ;;  %v6748_v8 = vsel %vm1032_vm5, %v2057_v28, %v2061_v2  ;;  %v2281_v28 = vsel %vm1198_vm7, %v2272_v56, %v2260_v7 }
 0x29d   : > { %v6751_v42 = vadd.f32 %v7516_v31, %v2110_v30  ;;  %v2103_v6 = vmul.f32 %v6636_v4, %v6748_v8  ;;  %v2104_v14 = vmul.f32 %v6639_v54, %v6744_v22  ;;  %v2277_v54 = vsel %vm1198_vm7, %v2264_v20, %v2268_v29 }
 0x29e   : > { %v2109_v33 = vadd.f32 %v2101_v3, %v1962_v55  ;;  %v2120_v50 = vpop.permute.xlu1 %2119  ;;  %v2307_v57 = vmul.f32 %v6761_v40, %v2277_v54  ;;  %v6786_v26 = vrot.slane %v2431_v49, %v7393_v47  ;;  %v2275_v30 = vsel %vm1198_vm7, %v2268_v29, %v2272_v56 }
 0x29f   : > { %7517 = vst [vmem:[#allocation42_spill] sm:$0xff] %v6751_v42  ;;  %v2111_v43 = vadd.f32 %v2103_v6, %v1964_v10  ;;  %v2112_v61 = vadd.f32 %v2104_v14, %v1965_v38  ;;  %v2116_v36 = vpop.permute.xlu0 %2115  ;;  %v6777_v10 = vrot.slane %v2284_v41, %v7392_v1  ;;  %v2306_v20 = vmul.f32 %v6772_v60, %v2279_v48 }
 0x2a0   : > { %v6758_v63 = vadd.f32 %v7518_v44, %v2109_v33  ;;  %v6797_v6 = vrot.slane %v2431_v49, %v7499_v25  ;;  %v6800_v14 = vrot.slane %v2431_v49, %v7461_v13  ;;  %v2308_v33 = vmul.f32 %v6782_v62, %v2275_v30 }
 0x2a1   : > { %v6764_v21 = vadd.f32 %v7520_v9, %v2111_v43  ;;  %v6767_v4 = vadd.f32 %v7522_v52, %v2112_v61  ;;  %v2309_v31 = vmul.f32 %v6777_v10, %v2281_v28  ;;  %v2315_v56 = vadd.f32 %v2307_v57, %v6692_v16  ;;  %v7524_v28 = vld [vmem:[#allocation68_spill] sm:$0xff] }
 0x2a2   : > { %7519 = vst [vmem:[#allocation33_spill] sm:$0xff] %v6758_v63  ;;  %v2128_v55 = vpop.permute.xlu1 %2127  ;;  %v6807_v43 = vrot.slane %v2431_v49, %v7392_v1  ;;  %v2314_v41 = vadd.f32 %v2306_v20, %v6706_v11  ;;  %v2316_v11 = vadd.f32 %v2308_v33, %v6709_v15  ;;  %v7527_v15 = vld [vmem:[#allocation72_spill] sm:$0xff]  ;;  %v2134_v42 = vsel %vm1095_vm6, %v2116_v36, %v2120_v50 }
 0x2a3   : > { %7521 = vst [vmem:[#allocation34_spill] sm:$0xff] %v6764_v21  ;;  %7523 = vst [vmem:[#allocation83_spill] sm:$0xff] %v6767_v4  ;;  %v2124_v38 = vpop.permute.xlu0 %2123  ;;  %v2317_v54 = vadd.f32 %v2309_v31, %v6712_v27 }
 0x2a6   : > { %v2411_v2 = vpop.permute.xlu1 %2410 }
 0x2a9   : > { %v2407_v3 = vpop.permute.xlu0 %2406 }
 0x2aa   : > { %v6794_v7 = vsel %vm1032_vm5, %v2407_v3, %v2411_v2  ;;  %v2419_v61 = vpop.permute.xlu1 %2418 }
 0x2ab   : > { %v2454_v29 = vmul.f32 %v6786_v26, %v6794_v7  ;;  %v6812_v9 = vsel %vm1032_vm5, %v2419_v61, %v2407_v3 }
 0x2ac   : > { %v2453_v16 = vmul.f32 %v6797_v6, %v6812_v9 }
 0x2ad   : > { %v2462_v44 = vadd.f32 %v2454_v29, %v2315_v56  ;;  %v2415_v52 = vpop.permute.xlu0 %2414 }
 0x2ae   : > { %v6819_v48 = vsel %vm1032_vm5, %v2415_v52, %v2419_v61  ;;  %v6823_v49 = vsel %vm1032_vm5, %v2411_v2, %v2415_v52  ;;  %v2461_v20 = vadd.f32 %v2453_v16, %v2314_v41  ;;  %v2266_v3 = vpop.permute.xlu1 %2265  ;;  %v7525_v61 = vld [vmem:[#allocation66_spill] sm:$0xff]  ;;  %v7526_v2 = vld [vmem:[#allocation69_spill] sm:$0xff]  ;;  %v2130_v16 = vsel %vm1095_vm6, %v2124_v38, %v2128_v55 }
 0x2af   : > { %v6827_v57 = vadd.f32 %v7524_v28, %v2462_v44  ;;  %v2455_v30 = vmul.f32 %v6800_v14, %v6823_v49  ;;  %v2456_v27 = vmul.f32 %v6807_v43, %v6819_v48 }
 0x2b0   : > { %v6834_v4 = vadd.f32 %v7525_v61, %v2461_v20 }
 0x2b1   : > { %v2463_v31 = vadd.f32 %v2455_v30, %v2316_v11  ;;  %v2464_v56 = vadd.f32 %v2456_v27, %v2317_v54  ;;  %v2262_v29 = vpop.permute.xlu0 %2261  ;;  %v2136_v54 = vsel %vm1095_vm6, %v2128_v55, %v2116_v36  ;;  %v2132_v11 = vsel %vm1095_vm6, %v2120_v50, %v2124_v38  ;;  %v2679_v30 = vld [vmem:[#allocation8 + $0x60] ss:$8 sm:$0xf] }
 0x2b2   : > { %v2165_v27 = vmul.f32 %v6661_v46, %v2134_v42  ;;  %v2280_v61 = vsel %vm1198_vm7, %v2262_v29, %v2266_v3  ;;  %v2166_v38 = vmul.f32 %v6671_v32, %v2132_v11  ;;  %v2167_v46 = vmul.f32 %v6676_v45, %v2130_v16  ;;  %v2640_v16 = vld [vmem:[#allocation8 + $0x47] ss:$8 sm:$0xf] }
 0x2b3   : > { %v6837_v52 = vadd.f32 %v7526_v2, %v2463_v31  ;;  %v6840_v33 = vadd.f32 %v7527_v15, %v2464_v56  ;;  %v2274_v44 = vpop.permute.xlu1 %2273  ;;  %v2164_v56 = vmul.f32 %v6668_v37, %v2136_v54  ;;  %v2494_v2 = vld [vmem:[#allocation8 + $0x45] ss:$8 sm:$0xf]  ;;  %v6863_v42 = vrot.slane %v2679_v30, %v7499_v25 }
 0x2b4   : > { %v2282_v36 = vsel %vm1198_vm7, %v2274_v44, %v2262_v29  ;;  %v6866_v37 = vrot.slane %v2679_v30, %v7392_v1  ;;  %v6872_v29 = vrot.slane %v2679_v30, %v7461_v13  ;;  %v2173_v11 = vadd.f32 %v2165_v27, %v6567_v19 }
 0x2b5   : > { %v2270_v28 = vpop.permute.xlu0 %2269  ;;  %v2313_v32 = vmul.f32 %v6777_v10, %v2282_v36  ;;  %v2172_v63 = vadd.f32 %v2164_v56, %v6585_v24  ;;  %v2174_v10 = vadd.f32 %v2166_v38, %v6583_v0  ;;  %v6898_v24 = vrot.slane %v2494_v2, %v7392_v1 }
 0x2b6   : > { %v2278_v20 = vsel %vm1198_vm7, %v2266_v3, %v2270_v28  ;;  %v2276_v55 = vsel %vm1198_vm7, %v2270_v28, %v2274_v44  ;;  %v6869_v3 = vrot.slane %v2679_v30, %v7393_v47  ;;  %v2310_v44 = vmul.f32 %v6772_v60, %v2280_v61 }
 0x2b7   : > { %v2474_v21 = vpop.permute.xlu1 %2473  ;;  %v2311_v15 = vmul.f32 %v6761_v40, %v2278_v20  ;;  %v2312_v45 = vmul.f32 %v6782_v62, %v2276_v55  ;;  %v6879_v28 = vrot.slane %v2494_v2, %v7393_v47  ;;  %v6884_v30 = vrot.slane %v2494_v2, %v7499_v25 }
 0x2b8   : > { %v6887_v40 = vrot.slane %v2494_v2, %v7461_v13  ;;  %v2175_v62 = vadd.f32 %v2167_v46, %v6590_v17  ;;  %v6903_v56 = vrot.slane %v2640_v16, %v7499_v25  ;;  %v2318_v0 = vadd.f32 %v2310_v44, %v2172_v63 }
 0x2b9   : > { %v2470_v41 = vpop.permute.xlu0 %2469  ;;  %v2319_v19 = vadd.f32 %v2311_v15, %v2173_v11  ;;  %v2320_v17 = vadd.f32 %v2312_v45, %v2174_v10  ;;  %v6906_v38 = vrot.slane %v2640_v16, %v7392_v1 }
 0x2ba   : > { %v2321_v36 = vadd.f32 %v2313_v32, %v2175_v62  ;;  %v2489_v46 = vsel %vm1095_vm6, %v2470_v41, %v2474_v21  ;;  %v2725_v62 = vld [vmem:[%s7205_s4] sm:$0xf] }
 0x2bb   : > { %v2482_v31 = vpop.permute.xlu1 %2481 }
 0x2bc   : > { %v2491_v20 = vsel %vm1095_vm6, %v2482_v31, %v2470_v41 }
 0x2bd   : > { %v2478_v50 = vpop.permute.xlu0 %2477  ;;  %v2516_v15 = vmul.f32 %v6884_v30, %v2491_v20 }
 0x2be   : > { %v2485_v63 = vsel %vm1095_vm6, %v2478_v50, %v2482_v31  ;;  %v2487_v45 = vsel %vm1095_vm6, %v2474_v21, %v2478_v50  ;;  %v6943_v21 = vrot.slane %v2640_v16, %v7461_v13  ;;  %v6946_v50 = vrot.slane %v2725_v62, %v7393_v47 }
 0x2c0   : > { %v2413_v54 = vpop.permute.xlu1 %2412 }
 0x2c1   : > { %v2409_v60 = vpop.permute.xlu0 %2408 }
 0x2c2   : > { %v6895_v61 = vsel %vm1032_vm5, %v2409_v60, %v2413_v54 }
 0x2c3   : > { %v2458_v27 = vmul.f32 %v6786_v26, %v6895_v61 }
 0x2c4   : > { %v2421_v55 = vpop.permute.xlu1 %2420 }
 0x2c5   : > { %v2466_v2 = vadd.f32 %v2458_v27, %v2319_v19  ;;  %v6913_v11 = vsel %vm1032_vm5, %v2421_v55, %v2409_v60  ;;  %v2417_v26 = vpop.permute.xlu0 %2416  ;;  %v7529_v60 = vld [vmem:[#allocation70_spill] sm:$0xff] }
 0x2c6   : > { %v2457_v44 = vmul.f32 %v6797_v6, %v6913_v11  ;;  %v6921_v32 = vsel %vm1032_vm5, %v2417_v26, %v2421_v55  ;;  %v6925_v41 = vsel %vm1032_vm5, %v2413_v54, %v2417_v26  ;;  %v6940_v54 = vrot.slane %v2640_v16, %v7393_v47 }
 0x2c7   : > { %7528 = vst [vmem:[#allocation29_spill] sm:$0xff] %v6921_v32  ;;  %v6930_v10 = vadd.f32 %v7529_v60, %v2466_v2  ;;  %v2459_v31 = vmul.f32 %v6800_v14, %v6925_v41  ;;  %v2460_v6 = vmul.f32 %v6807_v43, %v6921_v32  ;;  %v2701_v14 = vmul.f32 %v6863_v42, %v6794_v7  ;;  %v7533_v7 = vld [vmem:[#allocation73_spill] sm:$0xff] }
 0x2c8   : > { %v2465_v20 = vadd.f32 %v2457_v44, %v2318_v0  ;;  %v2620_v19 = vpop.permute.xlu1 %2619  ;;  %v2517_v43 = vmul.f32 %v6879_v28, %v2489_v46  ;;  %v2518_v0 = vmul.f32 %v6887_v40, %v2487_v45  ;;  %v2519_v26 = vmul.f32 %v6898_v24, %v2485_v63  ;;  %v7531_v44 = vld [vmem:[#allocation67_spill] sm:$0xff] }
 0x2c9   : > { %7530 = vst [vmem:[#allocation31_spill] sm:$0xff] %v6930_v10  ;;  %v2467_v27 = vadd.f32 %v2459_v31, %v2320_v17  ;;  %v2468_v55 = vadd.f32 %v2460_v6, %v2321_v36  ;;  %v2616_v2 = vpop.permute.xlu0 %2615  ;;  %v2524_v47 = vadd.f32 %v2516_v15, %v6687_v58  ;;  %v7532_v10 = vld [vmem:[#allocation71_spill] sm:$0xff]  ;;  %v2704_v17 = vmul.f32 %v6866_v37, %v6812_v9 }
 0x2ca   : > { %v6954_v60 = vadd.f32 %v7531_v44, %v2465_v20  ;;  %v2635_v16 = vsel %vm1198_vm7, %v2616_v2, %v2620_v19  ;;  %v2702_v63 = vmul.f32 %v6869_v3, %v6823_v49  ;;  %v2703_v45 = vmul.f32 %v6872_v29, %v6819_v48 }
 0x2cb   : > { %v6960_v32 = vadd.f32 %v7532_v10, %v2467_v27  ;;  %v6963_v46 = vadd.f32 %v7533_v7, %v2468_v55  ;;  %v2662_v36 = vmul.f32 %v6903_v56, %v2635_v16  ;;  %v6973_v58 = vrot.slane %v2725_v62, %v7392_v1 }
 0x2cc   : > { %v2628_v31 = vpop.permute.xlu1 %2627  ;;  %v2525_v15 = vadd.f32 %v2517_v43, %v6673_v12  ;;  %v2709_v10 = vadd.f32 %v2701_v14, %v6834_v4  ;;  %v2527_v9 = vadd.f32 %v2519_v26, %v6696_v23  ;;  %v2526_v44 = vadd.f32 %v2518_v0, %v6689_v51 }
 0x2cd   : > { %v2670_v6 = vadd.f32 %v2662_v36, %v2524_v47  ;;  %v2637_v20 = vsel %vm1198_vm7, %v2628_v31, %v2616_v2  ;;  %v2624_v27 = vpop.permute.xlu0 %2623  ;;  %v2712_v2 = vadd.f32 %v2704_v17, %v6840_v33  ;;  %v6990_v23 = vrot.slane %v2725_v62, %v7499_v25 }
 0x2ce   : > { %v2665_v49 = vmul.f32 %v6906_v38, %v2637_v20  ;;  %v2631_v48 = vsel %vm1198_vm7, %v2624_v27, %v2628_v31  ;;  %v2633_v55 = vsel %vm1198_vm7, %v2620_v19, %v2624_v27  ;;  %v6993_v26 = vrot.slane %v2725_v62, %v7461_v13 }
 0x2cf   : > { %v2717_v12 = vadd.f32 %v2709_v10, %v2670_v6  ;;  %v2663_v4 = vmul.f32 %v6940_v54, %v2633_v55  ;;  %v2664_v47 = vmul.f32 %v6943_v21, %v2631_v48  ;;  %v2710_v16 = vadd.f32 %v2702_v63, %v6827_v57 }
 0x2d0   : > { %v2673_v14 = vadd.f32 %v2665_v49, %v2527_v9  ;;  %v2476_v43 = vpop.permute.xlu1 %2475  ;;  %v2711_v19 = vadd.f32 %v2703_v45, %v6837_v52  ;;  %v2349_v63 = vmul.f32 %v6645_v18, %v6732_v53  ;;  %v2350_v45 = vmul.f32 %v6642_v59, %v6748_v8 }
 0x2d1   : > { %v2671_v51 = vadd.f32 %v2663_v4, %v2525_v15  ;;  %v2672_v0 = vadd.f32 %v2664_v47, %v2526_v44  ;;  %v2472_v7 = vpop.permute.xlu0 %2471  ;;  %v7001_v33 = vadd.f32 %v6990_v23, %v2717_v12  ;;  %v2351_v18 = vmul.f32 %v6653_v35, %v6744_v22  ;;  %v7534_v12 = vld [vmem:[#allocation33_spill] sm:$0xff]  ;;  %v7535_v22 = vld [vmem:[#allocation42_spill] sm:$0xff] }
 0x2d2   : > { %v2720_v36 = vadd.f32 %v2712_v2, %v2673_v14  ;;  %v2490_v15 = vsel %vm1095_vm6, %v2472_v7, %v2476_v43  ;;  %v2357_v4 = vadd.f32 %v2349_v63, %v7534_v12  ;;  %v2358_v47 = vadd.f32 %v2350_v45, %v7535_v22  ;;  %v7536_v14 = vld [vmem:[#allocation34_spill] sm:$0xff]  ;;  %v4238_v22 = vld [vmem:[#allocation9 + $0x74] ss:$8 sps:$4 sm:$0xff]  }
 0x2d3   : > { %v2719_v31 = vadd.f32 %v2711_v19, %v2672_v0  ;;  %v2718_v10 = vadd.f32 %v2710_v16, %v2671_v51  ;;  %v2755_v8 = vmax.f32 %v7001_v33, 0.0  ;;  %v2521_v44 = vmul.f32 %v6879_v28, %v2490_v15  ;;  %v7537_v0 = vld [vmem:[#allocation29_spill] sm:$0xff] }
 0x2d4   : > { %v2484_v6 = vpop.permute.xlu1 %2483  ;;  %v6998_v20 = vadd.f32 %v6973_v58, %v2720_v36  ;;  %v2708_v51 = vmul.f32 %v6866_v37, %v6913_v11  ;;  %v7538_v36 = vld [vmem:[#allocation83_spill] sm:$0xff] }
 0x2d5   : > { %v2492_v62 = vsel %vm1095_vm6, %v2484_v6, %v2472_v7  ;;  %v2480_v17 = vpop.permute.xlu0 %2479  ;;  %v7006_v57 = vadd.f32 %v6946_v50, %v2718_v10  ;;  %v7009_v52 = vadd.f32 %v6993_v26, %v2719_v31  ;;  %v2707_v7 = vmul.f32 %v6872_v29, %v7537_v0 }
 0x2d6   : > { %v2758_v27 = vmax.f32 %v6998_v20, 0.0  ;;  %v2520_v9 = vmul.f32 %v6884_v30, %v2492_v62  ;;  %v2486_v49 = vsel %vm1095_vm6, %v2480_v17, %v2484_v6  ;;  %v2488_v59 = vsel %vm1095_vm6, %v2476_v43, %v2480_v17 }
 0x2d7   : > { %v2756_v48 = vmax.f32 %v7006_v57, 0.0  ;;  %v2757_v55 = vmax.f32 %v7009_v52, 0.0  ;;  %v2352_v30 = vmul.f32 %v6648_v39, %v6738_v34  ;;  %v2359_v43 = vadd.f32 %v2351_v18, %v7536_v14  ;;  %v3277_v52 = vld [vmem:[%s7211_s10] sm:$0x3] }
 0x2d8   : > { %v2622_v53 = vpop.permute.xlu1 %2621  ;;  %2966 = vmatprep.mubr.f32.mxu1 %v2758_v27  ;;  %v2523_v2 = vmul.f32 %v6898_v24, %v2486_v49  ;;  %v2705_v34 = vmul.f32 %v6863_v42, %v6895_v61  ;;  %v2528_v28 = vadd.f32 %v2520_v9, %v2357_v4  ;;  %v2522_v16 = vmul.f32 %v6887_v40, %v2488_v59  ;;  %v7539_v9 = vld [vmem:[#allocation31_spill] sm:$0xff]  ;;  %v2993_v4 = vld [vmem:[%s7208_s7 + $0x18] sm:$0xff] }
 0x2d9   : > { %2891 = vmatprep.mubr.f32.mxu0 %v2756_v48  ;;  %v2618_v35 = vpop.permute.xlu0 %2617  ;;  %2967 = vmatmul.mubr.f32.vlgmr.msra.gmra.mxu1 %v2757_v55  ;;  %v2706_v24 = vmul.f32 %v6869_v3, %v6925_v41  ;;  %v2360_v31 = vadd.f32 %v2352_v30, %v7538_v36  ;;  %v2529_v6 = vadd.f32 %v2521_v44, %v2358_v47  ;;  %v4241_v47 = vld [vmem:[#allocation9 + $0x174] ss:$8 sps:$4 sm:$0xff]  }
 0x2da   : > { %v2636_v39 = vsel %vm1198_vm7, %v2618_v35, %v2622_v53  ;;  %2892 = vmatmul.mubr.f32.vlgmr.msra.gmra.mxu0 %v2755_v8  ;;  %v2713_v61 = vadd.f32 %v2705_v34, %v6954_v60  ;;  %v2530_v11 = vadd.f32 %v2522_v16, %v2359_v43  ;;  %v2716_v15 = vadd.f32 %v2708_v51, %v6963_v46 }
 0x2db   : > { %v2666_v19 = vmul.f32 %v6903_v56, %v2636_v39  ;;  %v2531_v56 = vadd.f32 %v2523_v2, %v2360_v31  ;;  %v2714_v60 = vadd.f32 %v2706_v24, %v7539_v9  ;;  %v2715_v49 = vadd.f32 %v2707_v7, %v6960_v32  ;;  %3120 = vmatprep.subr.mxu1 %v2993_v4  ;;  %v4242_v9 = vld [vmem:[#allocation9 + $0x60] ss:$8 sps:$4 sm:$0xff]   ;;  %v4265_v4 = vld [vmem:[#allocation9 + $0x134] ss:$8 sps:$4 sm:$0xff]  }
 0x2dc   : > { %v2630_v10 = vpop.permute.xlu1 %2629  ;;  %v3282_v20 = vrot.slane %v3277_v52, %v7499_v25 }
 0x2dd   : > { %v2674_v62 = vadd.f32 %v2666_v19, %v2528_v28  ;;  %v2638_v42 = vsel %vm1198_vm7, %v2630_v10, %v2618_v35  ;;  %v2626_v40 = vpop.permute.xlu0 %2625  ;;  %v2992_v35 = vld [vmem:[%s7208_s7 + $0x10] sm:$0xff] }
 0x2de   : > { %v2669_v37 = vmul.f32 %v6906_v38, %v2638_v42  ;;  %v2632_v3 = vsel %vm1198_vm7, %v2626_v40, %v2630_v10  ;;  %v2634_v29 = vsel %vm1198_vm7, %v2622_v53, %v2626_v40  ;;  %3121 = vmatpush1.msra.mxu1 %v2992_v35  ;;  %v4260_v35 = vld [vmem:[#allocation9 + $0x30] ss:$8 sps:$4 sm:$0xff]  }
 0x2df   : > { %v2667_v41 = vmul.f32 %v6940_v54, %v2634_v29  ;;  %v2668_v17 = vmul.f32 %v6943_v21, %v2632_v3  ;;  %v2721_v63 = vadd.f32 %v2713_v61, %v2674_v62  ;;  %3652 = vmatprep.subr.bf16.mxu1 %v4241_v47  ;;  %v2987_v3 = vld [vmem:[%s7207_s6] sm:$0x1]  ;;  %v4266_v47 = vld [vmem:[#allocation9 + $0x20] ss:$8 sps:$4 sm:$0xff]  }
 0x2e0   : > { %v2677_v45 = vadd.f32 %v2669_v37, %v2531_v56 }
 0x2e1   : > { %v2675_v38 = vadd.f32 %v2667_v41, %v2529_v6  ;;  %v2676_v18 = vadd.f32 %v2668_v17, %v2530_v11  ;;  %v7073_v54 = vadd.f32 %v6990_v23, %v2721_v63  ;;  %v2991_v23 = vld [vmem:[%s7208_s7 + $0x8] sm:$0xff]  ;;  %v4236_v41 = vld [vmem:[#allocation9 + $0x70] ss:$8 sps:$4 sm:$0xff]  }
 0x2e2   : > { %v2724_v59 = vadd.f32 %v2716_v15, %v2677_v45  ;;  %3049 = vmatprep.subr.mxu0 %v2991_v23  ;;  %v4239_v17 = vld [vmem:[#allocation9 + $0x170] ss:$8 sps:$4 sm:$0xff]   ;;  %v4244_v45 = vld [vmem:[#allocation9 + $0x64] ss:$8 sps:$4 sm:$0xff]   ;;  %v4257_v23 = vld [vmem:[#allocation9 + $0x140] ss:$8 sps:$4 sm:$0xff]  }
 0x2e3   : > { %v2722_v30 = vadd.f32 %v2714_v60, %v2675_v38  ;;  %v2723_v44 = vadd.f32 %v2715_v49, %v2676_v18  ;;  %v4247_v15 = vld [vmem:[#allocation9 + $0x164] ss:$8 sps:$4 sm:$0xff]   ;;  %v4245_v60 = vld [vmem:[#allocation9 + $0x160] ss:$8 sps:$4 sm:$0xff]   ;;  %v4250_v49 = vld [vmem:[#allocation9 + $0x54] ss:$8 sps:$4 sm:$0xff]  }
 0x2e4   : > { %v7070_v5 = vadd.f32 %v6973_v58, %v2724_v59  ;;  %v2759_v58 = vmax.f32 %v7073_v54, 0.0  ;;  %v4253_v38 = vld [vmem:[#allocation9 + $0x154] ss:$8 sps:$4 sm:$0xff]   ;;  %v4248_v18 = vld [vmem:[#allocation9 + $0x50] ss:$8 sps:$4 sm:$0xff]  }
 0x2e5   : > { %v7076_v21 = vadd.f32 %v6946_v50, %v2722_v30  ;;  %v7079_v46 = vadd.f32 %v6993_v26, %v2723_v44  ;;  %v7540_v50 = vmov 0.0   ;;  %v2990_v26 = vld [vmem:[%s7208_s7] sm:$0xff]  ;;  %v4251_v59 = vld [vmem:[#allocation9 + $0x150] ss:$8 sps:$4 sm:$0xff]   ;;  %v4256_v30 = vld [vmem:[#allocation9 + $0x44] ss:$8 sps:$4 sm:$0xff]  }
 0x2e6   : > { %v2762_v53 = vmax.f32 %v7070_v5, 0.0  ;;  %3050 = vmatpush1.msra.mxu0 %v2990_v26  ;;  %v4259_v44 = vld [vmem:[#allocation9 + $0x144] ss:$8 sps:$4 sm:$0xff]   ;;  %v4262_v26 = vld [vmem:[#allocation9 + $0x34] ss:$8 sps:$4 sm:$0xff]  }
 0x2e7   : > { %v2760_v32 = vmax.f32 %v7076_v21, 0.0  ;;  %v2761_v12 = vmax.f32 %v7079_v46, 0.0  ;;  %3609 = vmatprep.subr.bf16.mxu0 %v4238_v22  ;;  %v4263_v22 = vld [vmem:[#allocation9 + $0x130] ss:$8 sps:$4 sm:$0xff]  }
 0x2e8   : > { %2971 = vmatprep.mubr.f32.mxu1 %v2762_v53 }
 0x2e9   : > { %2896 = vmatprep.mubr.f32.mxu0 %v2760_v32  ;;  %2972 = vmatmul.mubr.f32.gmra.mxu1 %v2761_v12 }
 0x2ea   : > { %2897 = vmatmul.mubr.f32.gmra.mxu0 %v2759_v58  ;;  %3154 = vmatprep.mubr.f32.mxu1 %v7540_v50 }
 0x2eb   : > { %3083 = vmatprep.mubr.f32.mxu0 %v7540_v50  ;;  %v4254_v50 = vld [vmem:[#allocation9 + $0x40] ss:$8 sps:$4 sm:$0xff]  }
 0x399   : > { %v4045_v43 = vpop.f32.mrf.mxu1 }
 0x39a   : > { %v4007_v14 = vpop.f32.mrf.mxu0 }
 0x39b   : > { %v4046_v39 = vpop.f32.mrf.mxu1 }
 0x39c   : > { %v4008_v2 = vpop.f32.mrf.mxu0  ;;  %v4047_v28 = vadd.f32 %v4046_v39, %v4045_v43  ;;  %v4269_v43 = vld [vmem:[#allocation9 + $0x120] ss:$8 sps:$4 sm:$0xff]   ;;  %v4274_v39 = vld [vmem:[#allocation9 + $0x14] ss:$8 sps:$4 sm:$0xff]  }
 0x39d   : > { %v4009_v34 = vadd.f32 %v4008_v2, %v4007_v14  ;;  %v4268_v14 = vld [vmem:[#allocation9 + $0x24] ss:$8 sps:$4 sm:$0xff]  }
 0x39e   : > { %v4271_v2 = vld [vmem:[#allocation9 + $0x124] ss:$8 sps:$4 sm:$0xff]  }
 0x39f   : > { %v2969_v7 = vadd.f32 %v4047_v28, %v4009_v34  ;;  %v4272_v34 = vld [vmem:[#allocation9 + $0x10] ss:$8 sps:$4 sm:$0xff]   ;;  %v4277_v28 = vld [vmem:[#allocation9 + $0x114] ss:$8 sps:$4 sm:$0xff]  }
 0x3a1   : > { %v2978_v10 = vsel %vm2977_vm8, %v2969_v7, 0.0  ;;  %v4286_v7 = vld [vmem:[#allocation9 + $0xf4] ss:$8 sps:$4 sm:$0xff]  }
 0x3a9   : > { %v4048_v16 = vpop.f32.mrf.mxu1 }
 0x3aa   : > { %v4010_v19 = vpop.f32.mrf.mxu0 }
 0x3ab   : > { %v4049_v51 = vpop.f32.mrf.mxu1 }
 0x3ac   : > { %v4011_v24 = vpop.f32.mrf.mxu0  ;;  %v4050_v0 = vadd.f32 %v4049_v51, %v4048_v16  ;;  %v4275_v16 = vld [vmem:[#allocation9 + $0x110] ss:$8 sps:$4 sm:$0xff]   ;;  %v4283_v51 = vld [vmem:[#allocation9 + $0x104] ss:$8 sps:$4 sm:$0xff]  }
 0x3ad   : > { %v4012_v36 = vadd.f32 %v4011_v24, %v4010_v19  ;;  %v4280_v19 = vld [vmem:[#allocation9 + $0x4] ss:$8 sps:$4 sm:$0xff]   ;;  %v4278_v24 = vld [vmem:[#allocation9] ss:$8 sps:$4 sm:$0xff]  }
 0x3af   : > { %v2974_v31 = vadd.f32 %v4050_v0, %v4012_v36  ;;  %v4281_v0 = vld [vmem:[#allocation9 + $0x100] ss:$8 sps:$4 sm:$0xff]   ;;  %v4289_v36 = vld [vmem:[#allocation9 + $0x1f4] ss:$8 sps:$4 sm:$0xff]  }
 0x3b1   : > { %v2979_v6 = vsel %vm2977_vm8, %v2974_v31, 0.0  ;;  %v4284_v31 = vld [vmem:[#allocation9 + $0xf0] ss:$8 sps:$4 sm:$0xff]  }
 0x3b2   : > { %v2980_v62 = vadd.f32 %v2979_v6, %v2978_v10  ;;  %v4287_v10 = vld [vmem:[#allocation9 + $0x1f0] ss:$8 sps:$4 sm:$0xff]   ;;  %v4292_v6 = vld [vmem:[#allocation9 + $0xe4] ss:$8 sps:$4 sm:$0xff]  }
 0x3b4   : > { %v2981_v42 = vrot.slane %v2980_v62, 4 }
 0x3b6   : > { %v2982_v40 = vadd.f32 %v2981_v42, %v2980_v62  ;;  %v4295_v62 = vld [vmem:[#allocation9 + $0x1e4] ss:$8 sps:$4 sm:$0xff]   ;;  %v4290_v42 = vld [vmem:[#allocation9 + $0xe0] ss:$8 sps:$4 sm:$0xff]  }
 0x3b8   : > { %v2983_v61 = vrot.slane %v2982_v40, 2 }
 0x3ba   : > { %v2984_v56 = vadd.f32 %v2983_v61, %v2982_v40  ;;  %v4293_v40 = vld [vmem:[#allocation9 + $0x1e0] ss:$8 sps:$4 sm:$0xff]   ;;  %v4298_v61 = vld [vmem:[#allocation9 + $0xd4] ss:$8 sps:$4 sm:$0xff]  }
 0x3bc   : > { %v2985_v37 = vrot.slane %v2984_v56, 1 }
 0x3be   : > { %v2986_v29 = vadd.f32 %v2985_v37, %v2984_v56  ;;  %v4301_v56 = vld [vmem:[#allocation9 + $0x1d4] ss:$8 sps:$4 sm:$0xff]   ;;  %v4296_v37 = vld [vmem:[#allocation9 + $0xd0] ss:$8 sps:$4 sm:$0xff]  }
 0x3c0   : > { %v2988_v11 = vadd.f32 %v2987_v3, %v2986_v29  ;;  %v4299_v3 = vld [vmem:[#allocation9 + $0x1d0] ss:$8 sps:$4 sm:$0xff]   ;;  %v4304_v29 = vld [vmem:[#allocation9 + $0xc4] ss:$8 sps:$4 sm:$0xff]  }
 0x3c2   : > { %v2989_v63 = vmax.f32 %v2988_v11, 0.0  ;;  %v4307_v11 = vld [vmem:[#allocation9 + $0x1c4] ss:$8 sps:$4 sm:$0xff]  }
 0x3c4   : > { %3898 = vmatmul.mubr.msk.f32.vlgmr.msra.gmra.mxu0 %vm2977_vm8, %v2989_v63  ;;  %3899 = vmatmul.mubr.msk.f32.vlgmr.msra.gmra.mxu1 %vm2977_vm8, %v2989_v63  ;;  %v4310_v63 = vld [vmem:[#allocation9 + $0xb4] ss:$8 sps:$4 sm:$0xff]  }
 0x3c5   : > { %3610 = vmatpush1.bf16.msra.mxu0 %v4236_v41  ;;  %3653 = vmatpush1.bf16.msra.mxu1 %v4239_v17  ;;  %v4302_v41 = vld [vmem:[#allocation9 + $0xc0] ss:$8 sps:$4 sm:$0xff]  }
 0x3c6   : > { %3611 = vmatprep.subr.bf16.mxu0 %v4244_v45  ;;  %3654 = vmatprep.subr.bf16.mxu1 %v4247_v15  ;;  %v4305_v17 = vld [vmem:[#allocation9 + $0x1c0] ss:$8 sps:$4 sm:$0xff]   ;;  %v4313_v45 = vld [vmem:[#allocation9 + $0x1b4] ss:$8 sps:$4 sm:$0xff]   ;;  %v4308_v15 = vld [vmem:[#allocation9 + $0xb0] ss:$8 sps:$4 sm:$0xff]  }
 0x3c9   : > { %3612 = vmatpush1.bf16.msra.mxu0 %v4242_v9  ;;  %3655 = vmatpush1.bf16.msra.mxu1 %v4245_v60  ;;  %v4311_v9 = vld [vmem:[#allocation9 + $0x1b0] ss:$8 sps:$4 sm:$0xff]   ;;  %v4316_v60 = vld [vmem:[#allocation9 + $0xa4] ss:$8 sps:$4 sm:$0xff]  }
 0x3ca   : > { %3613 = vmatprep.subr.bf16.mxu0 %v4250_v49  ;;  %3656 = vmatprep.subr.bf16.mxu1 %v4253_v38  ;;  %v4319_v49 = vld [vmem:[#allocation9 + $0x1a4] ss:$8 sps:$4 sm:$0xff]   ;;  %v4314_v38 = vld [vmem:[#allocation9 + $0xa0] ss:$8 sps:$4 sm:$0xff]  }
 0x3cd   : > { %3614 = vmatpush1.bf16.msra.mxu0 %v4248_v18  ;;  %3657 = vmatpush1.bf16.msra.mxu1 %v4251_v59  ;;  %v4317_v18 = vld [vmem:[#allocation9 + $0x1a0] ss:$8 sps:$4 sm:$0xff]   ;;  %v4322_v59 = vld [vmem:[#allocation9 + $0x94] ss:$8 sps:$4 sm:$0xff]  }
 0x3ce   : > { %3615 = vmatprep.subr.bf16.mxu0 %v4256_v30  ;;  %3658 = vmatprep.subr.bf16.mxu1 %v4259_v44  ;;  %v4325_v30 = vld [vmem:[#allocation9 + $0x194] ss:$8 sps:$4 sm:$0xff]   ;;  %v4320_v44 = vld [vmem:[#allocation9 + $0x90] ss:$8 sps:$4 sm:$0xff]  }
 0x3d1   : > { %3616 = vmatpush1.bf16.msra.mxu0 %v4254_v50  ;;  %3659 = vmatpush1.bf16.msra.mxu1 %v4257_v23  ;;  %v4323_v50 = vld [vmem:[#allocation9 + $0x190] ss:$8 sps:$4 sm:$0xff]   ;;  %v4328_v23 = vld [vmem:[#allocation9 + $0x84] ss:$8 sps:$4 sm:$0xff]  }
 0x3d2   : > { %3617 = vmatprep.subr.bf16.mxu0 %v4262_v26  ;;  %3660 = vmatprep.subr.bf16.mxu1 %v4265_v4  ;;  %v4331_v26 = vld [vmem:[#allocation9 + $0x184] ss:$8 sps:$4 sm:$0xff]   ;;  %v4326_v4 = vld [vmem:[#allocation9 + $0x80] ss:$8 sps:$4 sm:$0xff]  }
 0x3d5   : > { %3618 = vmatpush1.bf16.msra.mxu0 %v4260_v35  ;;  %3661 = vmatpush1.bf16.msra.mxu1 %v4263_v22  ;;  %v4329_v35 = vld [vmem:[#allocation9 + $0x180] ss:$8 sps:$4 sm:$0xff]   ;;  %v2994_v22 = vld [vmem:[%s7209_s8] sm:$0xf] }
 0x3d6   : > { %3619 = vmatprep.subr.bf16.mxu0 %v4268_v14  ;;  %3662 = vmatprep.subr.bf16.mxu1 %v4271_v2  ;;  %v3007_v14 = vrot.slane %v2994_v22, %v7461_v13 }
 0x3d9   : > { %3620 = vmatpush1.bf16.msra.mxu0 %v4266_v47  ;;  %3663 = vmatpush1.bf16.msra.mxu1 %v4269_v43  ;;  %v2999_v47 = vrot.slane %v2994_v22, %v7499_v25  ;;  %v7541_v43 = vld [vmem:[#allocation20_spill] sm:$0xff] }
 0x3da   : > { %3621 = vmatprep.subr.bf16.mxu0 %v4274_v39  ;;  %3664 = vmatprep.subr.bf16.mxu1 %v4277_v28  ;;  %v3003_v2 = vrot.slane %v2994_v22, %v7541_v43  ;;  %v3011_v39 = vrot.slane %v2994_v22, %v7392_v1 }
 0x3dd   : > { %3622 = vmatpush1.bf16.msra.mxu0 %v4272_v34  ;;  %3665 = vmatpush1.bf16.msra.mxu1 %v4275_v16 }
 0x3de   : > { %3623 = vmatprep.subr.bf16.mxu0 %v4280_v19  ;;  %3666 = vmatprep.subr.bf16.mxu1 %v4283_v51 }
 0x3e1   : > { %3624 = vmatpush1.bf16.msra.mxu0 %v4278_v24  ;;  %3667 = vmatpush1.bf16.msra.mxu1 %v4281_v0 }
 0x3e2   : > { %3625 = vmatprep.subr.bf16.mxu0 %v4286_v7  ;;  %3668 = vmatprep.subr.bf16.mxu1 %v4289_v36 }
 0x3e5   : > { %3626 = vmatpush2.bf16.msra.mxu0 %v4284_v31  ;;  %3669 = vmatpush2.bf16.msra.mxu1 %v4287_v10 }
 0x3e6   : > { %3627 = vmatprep.subr.bf16.mxu0 %v4292_v6  ;;  %3670 = vmatprep.subr.bf16.mxu1 %v4295_v62 }
 0x3e9   : > { %3628 = vmatpush2.bf16.msra.mxu0 %v4290_v42  ;;  %3671 = vmatpush2.bf16.msra.mxu1 %v4293_v40 }
 0x3ea   : > { %3629 = vmatprep.subr.bf16.mxu0 %v4298_v61  ;;  %3672 = vmatprep.subr.bf16.mxu1 %v4301_v56 }
 0x3ed   : > { %3630 = vmatpush2.bf16.msra.mxu0 %v4296_v37  ;;  %3673 = vmatpush2.bf16.msra.mxu1 %v4299_v3 }
 0x3ee   : > { %3631 = vmatprep.subr.bf16.mxu0 %v4304_v29  ;;  %3674 = vmatprep.subr.bf16.mxu1 %v4307_v11 }
 0x3f1   : > { %3632 = vmatpush2.bf16.msra.mxu0 %v4302_v41  ;;  %3675 = vmatpush2.bf16.msra.mxu1 %v4305_v17 }
 0x3f2   : > { %3633 = vmatprep.subr.bf16.mxu0 %v4310_v63  ;;  %3676 = vmatprep.subr.bf16.mxu1 %v4313_v45 }
 0x3f5   : > { %3634 = vmatpush2.bf16.msra.mxu0 %v4308_v15  ;;  %3677 = vmatpush2.bf16.msra.mxu1 %v4311_v9 }
 0x3f6   : > { %3635 = vmatprep.subr.bf16.mxu0 %v4316_v60  ;;  %3678 = vmatprep.subr.bf16.mxu1 %v4319_v49 }
 0x3f9   : > { %3636 = vmatpush2.bf16.msra.mxu0 %v4314_v38  ;;  %3679 = vmatpush2.bf16.msra.mxu1 %v4317_v18 }
 0x3fa   : > { %3637 = vmatprep.subr.bf16.mxu0 %v4322_v59  ;;  %3680 = vmatprep.subr.bf16.mxu1 %v4325_v30 }
 0x3fd   : > { %3638 = vmatpush2.bf16.msra.mxu0 %v4320_v44  ;;  %3681 = vmatpush2.bf16.msra.mxu1 %v4323_v50  ;;  %v4348_v44 = vld [vmem:[%s4750_s29] sm:$0xff] }
 0x3fe   : > { %3639 = vmatprep.subr.bf16.mxu0 %v4328_v23  ;;  %3682 = vmatprep.subr.bf16.mxu1 %v4331_v26 }
 0x401   : > { %3640 = vmatpush2.bf16.msra.mxu0 %v4326_v4  ;;  %3683 = vmatpush2.bf16.msra.mxu1 %v4329_v35  ;;  %v4349_v35 = vld [vmem:[%s4750_s29 + $0x8] sm:$0xff] }
 0x484   : > { %v3085_v34 = vpop.f32.mrf.mxu0  ;;  %v3156_v28 = vpop.f32.mrf.mxu1 }
 0x485   : > { %v3086_v16 = vadd.f32 %v3085_v34, %v2999_v47  ;;  %v3157_v19 = vadd.f32 %v3156_v28, %v3007_v14  ;;  %v4351_v28 = vld [vmem:[%s4750_s29 + $0x18] sm:$0xff] }
 0x486   : > { %v3087_v51 = vpop.f32.mrf.mxu0  ;;  %v3158_v24 = vpop.f32.mrf.mxu1 }
 0x487   : > { %v3900_v0 = vmul.f32 -1.442695, %v3086_v16  ;;  %v3902_v7 = vmul.f32 -1.442695, %v3157_v19  ;;  %v3088_v36 = vadd.f32 %v3087_v51, %v3003_v2  ;;  %v3159_v31 = vadd.f32 %v3158_v24, %v3011_v39  ;;  %v4350_v2 = vld [vmem:[%s4750_s29 + $0x10] sm:$0xff] }
 0x489   : > { %4332 = vpow2.f32 %v3900_v0  ;;  %v3901_v10 = vmul.f32 -1.442695, %v3088_v36  ;;  %v3903_v6 = vmul.f32 -1.442695, %v3159_v31 }
 0x48a   : > { %4334 = vpow2.f32 %v3902_v7 }
 0x48b   : > { %4336 = vpow2.f32 %v3901_v10 }
 0x48c   : > { %4338 = vpow2.f32 %v3903_v6 }
 0x496   : > { %v4333_v13 = vpop.eup %4332 }
 0x497   : > { %v4335_v62 = vpop.eup %4334  ;;  %v3173_v42 = vadd.f32 1.0, %v4333_v13 }
 0x498   : > { %v4337_v1 = vpop.eup %4336  ;;  %v3175_v40 = vadd.f32 1.0, %v4335_v62 }
 0x499   : > { %v4339_v61 = vpop.eup %4338  ;;  %4340 = vrcp.f32 %v3173_v42  ;;  %v3174_v56 = vadd.f32 1.0, %v4337_v1 }
 0x49a   : > { %4342 = vrcp.f32 %v3175_v40  ;;  %v3176_v37 = vadd.f32 1.0, %v4339_v61 }
 0x49b   : > { %4344 = vrcp.f32 %v3174_v56 }
 0x49c   : > { %4346 = vrcp.f32 %v3176_v37 }
 0x4a6   : > { %v4341_v3 = vpop.eup %4340 }
 0x4a7   : > { %v4343_v29 = vpop.eup %4342  ;;  %v3188_v11 = vrot.slane %v4341_v3, %v7499_v25 }
 0x4a8   : > { %v4345_v41 = vpop.eup %4344  ;;  %v3196_v17 = vrot.slane %v4343_v29, %v7499_v25 }
 0x4a9   : > { %v4347_v63 = vpop.eup %4346  ;;  %v3192_v45 = vrot.slane %v4345_v41, %v7499_v25  ;;  %v3201_v9 = vmul.f32 %v3188_v11, %v2755_v8  ;;  %v3205_v60 = vmul.f32 %v3188_v11, %v2759_v58 }
 0x4aa   : > { %v3200_v15 = vrot.slane %v4347_v63, %v7499_v25  ;;  %v3203_v18 = vmul.f32 %v3196_v17, %v2757_v55  ;;  %v3207_v59 = vmul.f32 %v3196_v17, %v2761_v12 }
 0x4ab   : > { %v3202_v49 = vmul.f32 %v3192_v45, %v2756_v48  ;;  %v3206_v38 = vmul.f32 %v3192_v45, %v2760_v32  ;;  %v3209_v58 = vpack.c.bf16 %v3205_v60, %v3201_v9 }
 0x4ac   : > { %v3204_v30 = vmul.f32 %v3200_v15, %v2758_v27  ;;  %v3208_v33 = vmul.f32 %v3200_v15, %v2762_v53  ;;  %v3211_v57 = vpack.c.bf16 %v3207_v59, %v3203_v18  ;;  %v3286_v27 = vrot.slane %v3277_v52, %v7541_v43 }
 0x4ad   : > { %v3210_v8 = vpack.c.bf16 %v3206_v38, %v3202_v49 }
 0x4ae   : > { %v3212_v54 = vpack.c.bf16 %v3208_v33, %v3204_v30 }
 0x4af   : > { %3641 = vmatprep.mubr.bf16.mxu0 %v3210_v8 }
 0x4b0   : > { %3684 = vmatprep.mubr.bf16.mxu1 %v3212_v54  ;;  %3642 = vmatmul.mubr.bf16.vlgmr.msra.gmra.mxu0 %v3209_v58 }
 0x4b1   : > { %3685 = vmatmul.mubr.bf16.vlgmr.msra.gmra.mxu1 %v3211_v57 }
 0x570   : > { %v3643_v48 = vpop.f32.mrf.mxu0 }
 0x571   : > { %v3644_v55 = vadd.f32 %v3643_v48, %v3282_v20  ;;  %v3686_v5 = vpop.f32.mrf.mxu1 }
 0x572   : > { %v3645_v21 = vpop.f32.mrf.mxu0 }
 0x573   : > { %v3687_v46 = vadd.f32 %v3686_v5, %v3644_v55  ;;  %v3646_v53 = vadd.f32 %v3645_v21, %v3286_v27  ;;  %v3688_v32 = vpop.f32.mrf.mxu1 }
 0x574   : > { %v3647_v12 = vpop.f32.mrf.mxu0 }
 0x575   : > { %v3695_v50 = vadd.f32 %v4348_v44, %v3687_v46  ;;  %v3689_v23 = vadd.f32 %v3688_v32, %v3646_v53  ;;  %v3648_v26 = vadd.f32 %v3647_v12, %v3282_v20  ;;  %v3690_v4 = vpop.f32.mrf.mxu1 }
 0x576   : > { %v3649_v25 = vpop.f32.mrf.mxu0 }
 0x577   : > { %3699 = vst [vmem:[%s446_s23] sm:$0xff] %v3695_v50  ;;  %v3696_v22 = vadd.f32 %v4349_v35, %v3689_v23  ;;  %v3691_v47 = vadd.f32 %v3690_v4, %v3648_v26  ;;  %v3650_v14 = vadd.f32 %v3649_v25, %v3286_v27  ;;  %v3692_v43 = vpop.f32.mrf.mxu1 }
 0x579   : > { %3700 = vst [vmem:[%s446_s23 + $0x8] sm:$0xff] %v3696_v22  ;;  %v3697_v39 = vadd.f32 %v4350_v2, %v3691_v47  ;;  %v3693_v34 = vadd.f32 %v3692_v43, %v3650_v14 }
 0x57b   : > { %3701 = vst [vmem:[%s446_s23 + $0x10] sm:$0xff] %v3697_v39  ;;  %v3698_v16 = vadd.f32 %v4351_v28, %v3693_v34 }
 0x57d   : > { %3702 = vst [vmem:[%s446_s23 + $0x18] sm:$0xff] %v3698_v16 }
 0x57e   : > { %4471 = shalt.err (!%p4468_p3)
}
 0x57f   : > { %s4472_s29 = scalar_lea.hbm %s7157_s13, 512  ;;  %s4476_s22 = scalar_lea.hbm %s7212_s11, 1024 }
 0x580   : > { %p4473_p2 = scmp.ne.s32.totalorder %s7157_s13, %s4472_s29  ;;  %p4477_p5 = scmp.lt.s32.totalorder %s7157_s13, %s7212_s11 }
 0x581   : > { %p4478_p4 = scmp.lt.s32.totalorder %s4476_s22, %s4472_s29 }
 0x582   : > { %p4474_p9 = pnand %p4473_p2, %p7542_p12 }
 0x583   : > { %p4479_p6 = por %p4478_p4, %p4477_p5 }
 0x584   : > { %p4475_p11 = pneg %p4474_p9 }
 0x586   : > { %p4480_p8 = pnand %p4479_p6, %p4475_p11 }
 0x588   : > { %4483 = shalt.err (!%p4480_p8)
}
 0x589   : > { %s4547_s19 = smov 256   ;;  %s4548_s30 = smov 16  }
 0x58a   : > { %4065 = dma.vmem_to_hbm [thread:$0]  (%p7542_p12), %s7151_s12, 512, %s7157_s13, %s3704_s21, %s4547_s19, %s4547_s19, %s4548_s30  }
 0x58b PF: > { %s3732_s9 = sand.u32 1, %s4518_s17   ;;  %p7543_p7 = scmp.ne.s32.totalorder %s7299_s24, 0 }
 0x58c   : > { %p7544_p10 = scmp.ge.s32.totalorder %s4530_s20, 2  ;;  %s3733_s2 = scalar_lea.sflag [#allocation5], %s3732_s9 }
 0x58e   : > { %p4082_p13 = pnand %p7544_p10, %p7543_p7 }
 0x590   : > { %p4083_p0 = pneg %p4082_p13 }
 0x592   : > { %4513 = dma.done.wait (%p4083_p0), %s3733_s2, 512  }
 0x593   : > { %4515 = vsyncadd (%p4083_p0), %s3733_s2, 4294966784  ;;  %s7545_s3 = sld [smem:[#allocation16_spill]]  ;;  %p26_p1 = scmp.ge.s32.totalorder %s4689_s26, 4  }
 0x594   : > { %s7546_s19 = sld [smem:[#allocation17_spill]]  ;;  %s7547_s17 = smov %s4522_s18 }
 0x595   : > { %s7549_s20 = smov %s4689_s26  ;;  %28 = sbr.rel (!%p26_p1) target bundleno = 11 (0xb), region = 145 }
 0x599   : > { %s7548_s18 = smov %s7545_s3 }
 0x59a   :  { %3738 = vsyncpa [#allocation4], 1 }
 0x59b   :  { %3740 = vsyncpa [#allocation4 + $0x1], 1 }
 0x59c   :  { %3741 = vsyncpa [#allocation7], 1 }
 0x59d   :  { %3742 = vsyncpa [#allocation10], 1 }
 0x59e   :  { %3743 = vsyncpa [#allocation5], 1 }
 0x59f   :  { %3745 = vsyncpa [#allocation5 + $0x1], 1 }

</bundles_post_ra>
